<compile_context>
chip_gen: v6e
topology: v6e:2x2x1
jax: 0.10.0
libtpu: 0.0.40
codegen_flags: <defaults>
</compile_context>

<pallas_src>
import functools

import jax
import jax.numpy as jnp
from jax import lax
from jax.experimental import pallas as pl
from jax.experimental.pallas import tpu as pltpu


# ----------------------------------------------------------------------------- kernel
def cross_attn_kernel(h_ref, enc_ref, mask_ref, lnw_ref,
                      wq_ref, wkv_ref, wo_ref, out_ref,
                      *, n_heads, d_kv, eps, compact_rearrange):
    H, dkv = n_heads, d_kv
    inner = H * dkv
    TB, Lq, D = h_ref.shape
    Lk = enc_ref.shape[1]

    xf = h_ref[...].astype(jnp.float32)                      # (TB, Lq, D)
    lnw = lnw_ref[...]                                       # (1, D) f32

    # ---- T5-style RMSNorm (f32 math, no mean subtraction, no bias) ----
    var = jnp.mean(xf * xf, axis=-1, keepdims=True)
    normed = xf * lax.rsqrt(var + eps) * lnw                 # (TB, Lq, D) f32

    # ---- Fused projections: large 2-D bf16 MXU matmuls, f32 accumulation ----
    cdt = jnp.bfloat16 if compact_rearrange else jnp.float32
    normed2 = normed.reshape(TB * Lq, D).astype(jnp.bfloat16)
    enc2 = enc_ref[...].reshape(TB * Lk, D)                  # bf16 (cast in wrapper)
    q = jnp.dot(normed2, wq_ref[...],
                preferred_element_type=jnp.float32).astype(cdt)    # (TB*Lq, inner)
    kv = jnp.dot(enc2, wkv_ref[...],
                 preferred_element_type=jnp.float32).astype(cdt)   # (TB*Lk, 2*inner)

    # ---- Whole-slab head-major rearrangement (no per-batch-element loop) ----
    #   Q   -> (TB*H, Lq, dkv)
    #   K,V -> (TB*H, dkv, Lk)   (lane-dense along Lk)
    qh = jnp.transpose(q.reshape(TB, Lq, inner), (0, 2, 1))        # (TB, inner, Lq)
    qb = jnp.transpose(qh.reshape(TB * H, dkv, Lq), (0, 2, 1))     # (TB*H, Lq, dkv)
    kvt = jnp.transpose(kv.reshape(TB, Lk, 2 * inner), (0, 2, 1))  # (TB, 2*inner, Lk)
    kb = kvt[:, :inner, :].reshape(TB * H, dkv, Lk)
    vb = kvt[:, inner:, :].reshape(TB * H, dkv, Lk)

    # ---- Attention, batched over TB*H (T5: no 1/sqrt(d_kv) scaling) ----
    s = jnp.einsum('bqd,bdk->bqk',
                   qb.astype(jnp.bfloat16), kb.astype(jnp.bfloat16),
                   preferred_element_type=jnp.float32)             # (TB*H, Lq, Lk)

    # Additive mask (TB, Lm, Lk), Lm in {1, Lq}; broadcast over heads / queries once.
    m = mask_ref[...].astype(jnp.float32)
    s = (s.reshape(TB, H, Lq, Lk) + m[:, None]).reshape(TB * H, Lq, Lk)

    # Softmax (f32); normalization via the EUP approximate reciprocal.
    s = s - jnp.max(s, axis=-1, keepdims=True)
    p = jnp.exp(s)
    p = p * pl.reciprocal(jnp.sum(p, axis=-1, keepdims=True), approx=True)

    oh = jnp.einsum('bqk,bdk->bqd',
                    p.astype(jnp.bfloat16), vb.astype(jnp.bfloat16),
                    preferred_element_type=jnp.float32)            # (TB*H, Lq, dkv)
    oh = oh.astype(jnp.bfloat16).reshape(TB, H, Lq, dkv)

    # ---- Output projection folded over heads:
    #      H accumulating (TB*Lq, dkv) @ (dkv, D) MXU matmuls (no recombination
    #      transpose, no concatenate). ----
    o = None
    for h in range(H):                                             # small fixed trip count
        c = jnp.dot(oh[:, h].reshape(TB * Lq, dkv), wo_ref[h],
                    preferred_element_type=jnp.float32)
        o = c if o is None else o + c

    # Residual add (dropout = identity in eval mode).
    out_ref[...] = (xf + o.reshape(TB, Lq, D)).astype(out_ref.dtype)


# ----------------------------------------------------------------------------- helpers
def _normalize_mask(mask, B, Lq, Lk):
    """Validate and canonicalize the additive mask to (B, Lm, Lk), Lm in {1, Lq}."""
    m = jnp.asarray(mask)
    if m.ndim == 4:
        if (m.shape[0] != B or m.shape[1] != 1 or m.shape[2] not in (1, Lq)
                or m.shape[3] != Lk):
            raise ValueError(f"unsupported mask shape {m.shape}")
        m = m[:, 0]
    elif m.ndim == 3:
        if m.shape[0] != B or m.shape[1] not in (1, Lq) or m.shape[2] != Lk:
            raise ValueError(f"unsupported mask shape {m.shape}")
    elif m.ndim == 2:
        if m.shape != (B, Lk):
            raise ValueError(f"unsupported mask shape {m.shape}")
        m = m[:, None, :]
    else:
        raise ValueError(f"unsupported mask rank {m.ndim}")
    return m.astype(jnp.float32)


def _choose_tb(B, max_tb):
    """Batch-block size; keeps >= 2 grid steps when B > 1 (v7x: 2 TensorCores) and
    pads awkward B instead of degenerating to tb = 1."""
    cap = B if B <= 1 else (B + 1) // 2
    cap = max(1, min(cap, max_tb))
    div = max(t for t in range(1, cap + 1) if B % t == 0)
    if 2 * div >= cap:
        return div, B                       # divisor is good enough -> no padding
    b_pad = ((B + cap - 1) // cap) * cap
    return cap, b_pad


def _vmem_limit_bytes(tb, Lq, Lk, Lm, D, n_heads, d_kv, hid_itemsize):
    inner = n_heads * d_kv
    io = 2 * (2 * tb * Lq * D * hid_itemsize        # hidden in + out
              + 2 * tb * Lk * D                     # encoder (bf16)
              + 4 * tb * Lm * Lk)                   # mask (f32)
    weights = 2 * (2 * (D * inner + D * 2 * inner + inner * D) + 4 * D)
    scratch = (tb * Lq * inner * 10
               + tb * Lk * 2 * inner * 8
               + n_heads * tb * Lq * Lk * 12
               + n_heads * tb * Lq * d_kv * 6
               + tb * Lq * D * 8)
    est = int(1.25 * (io + weights + scratch))
    return int(max(32 * 2 ** 20, min(est, 96 * 2 ** 20)))


def _make_call(Bp, Lq, Lk, Lm, D, n_heads, d_kv, eps, tb, out_dtype,
               use_buffered, compact_rearrange, cost, vmem_limit):
    inner = n_heads * d_kv

    def wspec(shape):
        nd = len(shape)
        imap = lambda b, _nd=nd: (0,) * _nd
        if use_buffered:
            # Constant-index operands: single-buffered VMEM (fetched once).
            return pl.BlockSpec(shape, imap, pipeline_mode=pl.Buffered(1))
        return pl.BlockSpec(shape, imap)

    kernel = functools.partial(cross_attn_kernel, n_heads=n_heads, d_kv=d_kv,
                               eps=eps, compact_rearrange=compact_rearrange)

    return pl.pallas_call(
        kernel,
        out_shape=jax.ShapeDtypeStruct((Bp, Lq, D), out_dtype),
        grid_spec=pltpu.PrefetchScalarGridSpec(
            num_scalar_prefetch=0,
            grid=(Bp // tb,),
            in_specs=[
                pl.BlockSpec((tb, Lq, D), lambda b: (b, 0, 0)),    # hidden (f32)
                pl.BlockSpec((tb, Lk, D), lambda b: (b, 0, 0)),    # encoder (bf16)
                pl.BlockSpec((tb, Lm, Lk), lambda b: (b, 0, 0)),   # mask (f32, per-key)
                wspec((1, D)),                                     # RMSNorm weight
                wspec((D, inner)),                                 # Wq
                wspec((D, 2 * inner)),                             # fused Wk|Wv
                wspec((n_heads, d_kv, D)),                         # Wo, per-head
            ],
            out_specs=pl.BlockSpec((tb, Lq, D), lambda b: (b, 0, 0)),
        ),
        compiler_params=pltpu.CompilerParams(
            dimension_semantics=("parallel",),
            vmem_limit_bytes=vmem_limit),
        cost_estimate=cost,
    )


# ----------------------------------------------------------------------------- wrapper
def cross_attention(hidden, mask, encoder, ln_weight, wq, wk, wv, wo,
                    *, n_heads, d_kv, eps=1e-6, max_tb=32):
    B, Lq, D = hidden.shape
    Lk = encoder.shape[1]
    inner = n_heads * d_kv
    assert encoder.shape == (B, Lk, D)
    assert ln_weight.shape == (D,)
    assert wq.shape == (D, inner) and wk.shape == (D, inner)
    assert wv.shape == (D, inner) and wo.shape == (inner, D)

    mask_n = _normalize_mask(mask, B, Lq, Lk)          # (B, Lm, Lk) f32
    Lm = mask_n.shape[1]

    tb, Bp = _choose_tb(B, max_tb)

    # Operand prep (plain XLA, once per call).
    enc_b = encoder.astype(jnp.bfloat16)               # matmul-only operand -> bf16 DMA
    hidden_p, enc_p, mask_p = hidden, enc_b, mask_n
    if Bp != B:                                        # pad awkward batch sizes
        pad = Bp - B
        hidden_p = jnp.pad(hidden, ((0, pad), (0, 0), (0, 0)))
        enc_p = jnp.pad(enc_b, ((0, pad), (0, 0), (0, 0)))
        mask_p = jnp.pad(mask_n, ((0, pad), (0, 0), (0, 0)))

    lnw2d = ln_weight.reshape(1, D).astype(jnp.float32)
    wq_b = wq.astype(jnp.bfloat16)
    wkv_b = jnp.concatenate([wk, wv], axis=1).astype(jnp.bfloat16)      # fused K|V
    wo_h = wo.reshape(n_heads, d_kv, D).astype(jnp.bfloat16)            # per-head Wo

    flops = 2 * Bp * (Lq * D * inner                   # q projection
                      + Lk * D * 2 * inner             # fused k/v projection
                      + 2 * n_heads * Lq * Lk * d_kv   # scores + p@v
                      + Lq * inner * D)                # output projection
    bytes_accessed = (2 * hidden_p.size * hidden_p.dtype.itemsize
                      + enc_p.size * 2 + mask_p.size * 4 + lnw2d.size * 4
                      + (wq_b.size + wkv_b.size + wo_h.size) * 2)
    cost = pl.CostEstimate(flops=flops,
                           transcendentals=Bp * n_heads * Lq * Lk,
                           bytes_accessed=bytes_accessed)
    vmem_limit = _vmem_limit_bytes(tb, Lq, Lk, Lm, D, n_heads, d_kv,
                                   hidden.dtype.itemsize)

    def run(use_buffered, compact_rearrange):
        call = _make_call(Bp, Lq, Lk, Lm, D, n_heads, d_kv, eps, tb, hidden.dtype,
                          use_buffered, compact_rearrange, cost, vmem_limit)
        return jax.block_until_ready(
            call(hidden_p, enc_p, mask_p, lnw2d, wq_b, wkv_b, wo_h))

    # Preferred config first; graceful fallbacks if this JAX/Mosaic build rejects
    # pipeline_mode=Buffered(1) or 16-bit slab rearrangement.
    last_err = None
    out = None
    for use_buffered, compact in ((True, True), (False, True),
                                  (True, False), (False, False)):
        try:
            out = run(use_buffered, compact)
            break
        except Exception as e:                          # pragma: no cover
            last_err = e
    if out is None:
        raise last_err

    return out if Bp == B else out[:B]


# ----------------------------------------------------------------------------- reference
def cross_attention_ref(hidden, mask, encoder, ln_weight, wq, wk, wv, wo,
                        *, n_heads, d_kv, eps=1e-6):
    """Plain JAX (f32) reference mirroring the PyTorch CrossAttention in eval mode."""
    B, Lq, D = hidden.shape
    Lk = encoder.shape[1]
    var = jnp.mean(hidden ** 2, axis=-1, keepdims=True)
    normed = hidden * lax.rsqrt(var + eps) * ln_weight
    q = (normed @ wq).reshape(B, Lq, n_heads, d_kv).transpose(0, 2, 1, 3)
    k = (encoder @ wk).reshape(B, Lk, n_heads, d_kv).transpose(0, 2, 1, 3)
    v = (encoder @ wv).reshape(B, Lk, n_heads, d_kv).transpose(0, 2, 1, 3)
    scores = jnp.einsum('bhqd,bhkd->bhqk', q, k) + mask          # mask (B,1,1,Lk) broadcasts
    attw = jax.nn.softmax(scores, axis=-1)
    out = jnp.einsum('bhqk,bhkd->bhqd', attw, v)
    out = out.transpose(0, 2, 1, 3).reshape(B, Lq, n_heads * d_kv)
    return hidden + out @ wo


# ----------------------------------------------------------------------------- main
if __name__ == "__main__":
    # Small config consistent with the module structure.
    B, Lq, Lk = 4, 8, 16
    D, n_heads, d_kv = 32, 4, 8
    inner = n_heads * d_kv
    eps = 1e-6

    key = jax.random.PRNGKey(0)
    k_h, k_e, k_m, k_ln, k_q, k_k, k_v, k_o = jax.random.split(key, 8)

    hidden = jax.random.normal(k_h, (B, Lq, D), dtype=jnp.float32)
    encoder = jax.random.normal(k_e, (B, Lk, D), dtype=jnp.float32)
    # Additive key-padding mask, shaped exactly like the PyTorch module builds it.
    keep = jax.random.uniform(k_m, (B, 1, 1, Lk)) >= 0.2
    mask = jnp.where(keep, 0.0, -1e9).astype(jnp.float32)

    # Deterministic parameter init (weights pre-transposed to (in, out)).
    ln_weight = 1.0 + 0.1 * jax.random.normal(k_ln, (D,), dtype=jnp.float32)
    wq = jax.random.normal(k_q, (D, inner), dtype=jnp.float32) * 0.05
    wk = jax.random.normal(k_k, (D, inner), dtype=jnp.float32) * 0.05
    wv = jax.random.normal(k_v, (D, inner), dtype=jnp.float32) * 0.05
    wo = jax.random.normal(k_o, (inner, D), dtype=jnp.float32) * 0.05

    out = cross_attention(hidden, mask, encoder, ln_weight, wq, wk, wv, wo,
                          n_heads=n_heads, d_kv=d_kv, eps=eps)
    out = jax.block_until_ready(out)

    ref = cross_attention_ref(hidden, mask, encoder, ln_weight, wq, wk, wv, wo,
                              n_heads=n_heads, d_kv=d_kv, eps=eps)
    assert out.shape == (B, Lq, D)
    assert bool(jnp.all(jnp.isfinite(out)))
    max_err = float(jnp.max(jnp.abs(out - ref)))
    # bf16 MXU operands (f32 accumulation) + approx reciprocal -> loosened tolerance.
    assert jnp.allclose(out, ref, atol=2e-2, rtol=2e-2), \
        f"mismatch vs reference (max abs err {max_err:.3e})"

    print("KERNEL_OK")
</pallas_src>

<mosaic_0001>
module attributes {stable_mosaic.version = 11 : i64} {
  func.func @cross_attn_kernel(%arg0: i32, %arg1: memref<2x8x32xf32, #tpu.memory_space<vmem>>, %arg2: memref<2x16x32xbf16, #tpu.memory_space<vmem>>, %arg3: memref<2x1x16xf32, #tpu.memory_space<vmem>>, %arg4: memref<1x32xf32, #tpu.memory_space<vmem>>, %arg5: memref<32x32xbf16, #tpu.memory_space<vmem>>, %arg6: memref<32x64xbf16, #tpu.memory_space<vmem>>, %arg7: memref<4x8x32xbf16, #tpu.memory_space<vmem>>, %arg8: memref<2x8x32xf32, #tpu.memory_space<vmem>>) attributes {dimension_semantics = [#tpu.dimension_semantics<parallel>], iteration_bounds = array<i64: 2>, scalar_prefetch = 0 : i64, scratch_operands = 0 : i64, tpu.core_type = #tpu.core_type<tc>, window_params = [{transform_indices = @transform_0, window_bounds = array<i64: 2, 8, 32>}, {transform_indices = @transform_1, window_bounds = array<i64: 2, 16, 32>}, {transform_indices = @transform_2, window_bounds = array<i64: 2, 1, 16>}, {pipeline_mode = #tpu.pipeline_mode<synchronous>, transform_indices = @transform_3, window_bounds = array<i64: 1, 32>}, {pipeline_mode = #tpu.pipeline_mode<synchronous>, transform_indices = @transform_4, window_bounds = array<i64: 32, 32>}, {pipeline_mode = #tpu.pipeline_mode<synchronous>, transform_indices = @transform_5, window_bounds = array<i64: 32, 64>}, {pipeline_mode = #tpu.pipeline_mode<synchronous>, transform_indices = @transform_6, window_bounds = array<i64: 4, 8, 32>}, {transform_indices = @transform_7, window_bounds = array<i64: 2, 8, 32>}]} {
    %c0 = arith.constant 0 : index
    %c0_0 = arith.constant 0 : index
    %c0_1 = arith.constant 0 : index
    %0 = vector.load %arg1[%c0, %c0_0, %c0_1] : memref<2x8x32xf32, #tpu.memory_space<vmem>>, vector<2x8x32xf32>
    %c0_2 = arith.constant 0 : index
    %c0_3 = arith.constant 0 : index
    %1 = vector.load %arg4[%c0_2, %c0_3] : memref<1x32xf32, #tpu.memory_space<vmem>>, vector<1x32xf32>
    %2 = arith.mulf %0, %0 : vector<2x8x32xf32>
    %cst = arith.constant dense<0.000000e+00> : vector<2x8xf32>
    %3 = vector.multi_reduction <add>, %2, %cst [2] : vector<2x8x32xf32> to vector<2x8xf32>
    %4 = vector.shape_cast %3 : vector<2x8xf32> to vector<2x8x1xf32>
    %cst_4 = arith.constant 3.200000e+01 : f32
    %5 = vector.broadcast %cst_4 : f32 to vector<2x8x1xf32>
    %6 = arith.divf %4, %5 : vector<2x8x1xf32>
    %cst_5 = arith.constant 9.99999997E-7 : f32
    %7 = vector.broadcast %cst_5 : f32 to vector<2x8x1xf32>
    %8 = arith.addf %6, %7 : vector<2x8x1xf32>
    %9 = math.rsqrt %8 : vector<2x8x1xf32>
    %10 = vector.broadcast %9 : vector<2x8x1xf32> to vector<2x8x32xf32>
    %11 = arith.mulf %0, %10 : vector<2x8x32xf32>
    %12 = vector.shape_cast %1 : vector<1x32xf32> to vector<1x1x32xf32>
    %13 = vector.broadcast %12 : vector<1x1x32xf32> to vector<2x8x32xf32>
    %14 = arith.mulf %11, %13 : vector<2x8x32xf32>
    %15 = vector.shape_cast %14 : vector<2x8x32xf32> to vector<16x32xf32>
    %16 = arith.truncf %15 : vector<16x32xf32> to vector<16x32xbf16>
    %c0_6 = arith.constant 0 : index
    %c0_7 = arith.constant 0 : index
    %c0_8 = arith.constant 0 : index
    %17 = vector.load %arg2[%c0_6, %c0_7, %c0_8] : memref<2x16x32xbf16, #tpu.memory_space<vmem>>, vector<2x16x32xbf16>
    %18 = vector.shape_cast %17 : vector<2x16x32xbf16> to vector<32x32xbf16>
    %c0_9 = arith.constant 0 : index
    %c0_10 = arith.constant 0 : index
    %19 = vector.load %arg5[%c0_9, %c0_10] : memref<32x32xbf16, #tpu.memory_space<vmem>>, vector<32x32xbf16>
    %cst_11 = arith.constant dense<0.000000e+00> : vector<16x32xf32>
    %20 = tpu.matmul %16, %19, %cst_11 {dimension_numbers = #tpu.dot_dimension_numbers<[1], [0], [0], [1], [0, 0, 1, 1], [], []>} : vector<16x32xbf16>, vector<32x32xbf16>, vector<16x32xf32> -> vector<16x32xf32>
    %21 = arith.truncf %20 : vector<16x32xf32> to vector<16x32xbf16>
    %c0_12 = arith.constant 0 : index
    %c0_13 = arith.constant 0 : index
    %22 = vector.load %arg6[%c0_12, %c0_13] : memref<32x64xbf16, #tpu.memory_space<vmem>>, vector<32x64xbf16>
    %cst_14 = arith.constant dense<0.000000e+00> : vector<32x64xf32>
    %23 = tpu.matmul %18, %22, %cst_14 {dimension_numbers = #tpu.dot_dimension_numbers<[1], [0], [0], [1], [0, 0, 1, 1], [], []>} : vector<32x32xbf16>, vector<32x64xbf16>, vector<32x64xf32> -> vector<32x64xf32>
    %24 = arith.truncf %23 : vector<32x64xf32> to vector<32x64xbf16>
    %25 = vector.shape_cast %21 : vector<16x32xbf16> to vector<2x8x32xbf16>
    %26 = tpu.transpose %25, [0, 2, 1] : vector<2x8x32xbf16> -> vector<2x32x8xbf16>
    %27 = vector.shape_cast %26 : vector<2x32x8xbf16> to vector<8x8x8xbf16>
    %28 = tpu.transpose %27, [0, 2, 1] : vector<8x8x8xbf16> -> vector<8x8x8xbf16>
    %29 = vector.shape_cast %24 : vector<32x64xbf16> to vector<2x16x64xbf16>
    %30 = tpu.transpose %29, [0, 2, 1] : vector<2x16x64xbf16> -> vector<2x64x16xbf16>
    %31 = vector.extract_strided_slice %30 {offsets = [0, 0, 0], sizes = [2, 32, 16], strides = [1, 1, 1]} : vector<2x64x16xbf16> to vector<2x32x16xbf16>
    %32 = vector.shape_cast %31 : vector<2x32x16xbf16> to vector<8x8x16xbf16>
    %33 = vector.extract_strided_slice %30 {offsets = [0, 32, 0], sizes = [2, 32, 16], strides = [1, 1, 1]} : vector<2x64x16xbf16> to vector<2x32x16xbf16>
    %34 = vector.shape_cast %33 : vector<2x32x16xbf16> to vector<8x8x16xbf16>
    "tpu.trace_start"() <{level = 10 : i32, message = "bqd,bdk->bqk"}> : () -> ()
    %cst_15 = arith.constant dense<0.000000e+00> : vector<8x8x16xf32>
    %35 = tpu.matmul %28, %32, %cst_15 {dimension_numbers = #tpu.dot_dimension_numbers<[2], [1], [1], [2], [0, 0, 0, 1, 1, 2], [0], [0]>} : vector<8x8x8xbf16>, vector<8x8x16xbf16>, vector<8x8x16xf32> -> vector<8x8x16xf32>
    "tpu.trace_stop"() : () -> ()
    %c0_16 = arith.constant 0 : index
    %c0_17 = arith.constant 0 : index
    %c0_18 = arith.constant 0 : index
    %36 = vector.load %arg3[%c0_16, %c0_17, %c0_18] : memref<2x1x16xf32, #tpu.memory_space<vmem>>, vector<2x1x16xf32>
    %37 = vector.shape_cast %35 : vector<8x8x16xf32> to vector<2x4x8x16xf32>
    %38 = vector.shape_cast %36 : vector<2x1x16xf32> to vector<2x1x1x16xf32>
    %39 = vector.broadcast %38 : vector<2x1x1x16xf32> to vector<2x4x8x16xf32>
    %40 = arith.addf %37, %39 : vector<2x4x8x16xf32>
    %41 = vector.shape_cast %40 : vector<2x4x8x16xf32> to vector<8x8x16xf32>
    %cst_19 = arith.constant dense<0xFF800000> : vector<8x8xf32>
    %42 = vector.multi_reduction <maximumf>, %41, %cst_19 [2] : vector<8x8x16xf32> to vector<8x8xf32>
    %43 = vector.shape_cast %42 : vector<8x8xf32> to vector<8x8x1xf32>
    %44 = vector.broadcast %43 : vector<8x8x1xf32> to vector<8x8x16xf32>
    %45 = arith.subf %41, %44 : vector<8x8x16xf32>
    %46 = math.exp %45 : vector<8x8x16xf32>
    %cst_20 = arith.constant dense<0.000000e+00> : vector<8x8xf32>
    %47 = vector.multi_reduction <add>, %46, %cst_20 [2] : vector<8x8x16xf32> to vector<8x8xf32>
    %48 = vector.shape_cast %47 : vector<8x8xf32> to vector<8x8x1xf32>
    %49 = tpu.reciprocal %48 {approx = true} : vector<8x8x1xf32> -> vector<8x8x1xf32>
    %50 = vector.broadcast %49 : vector<8x8x1xf32> to vector<8x8x16xf32>
    %51 = arith.mulf %46, %50 : vector<8x8x16xf32>
    %52 = arith.truncf %51 : vector<8x8x16xf32> to vector<8x8x16xbf16>
    "tpu.trace_start"() <{level = 10 : i32, message = "bqk,bdk->bqd"}> : () -> ()
    %cst_21 = arith.constant dense<0.000000e+00> : vector<8x8x8xf32>
    %53 = tpu.matmul %52, %34, %cst_21 {dimension_numbers = #tpu.dot_dimension_numbers<[2], [2], [1], [1], [0, 0, 0, 1, 1, 1], [0], [0]>} : vector<8x8x16xbf16>, vector<8x8x16xbf16>, vector<8x8x8xf32> -> vector<8x8x8xf32>
    "tpu.trace_stop"() : () -> ()
    %54 = arith.truncf %53 : vector<8x8x8xf32> to vector<8x8x8xbf16>
    %55 = vector.shape_cast %54 : vector<8x8x8xbf16> to vector<2x4x8x8xbf16>
    %56 = vector.extract_strided_slice %55 {offsets = [0, 0, 0, 0], sizes = [2, 1, 8, 8], strides = [1, 1, 1, 1]} : vector<2x4x8x8xbf16> to vector<2x1x8x8xbf16>
    %57 = vector.shape_cast %56 : vector<2x1x8x8xbf16> to vector<2x8x8xbf16>
    %58 = vector.shape_cast %57 : vector<2x8x8xbf16> to vector<16x8xbf16>
    %c0_22 = arith.constant 0 : index
    %c0_23 = arith.constant 0 : index
    %c0_24 = arith.constant 0 : index
    %59 = vector.load %arg7[%c0_22, %c0_23, %c0_24] : memref<4x8x32xbf16, #tpu.memory_space<vmem>>, vector<1x8x32xbf16>
    %60 = vector.shape_cast %59 : vector<1x8x32xbf16> to vector<8x32xbf16>
    %cst_25 = arith.constant dense<0.000000e+00> : vector<16x32xf32>
    %61 = tpu.matmul %58, %60, %cst_25 {dimension_numbers = #tpu.dot_dimension_numbers<[1], [0], [0], [1], [0, 0, 1, 1], [], []>} : vector<16x8xbf16>, vector<8x32xbf16>, vector<16x32xf32> -> vector<16x32xf32>
    %62 = vector.extract_strided_slice %55 {offsets = [0, 1, 0, 0], sizes = [2, 1, 8, 8], strides = [1, 1, 1, 1]} : vector<2x4x8x8xbf16> to vector<2x1x8x8xbf16>
    %63 = vector.shape_cast %62 : vector<2x1x8x8xbf16> to vector<2x8x8xbf16>
    %64 = vector.shape_cast %63 : vector<2x8x8xbf16> to vector<16x8xbf16>
    %c1 = arith.constant 1 : index
    %c0_26 = arith.constant 0 : index
    %c0_27 = arith.constant 0 : index
    %65 = vector.load %arg7[%c1, %c0_26, %c0_27] : memref<4x8x32xbf16, #tpu.memory_space<vmem>>, vector<1x8x32xbf16>
    %66 = vector.shape_cast %65 : vector<1x8x32xbf16> to vector<8x32xbf16>
    %cst_28 = arith.constant dense<0.000000e+00> : vector<16x32xf32>
    %67 = tpu.matmul %64, %66, %cst_28 {dimension_numbers = #tpu.dot_dimension_numbers<[1], [0], [0], [1], [0, 0, 1, 1], [], []>} : vector<16x8xbf16>, vector<8x32xbf16>, vector<16x32xf32> -> vector<16x32xf32>
    %68 = arith.addf %61, %67 : vector<16x32xf32>
    %69 = vector.extract_strided_slice %55 {offsets = [0, 2, 0, 0], sizes = [2, 1, 8, 8], strides = [1, 1, 1, 1]} : vector<2x4x8x8xbf16> to vector<2x1x8x8xbf16>
    %70 = vector.shape_cast %69 : vector<2x1x8x8xbf16> to vector<2x8x8xbf16>
    %71 = vector.shape_cast %70 : vector<2x8x8xbf16> to vector<16x8xbf16>
    %c2 = arith.constant 2 : index
    %c0_29 = arith.constant 0 : index
    %c0_30 = arith.constant 0 : index
    %72 = vector.load %arg7[%c2, %c0_29, %c0_30] : memref<4x8x32xbf16, #tpu.memory_space<vmem>>, vector<1x8x32xbf16>
    %73 = vector.shape_cast %72 : vector<1x8x32xbf16> to vector<8x32xbf16>
    %cst_31 = arith.constant dense<0.000000e+00> : vector<16x32xf32>
    %74 = tpu.matmul %71, %73, %cst_31 {dimension_numbers = #tpu.dot_dimension_numbers<[1], [0], [0], [1], [0, 0, 1, 1], [], []>} : vector<16x8xbf16>, vector<8x32xbf16>, vector<16x32xf32> -> vector<16x32xf32>
    %75 = arith.addf %68, %74 : vector<16x32xf32>
    %76 = vector.extract_strided_slice %55 {offsets = [0, 3, 0, 0], sizes = [2, 1, 8, 8], strides = [1, 1, 1, 1]} : vector<2x4x8x8xbf16> to vector<2x1x8x8xbf16>
    %77 = vector.shape_cast %76 : vector<2x1x8x8xbf16> to vector<2x8x8xbf16>
    %78 = vector.shape_cast %77 : vector<2x8x8xbf16> to vector<16x8xbf16>
    %c3 = arith.constant 3 : index
    %c0_32 = arith.constant 0 : index
    %c0_33 = arith.constant 0 : index
    %79 = vector.load %arg7[%c3, %c0_32, %c0_33] : memref<4x8x32xbf16, #tpu.memory_space<vmem>>, vector<1x8x32xbf16>
    %80 = vector.shape_cast %79 : vector<1x8x32xbf16> to vector<8x32xbf16>
    %cst_34 = arith.constant dense<0.000000e+00> : vector<16x32xf32>
    %81 = tpu.matmul %78, %80, %cst_34 {dimension_numbers = #tpu.dot_dimension_numbers<[1], [0], [0], [1], [0, 0, 1, 1], [], []>} : vector<16x8xbf16>, vector<8x32xbf16>, vector<16x32xf32> -> vector<16x32xf32>
    %82 = arith.addf %75, %81 : vector<16x32xf32>
    %83 = vector.shape_cast %82 : vector<16x32xf32> to vector<2x8x32xf32>
    %84 = arith.addf %0, %83 : vector<2x8x32xf32>
    %c0_35 = arith.constant 0 : index
    %c0_36 = arith.constant 0 : index
    %c0_37 = arith.constant 0 : index
    %85 = vector.load %arg8[%c0_35, %c0_36, %c0_37] : memref<2x8x32xf32, #tpu.memory_space<vmem>>, vector<2x8x32xf32>
    tpu.vector_store %arg8[%c0_35, %c0_36, %c0_37], %84 {strides = array<i32>} : memref<2x8x32xf32, #tpu.memory_space<vmem>>, vector<2x8x32xf32>,
    return
  }
  func.func @transform_0(%arg0: i32) -> (i32, i32, i32) {
    %c0_i32 = arith.constant 0 : i32
    %c0_i32_0 = arith.constant 0 : i32
    %c0_i32_1 = arith.constant 0 : i32
    return %arg0, %c0_i32, %c0_i32_0 : i32, i32, i32
  }
  func.func @transform_1(%arg0: i32) -> (i32, i32, i32) {
    %c0_i32 = arith.constant 0 : i32
    %c0_i32_0 = arith.constant 0 : i32
    %c0_i32_1 = arith.constant 0 : i32
    return %arg0, %c0_i32, %c0_i32_0 : i32, i32, i32
  }
  func.func @transform_2(%arg0: i32) -> (i32, i32, i32) {
    %c0_i32 = arith.constant 0 : i32
    %c0_i32_0 = arith.constant 0 : i32
    %c0_i32_1 = arith.constant 0 : i32
    return %arg0, %c0_i32, %c0_i32_0 : i32, i32, i32
  }
  func.func @transform_3(%arg0: i32) -> (i32, i32) {
    %c0_i32 = arith.constant 0 : i32
    %c0_i32_0 = arith.constant 0 : i32
    %c0_i32_1 = arith.constant 0 : i32
    return %c0_i32, %c0_i32_0 : i32, i32
  }
  func.func @transform_4(%arg0: i32) -> (i32, i32) {
    %c0_i32 = arith.constant 0 : i32
    %c0_i32_0 = arith.constant 0 : i32
    %c0_i32_1 = arith.constant 0 : i32
    return %c0_i32, %c0_i32_0 : i32, i32
  }
  func.func @transform_5(%arg0: i32) -> (i32, i32) {
    %c0_i32 = arith.constant 0 : i32
    %c0_i32_0 = arith.constant 0 : i32
    %c0_i32_1 = arith.constant 0 : i32
    return %c0_i32, %c0_i32_0 : i32, i32
  }
  func.func @transform_6(%arg0: i32) -> (i32, i32, i32) {
    %c0_i32 = arith.constant 0 : i32
    %c0_i32_0 = arith.constant 0 : i32
    %c0_i32_1 = arith.constant 0 : i32
    %c0_i32_2 = arith.constant 0 : i32
    return %c0_i32, %c0_i32_0, %c0_i32_1 : i32, i32, i32
  }
  func.func @transform_7(%arg0: i32) -> (i32, i32, i32) {
    %c0_i32 = arith.constant 0 : i32
    %c0_i32_0 = arith.constant 0 : i32
    %c0_i32_1 = arith.constant 0 : i32
    return %arg0, %c0_i32, %c0_i32_0 : i32, i32, i32
  }
}

module attributes {stable_mosaic.version = 11 : i64} {
  func.func @cross_attn_kernel(%arg0: i32, %arg1: memref<2x8x32xf32, #tpu.memory_space<vmem>>, %arg2: memref<2x16x32xbf16, #tpu.memory_space<vmem>>, %arg3: memref<2x1x16xf32, #tpu.memory_space<vmem>>, %arg4: memref<1x32xf32, #tpu.memory_space<vmem>>, %arg5: memref<32x32xbf16, #tpu.memory_space<vmem>>, %arg6: memref<32x64xbf16, #tpu.memory_space<vmem>>, %arg7: memref<4x8x32xbf16, #tpu.memory_space<vmem>>, %arg8: memref<2x8x32xf32, #tpu.memory_space<vmem>>) attributes {dimension_semantics = [#tpu.dimension_semantics<parallel>], iteration_bounds = array<i64: 2>, scalar_prefetch = 0 : i64, scratch_operands = 0 : i64, tpu.core_type = #tpu.core_type<tc>, window_params = [{transform_indices = @transform_0, window_bounds = array<i64: 2, 8, 32>}, {transform_indices = @transform_1, window_bounds = array<i64: 2, 16, 32>}, {transform_indices = @transform_2, window_bounds = array<i64: 2, 1, 16>}, {pipeline_mode = #tpu.pipeline_mode<synchronous>, transform_indices = @transform_3, window_bounds = array<i64: 1, 32>}, {pipeline_mode = #tpu.pipeline_mode<synchronous>, transform_indices = @transform_4, window_bounds = array<i64: 32, 32>}, {pipeline_mode = #tpu.pipeline_mode<synchronous>, transform_indices = @transform_5, window_bounds = array<i64: 32, 64>}, {pipeline_mode = #tpu.pipeline_mode<synchronous>, transform_indices = @transform_6, window_bounds = array<i64: 4, 8, 32>}, {transform_indices = @transform_7, window_bounds = array<i64: 2, 8, 32>}]} {
    %c0 = arith.constant 0 : index
    %c0_0 = arith.constant 0 : index
    %c0_1 = arith.constant 0 : index
    %0 = vector.load %arg1[%c0, %c0_0, %c0_1] : memref<2x8x32xf32, #tpu.memory_space<vmem>>, vector<2x8x32xf32>
    %c0_2 = arith.constant 0 : index
    %c0_3 = arith.constant 0 : index
    %1 = vector.load %arg4[%c0_2, %c0_3] : memref<1x32xf32, #tpu.memory_space<vmem>>, vector<1x32xf32>
    %2 = arith.mulf %0, %0 : vector<2x8x32xf32>
    %cst = arith.constant dense<0.000000e+00> : vector<2x8xf32>
    %3 = vector.multi_reduction <add>, %2, %cst [2] : vector<2x8x32xf32> to vector<2x8xf32>
    %4 = vector.shape_cast %3 : vector<2x8xf32> to vector<2x8x1xf32>
    %cst_4 = arith.constant 3.200000e+01 : f32
    %5 = vector.broadcast %cst_4 : f32 to vector<2x8x1xf32>
    %6 = arith.divf %4, %5 : vector<2x8x1xf32>
    %cst_5 = arith.constant 9.99999997E-7 : f32
    %7 = vector.broadcast %cst_5 : f32 to vector<2x8x1xf32>
    %8 = arith.addf %6, %7 : vector<2x8x1xf32>
    %9 = math.rsqrt %8 : vector<2x8x1xf32>
    %10 = vector.broadcast %9 : vector<2x8x1xf32> to vector<2x8x32xf32>
    %11 = arith.mulf %0, %10 : vector<2x8x32xf32>
    %12 = vector.shape_cast %1 : vector<1x32xf32> to vector<1x1x32xf32>
    %13 = vector.broadcast %12 : vector<1x1x32xf32> to vector<2x8x32xf32>
    %14 = arith.mulf %11, %13 : vector<2x8x32xf32>
    %15 = vector.shape_cast %14 : vector<2x8x32xf32> to vector<16x32xf32>
    %16 = arith.truncf %15 : vector<16x32xf32> to vector<16x32xbf16>
    %c0_6 = arith.constant 0 : index
    %c0_7 = arith.constant 0 : index
    %c0_8 = arith.constant 0 : index
    %17 = vector.load %arg2[%c0_6, %c0_7, %c0_8] : memref<2x16x32xbf16, #tpu.memory_space<vmem>>, vector<2x16x32xbf16>
    %18 = vector.shape_cast %17 : vector<2x16x32xbf16> to vector<32x32xbf16>
    %c0_9 = arith.constant 0 : index
    %c0_10 = arith.constant 0 : index
    %19 = vector.load %arg5[%c0_9, %c0_10] : memref<32x32xbf16, #tpu.memory_space<vmem>>, vector<32x32xbf16>
    %cst_11 = arith.constant dense<0.000000e+00> : vector<16x32xf32>
    %20 = tpu.matmul %16, %19, %cst_11 {dimension_numbers = #tpu.dot_dimension_numbers<[1], [0], [0], [1], [0, 0, 1, 1], [], []>} : vector<16x32xbf16>, vector<32x32xbf16>, vector<16x32xf32> -> vector<16x32xf32>
    %21 = arith.truncf %20 : vector<16x32xf32> to vector<16x32xbf16>
    %c0_12 = arith.constant 0 : index
    %c0_13 = arith.constant 0 : index
    %22 = vector.load %arg6[%c0_12, %c0_13] : memref<32x64xbf16, #tpu.memory_space<vmem>>, vector<32x64xbf16>
    %cst_14 = arith.constant dense<0.000000e+00> : vector<32x64xf32>
    %23 = tpu.matmul %18, %22, %cst_14 {dimension_numbers = #tpu.dot_dimension_numbers<[1], [0], [0], [1], [0, 0, 1, 1], [], []>} : vector<32x32xbf16>, vector<32x64xbf16>, vector<32x64xf32> -> vector<32x64xf32>
    %24 = arith.truncf %23 : vector<32x64xf32> to vector<32x64xbf16>
    %25 = vector.shape_cast %21 : vector<16x32xbf16> to vector<2x8x32xbf16>
    %26 = tpu.transpose %25, [0, 2, 1] : vector<2x8x32xbf16> -> vector<2x32x8xbf16>
    %27 = vector.shape_cast %26 : vector<2x32x8xbf16> to vector<8x8x8xbf16>
    %28 = tpu.transpose %27, [0, 2, 1] : vector<8x8x8xbf16> -> vector<8x8x8xbf16>
    %29 = vector.shape_cast %24 : vector<32x64xbf16> to vector<2x16x64xbf16>
    %30 = tpu.transpose %29, [0, 2, 1] : vector<2x16x64xbf16> -> vector<2x64x16xbf16>
    %31 = vector.extract_strided_slice %30 {offsets = [0, 0, 0], sizes = [2, 32, 16], strides = [1, 1, 1]} : vector<2x64x16xbf16> to vector<2x32x16xbf16>
    %32 = vector.shape_cast %31 : vector<2x32x16xbf16> to vector<8x8x16xbf16>
    %33 = vector.extract_strided_slice %30 {offsets = [0, 32, 0], sizes = [2, 32, 16], strides = [1, 1, 1]} : vector<2x64x16xbf16> to vector<2x32x16xbf16>
    %34 = vector.shape_cast %33 : vector<2x32x16xbf16> to vector<8x8x16xbf16>
    "tpu.trace_start"() <{level = 10 : i32, message = "bqd,bdk->bqk"}> : () -> ()
    %cst_15 = arith.constant dense<0.000000e+00> : vector<8x8x16xf32>
    %35 = tpu.matmul %28, %32, %cst_15 {dimension_numbers = #tpu.dot_dimension_numbers<[2], [1], [1], [2], [0, 0, 0, 1, 1, 2], [0], [0]>} : vector<8x8x8xbf16>, vector<8x8x16xbf16>, vector<8x8x16xf32> -> vector<8x8x16xf32>
    "tpu.trace_stop"() : () -> ()
    %c0_16 = arith.constant 0 : index
    %c0_17 = arith.constant 0 : index
    %c0_18 = arith.constant 0 : index
    %36 = vector.load %arg3[%c0_16, %c0_17, %c0_18] : memref<2x1x16xf32, #tpu.memory_space<vmem>>, vector<2x1x16xf32>
    %37 = vector.shape_cast %35 : vector<8x8x16xf32> to vector<2x4x8x16xf32>
    %38 = vector.shape_cast %36 : vector<2x1x16xf32> to vector<2x1x1x16xf32>
    %39 = vector.broadcast %38 : vector<2x1x1x16xf32> to vector<2x4x8x16xf32>
    %40 = arith.addf %37, %39 : vector<2x4x8x16xf32>
    %41 = vector.shape_cast %40 : vector<2x4x8x16xf32> to vector<8x8x16xf32>
    %cst_19 = arith.constant dense<0xFF800000> : vector<8x8xf32>
    %42 = vector.multi_reduction <maximumf>, %41, %cst_19 [2] : vector<8x8x16xf32> to vector<8x8xf32>
    %43 = vector.shape_cast %42 : vector<8x8xf32> to vector<8x8x1xf32>
    %44 = vector.broadcast %43 : vector<8x8x1xf32> to vector<8x8x16xf32>
    %45 = arith.subf %41, %44 : vector<8x8x16xf32>
    %46 = math.exp %45 : vector<8x8x16xf32>
    %cst_20 = arith.constant dense<0.000000e+00> : vector<8x8xf32>
    %47 = vector.multi_reduction <add>, %46, %cst_20 [2] : vector<8x8x16xf32> to vector<8x8xf32>
    %48 = vector.shape_cast %47 : vector<8x8xf32> to vector<8x8x1xf32>
    %49 = tpu.reciprocal %48 {approx = true} : vector<8x8x1xf32> -> vector<8x8x1xf32>
    %50 = vector.broadcast %49 : vector<8x8x1xf32> to vector<8x8x16xf32>
    %51 = arith.mulf %46, %50 : vector<8x8x16xf32>
    %52 = arith.truncf %51 : vector<8x8x16xf32> to vector<8x8x16xbf16>
    "tpu.trace_start"() <{level = 10 : i32, message = "bqk,bdk->bqd"}> : () -> ()
    %cst_21 = arith.constant dense<0.000000e+00> : vector<8x8x8xf32>
    %53 = tpu.matmul %52, %34, %cst_21 {dimension_numbers = #tpu.dot_dimension_numbers<[2], [2], [1], [1], [0, 0, 0, 1, 1, 1], [0], [0]>} : vector<8x8x16xbf16>, vector<8x8x16xbf16>, vector<8x8x8xf32> -> vector<8x8x8xf32>
    "tpu.trace_stop"() : () -> ()
    %54 = arith.truncf %53 : vector<8x8x8xf32> to vector<8x8x8xbf16>
    %55 = vector.shape_cast %54 : vector<8x8x8xbf16> to vector<2x4x8x8xbf16>
    %56 = vector.extract_strided_slice %55 {offsets = [0, 0, 0, 0], sizes = [2, 1, 8, 8], strides = [1, 1, 1, 1]} : vector<2x4x8x8xbf16> to vector<2x1x8x8xbf16>
    %57 = vector.shape_cast %56 : vector<2x1x8x8xbf16> to vector<2x8x8xbf16>
    %58 = vector.shape_cast %57 : vector<2x8x8xbf16> to vector<16x8xbf16>
    %c0_22 = arith.constant 0 : index
    %c0_23 = arith.constant 0 : index
    %c0_24 = arith.constant 0 : index
    %59 = vector.load %arg7[%c0_22, %c0_23, %c0_24] : memref<4x8x32xbf16, #tpu.memory_space<vmem>>, vector<1x8x32xbf16>
    %60 = vector.shape_cast %59 : vector<1x8x32xbf16> to vector<8x32xbf16>
    %cst_25 = arith.constant dense<0.000000e+00> : vector<16x32xf32>
    %61 = tpu.matmul %58, %60, %cst_25 {dimension_numbers = #tpu.dot_dimension_numbers<[1], [0], [0], [1], [0, 0, 1, 1], [], []>} : vector<16x8xbf16>, vector<8x32xbf16>, vector<16x32xf32> -> vector<16x32xf32>
    %62 = vector.extract_strided_slice %55 {offsets = [0, 1, 0, 0], sizes = [2, 1, 8, 8], strides = [1, 1, 1, 1]} : vector<2x4x8x8xbf16> to vector<2x1x8x8xbf16>
    %63 = vector.shape_cast %62 : vector<2x1x8x8xbf16> to vector<2x8x8xbf16>
    %64 = vector.shape_cast %63 : vector<2x8x8xbf16> to vector<16x8xbf16>
    %c1 = arith.constant 1 : index
    %c0_26 = arith.constant 0 : index
    %c0_27 = arith.constant 0 : index
    %65 = vector.load %arg7[%c1, %c0_26, %c0_27] : memref<4x8x32xbf16, #tpu.memory_space<vmem>>, vector<1x8x32xbf16>
    %66 = vector.shape_cast %65 : vector<1x8x32xbf16> to vector<8x32xbf16>
    %cst_28 = arith.constant dense<0.000000e+00> : vector<16x32xf32>
    %67 = tpu.matmul %64, %66, %cst_28 {dimension_numbers = #tpu.dot_dimension_numbers<[1], [0], [0], [1], [0, 0, 1, 1], [], []>} : vector<16x8xbf16>, vector<8x32xbf16>, vector<16x32xf32> -> vector<16x32xf32>
    %68 = arith.addf %61, %67 : vector<16x32xf32>
    %69 = vector.extract_strided_slice %55 {offsets = [0, 2, 0, 0], sizes = [2, 1, 8, 8], strides = [1, 1, 1, 1]} : vector<2x4x8x8xbf16> to vector<2x1x8x8xbf16>
    %70 = vector.shape_cast %69 : vector<2x1x8x8xbf16> to vector<2x8x8xbf16>
    %71 = vector.shape_cast %70 : vector<2x8x8xbf16> to vector<16x8xbf16>
    %c2 = arith.constant 2 : index
    %c0_29 = arith.constant 0 : index
    %c0_30 = arith.constant 0 : index
    %72 = vector.load %arg7[%c2, %c0_29, %c0_30] : memref<4x8x32xbf16, #tpu.memory_space<vmem>>, vector<1x8x32xbf16>
    %73 = vector.shape_cast %72 : vector<1x8x32xbf16> to vector<8x32xbf16>
    %cst_31 = arith.constant dense<0.000000e+00> : vector<16x32xf32>
    %74 = tpu.matmul %71, %73, %cst_31 {dimension_numbers = #tpu.dot_dimension_numbers<[1], [0], [0], [1], [0, 0, 1, 1], [], []>} : vector<16x8xbf16>, vector<8x32xbf16>, vector<16x32xf32> -> vector<16x32xf32>
    %75 = arith.addf %68, %74 : vector<16x32xf32>
    %76 = vector.extract_strided_slice %55 {offsets = [0, 3, 0, 0], sizes = [2, 1, 8, 8], strides = [1, 1, 1, 1]} : vector<2x4x8x8xbf16> to vector<2x1x8x8xbf16>
    %77 = vector.shape_cast %76 : vector<2x1x8x8xbf16> to vector<2x8x8xbf16>
    %78 = vector.shape_cast %77 : vector<2x8x8xbf16> to vector<16x8xbf16>
    %c3 = arith.constant 3 : index
    %c0_32 = arith.constant 0 : index
    %c0_33 = arith.constant 0 : index
    %79 = vector.load %arg7[%c3, %c0_32, %c0_33] : memref<4x8x32xbf16, #tpu.memory_space<vmem>>, vector<1x8x32xbf16>
    %80 = vector.shape_cast %79 : vector<1x8x32xbf16> to vector<8x32xbf16>
    %cst_34 = arith.constant dense<0.000000e+00> : vector<16x32xf32>
    %81 = tpu.matmul %78, %80, %cst_34 {dimension_numbers = #tpu.dot_dimension_numbers<[1], [0], [0], [1], [0, 0, 1, 1], [], []>} : vector<16x8xbf16>, vector<8x32xbf16>, vector<16x32xf32> -> vector<16x32xf32>
    %82 = arith.addf %75, %81 : vector<16x32xf32>
    %83 = vector.shape_cast %82 : vector<16x32xf32> to vector<2x8x32xf32>
    %84 = arith.addf %0, %83 : vector<2x8x32xf32>
    %c0_35 = arith.constant 0 : index
    %c0_36 = arith.constant 0 : index
    %c0_37 = arith.constant 0 : index
    %85 = vector.load %arg8[%c0_35, %c0_36, %c0_37] : memref<2x8x32xf32, #tpu.memory_space<vmem>>, vector<2x8x32xf32>
    tpu.vector_store %arg8[%c0_35, %c0_36, %c0_37], %84 {strides = array<i32>} : memref<2x8x32xf32, #tpu.memory_space<vmem>>, vector<2x8x32xf32>,
    return
  }
  func.func @transform_0(%arg0: i32) -> (i32, i32, i32) {
    %c0_i32 = arith.constant 0 : i32
    %c0_i32_0 = arith.constant 0 : i32
    %c0_i32_1 = arith.constant 0 : i32
    return %arg0, %c0_i32, %c0_i32_0 : i32, i32, i32
  }
  func.func @transform_1(%arg0: i32) -> (i32, i32, i32) {
    %c0_i32 = arith.constant 0 : i32
    %c0_i32_0 = arith.constant 0 : i32
    %c0_i32_1 = arith.constant 0 : i32
    return %arg0, %c0_i32, %c0_i32_0 : i32, i32, i32
  }
  func.func @transform_2(%arg0: i32) -> (i32, i32, i32) {
    %c0_i32 = arith.constant 0 : i32
    %c0_i32_0 = arith.constant 0 : i32
    %c0_i32_1 = arith.constant 0 : i32
    return %arg0, %c0_i32, %c0_i32_0 : i32, i32, i32
  }
  func.func @transform_3(%arg0: i32) -> (i32, i32) {
    %c0_i32 = arith.constant 0 : i32
    %c0_i32_0 = arith.constant 0 : i32
    %c0_i32_1 = arith.constant 0 : i32
    return %c0_i32, %c0_i32_0 : i32, i32
  }
  func.func @transform_4(%arg0: i32) -> (i32, i32) {
    %c0_i32 = arith.constant 0 : i32
    %c0_i32_0 = arith.constant 0 : i32
    %c0_i32_1 = arith.constant 0 : i32
    return %c0_i32, %c0_i32_0 : i32, i32
  }
  func.func @transform_5(%arg0: i32) -> (i32, i32) {
    %c0_i32 = arith.constant 0 : i32
    %c0_i32_0 = arith.constant 0 : i32
    %c0_i32_1 = arith.constant 0 : i32
    return %c0_i32, %c0_i32_0 : i32, i32
  }
  func.func @transform_6(%arg0: i32) -> (i32, i32, i32) {
    %c0_i32 = arith.constant 0 : i32
    %c0_i32_0 = arith.constant 0 : i32
    %c0_i32_1 = arith.constant 0 : i32
    %c0_i32_2 = arith.constant 0 : i32
    return %c0_i32, %c0_i32_0, %c0_i32_1 : i32, i32, i32
  }
  func.func @transform_7(%arg0: i32) -> (i32, i32, i32) {
    %c0_i32 = arith.constant 0 : i32
    %c0_i32_0 = arith.constant 0 : i32
    %c0_i32_1 = arith.constant 0 : i32
    return %arg0, %c0_i32, %c0_i32_0 : i32, i32, i32
  }
}

module attributes {stable_mosaic.version = 11 : i64} {
  func.func @cross_attn_kernel(%arg0: i32, %arg1: memref<2x8x32xf32, #tpu.memory_space<vmem>>, %arg2: memref<2x16x32xbf16, #tpu.memory_space<vmem>>, %arg3: memref<2x1x16xf32, #tpu.memory_space<vmem>>, %arg4: memref<1x32xf32, #tpu.memory_space<vmem>>, %arg5: memref<32x32xbf16, #tpu.memory_space<vmem>>, %arg6: memref<32x64xbf16, #tpu.memory_space<vmem>>, %arg7: memref<4x8x32xbf16, #tpu.memory_space<vmem>>, %arg8: memref<2x8x32xf32, #tpu.memory_space<vmem>>) attributes {dimension_semantics = [#tpu.dimension_semantics<parallel>], iteration_bounds = array<i64: 2>, scalar_prefetch = 0 : i64, scratch_operands = 0 : i64, tpu.core_type = #tpu.core_type<tc>, window_params = [{transform_indices = @transform_0, window_bounds = array<i64: 2, 8, 32>}, {transform_indices = @transform_1, window_bounds = array<i64: 2, 16, 32>}, {transform_indices = @transform_2, window_bounds = array<i64: 2, 1, 16>}, {pipeline_mode = #tpu.pipeline_mode<synchronous>, transform_indices = @transform_3, window_bounds = array<i64: 1, 32>}, {pipeline_mode = #tpu.pipeline_mode<synchronous>, transform_indices = @transform_4, window_bounds = array<i64: 32, 32>}, {pipeline_mode = #tpu.pipeline_mode<synchronous>, transform_indices = @transform_5, window_bounds = array<i64: 32, 64>}, {pipeline_mode = #tpu.pipeline_mode<synchronous>, transform_indices = @transform_6, window_bounds = array<i64: 4, 8, 32>}, {transform_indices = @transform_7, window_bounds = array<i64: 2, 8, 32>}]} {
    %c0 = arith.constant 0 : index
    %c0_0 = arith.constant 0 : index
    %c0_1 = arith.constant 0 : index
    %0 = vector.load %arg1[%c0, %c0_0, %c0_1] : memref<2x8x32xf32, #tpu.memory_space<vmem>>, vector<2x8x32xf32>
    %c0_2 = arith.constant 0 : index
    %c0_3 = arith.constant 0 : index
    %1 = vector.load %arg4[%c0_2, %c0_3] : memref<1x32xf32, #tpu.memory_space<vmem>>, vector<1x32xf32>
    %2 = arith.mulf %0, %0 : vector<2x8x32xf32>
    %cst = arith.constant dense<0.000000e+00> : vector<2x8xf32>
    %3 = vector.multi_reduction <add>, %2, %cst [2] : vector<2x8x32xf32> to vector<2x8xf32>
    %4 = vector.shape_cast %3 : vector<2x8xf32> to vector<2x8x1xf32>
    %cst_4 = arith.constant 3.200000e+01 : f32
    %5 = vector.broadcast %cst_4 : f32 to vector<2x8x1xf32>
    %6 = arith.divf %4, %5 : vector<2x8x1xf32>
    %cst_5 = arith.constant 9.99999997E-7 : f32
    %7 = vector.broadcast %cst_5 : f32 to vector<2x8x1xf32>
    %8 = arith.addf %6, %7 : vector<2x8x1xf32>
    %9 = math.rsqrt %8 : vector<2x8x1xf32>
    %10 = vector.broadcast %9 : vector<2x8x1xf32> to vector<2x8x32xf32>
    %11 = arith.mulf %0, %10 : vector<2x8x32xf32>
    %12 = vector.shape_cast %1 : vector<1x32xf32> to vector<1x1x32xf32>
    %13 = vector.broadcast %12 : vector<1x1x32xf32> to vector<2x8x32xf32>
    %14 = arith.mulf %11, %13 : vector<2x8x32xf32>
    %15 = vector.shape_cast %14 : vector<2x8x32xf32> to vector<16x32xf32>
    %16 = arith.truncf %15 : vector<16x32xf32> to vector<16x32xbf16>
    %c0_6 = arith.constant 0 : index
    %c0_7 = arith.constant 0 : index
    %c0_8 = arith.constant 0 : index
    %17 = vector.load %arg2[%c0_6, %c0_7, %c0_8] : memref<2x16x32xbf16, #tpu.memory_space<vmem>>, vector<2x16x32xbf16>
    %18 = vector.shape_cast %17 : vector<2x16x32xbf16> to vector<32x32xbf16>
    %c0_9 = arith.constant 0 : index
    %c0_10 = arith.constant 0 : index
    %19 = vector.load %arg5[%c0_9, %c0_10] : memref<32x32xbf16, #tpu.memory_space<vmem>>, vector<32x32xbf16>
    %cst_11 = arith.constant dense<0.000000e+00> : vector<16x32xf32>
    %20 = tpu.matmul %16, %19, %cst_11 {dimension_numbers = #tpu.dot_dimension_numbers<[1], [0], [0], [1], [0, 0, 1, 1], [], []>} : vector<16x32xbf16>, vector<32x32xbf16>, vector<16x32xf32> -> vector<16x32xf32>
    %c0_12 = arith.constant 0 : index
    %c0_13 = arith.constant 0 : index
    %21 = vector.load %arg6[%c0_12, %c0_13] : memref<32x64xbf16, #tpu.memory_space<vmem>>, vector<32x64xbf16>
    %cst_14 = arith.constant dense<0.000000e+00> : vector<32x64xf32>
    %22 = tpu.matmul %18, %21, %cst_14 {dimension_numbers = #tpu.dot_dimension_numbers<[1], [0], [0], [1], [0, 0, 1, 1], [], []>} : vector<32x32xbf16>, vector<32x64xbf16>, vector<32x64xf32> -> vector<32x64xf32>
    %23 = vector.shape_cast %20 : vector<16x32xf32> to vector<2x8x32xf32>
    %24 = tpu.transpose %23, [0, 2, 1] : vector<2x8x32xf32> -> vector<2x32x8xf32>
    %25 = vector.shape_cast %24 : vector<2x32x8xf32> to vector<8x8x8xf32>
    %26 = tpu.transpose %25, [0, 2, 1] : vector<8x8x8xf32> -> vector<8x8x8xf32>
    %27 = vector.shape_cast %22 : vector<32x64xf32> to vector<2x16x64xf32>
    %28 = tpu.transpose %27, [0, 2, 1] : vector<2x16x64xf32> -> vector<2x64x16xf32>
    %29 = vector.extract_strided_slice %28 {offsets = [0, 0, 0], sizes = [2, 32, 16], strides = [1, 1, 1]} : vector<2x64x16xf32> to vector<2x32x16xf32>
    %30 = vector.shape_cast %29 : vector<2x32x16xf32> to vector<8x8x16xf32>
    %31 = vector.extract_strided_slice %28 {offsets = [0, 32, 0], sizes = [2, 32, 16], strides = [1, 1, 1]} : vector<2x64x16xf32> to vector<2x32x16xf32>
    %32 = vector.shape_cast %31 : vector<2x32x16xf32> to vector<8x8x16xf32>
    %33 = arith.truncf %26 : vector<8x8x8xf32> to vector<8x8x8xbf16>
    %34 = arith.truncf %30 : vector<8x8x16xf32> to vector<8x8x16xbf16>
    "tpu.trace_start"() <{level = 10 : i32, message = "bqd,bdk->bqk"}> : () -> ()
    %cst_15 = arith.constant dense<0.000000e+00> : vector<8x8x16xf32>
    %35 = tpu.matmul %33, %34, %cst_15 {dimension_numbers = #tpu.dot_dimension_numbers<[2], [1], [1], [2], [0, 0, 0, 1, 1, 2], [0], [0]>} : vector<8x8x8xbf16>, vector<8x8x16xbf16>, vector<8x8x16xf32> -> vector<8x8x16xf32>
    "tpu.trace_stop"() : () -> ()
    %c0_16 = arith.constant 0 : index
    %c0_17 = arith.constant 0 : index
    %c0_18 = arith.constant 0 : index
    %36 = vector.load %arg3[%c0_16, %c0_17, %c0_18] : memref<2x1x16xf32, #tpu.memory_space<vmem>>, vector<2x1x16xf32>
    %37 = vector.shape_cast %35 : vector<8x8x16xf32> to vector<2x4x8x16xf32>
    %38 = vector.shape_cast %36 : vector<2x1x16xf32> to vector<2x1x1x16xf32>
    %39 = vector.broadcast %38 : vector<2x1x1x16xf32> to vector<2x4x8x16xf32>
    %40 = arith.addf %37, %39 : vector<2x4x8x16xf32>
    %41 = vector.shape_cast %40 : vector<2x4x8x16xf32> to vector<8x8x16xf32>
    %cst_19 = arith.constant dense<0xFF800000> : vector<8x8xf32>
    %42 = vector.multi_reduction <maximumf>, %41, %cst_19 [2] : vector<8x8x16xf32> to vector<8x8xf32>
    %43 = vector.shape_cast %42 : vector<8x8xf32> to vector<8x8x1xf32>
    %44 = vector.broadcast %43 : vector<8x8x1xf32> to vector<8x8x16xf32>
    %45 = arith.subf %41, %44 : vector<8x8x16xf32>
    %46 = math.exp %45 : vector<8x8x16xf32>
    %cst_20 = arith.constant dense<0.000000e+00> : vector<8x8xf32>
    %47 = vector.multi_reduction <add>, %46, %cst_20 [2] : vector<8x8x16xf32> to vector<8x8xf32>
    %48 = vector.shape_cast %47 : vector<8x8xf32> to vector<8x8x1xf32>
    %49 = tpu.reciprocal %48 {approx = true} : vector<8x8x1xf32> -> vector<8x8x1xf32>
    %50 = vector.broadcast %49 : vector<8x8x1xf32> to vector<8x8x16xf32>
    %51 = arith.mulf %46, %50 : vector<8x8x16xf32>
    %52 = arith.truncf %51 : vector<8x8x16xf32> to vector<8x8x16xbf16>
    %53 = arith.truncf %32 : vector<8x8x16xf32> to vector<8x8x16xbf16>
    "tpu.trace_start"() <{level = 10 : i32, message = "bqk,bdk->bqd"}> : () -> ()
    %cst_21 = arith.constant dense<0.000000e+00> : vector<8x8x8xf32>
    %54 = tpu.matmul %52, %53, %cst_21 {dimension_numbers = #tpu.dot_dimension_numbers<[2], [2], [1], [1], [0, 0, 0, 1, 1, 1], [0], [0]>} : vector<8x8x16xbf16>, vector<8x8x16xbf16>, vector<8x8x8xf32> -> vector<8x8x8xf32>
    "tpu.trace_stop"() : () -> ()
    %55 = arith.truncf %54 : vector<8x8x8xf32> to vector<8x8x8xbf16>
    %56 = vector.shape_cast %55 : vector<8x8x8xbf16> to vector<2x4x8x8xbf16>
    %57 = vector.extract_strided_slice %56 {offsets = [0, 0, 0, 0], sizes = [2, 1, 8, 8], strides = [1, 1, 1, 1]} : vector<2x4x8x8xbf16> to vector<2x1x8x8xbf16>
    %58 = vector.shape_cast %57 : vector<2x1x8x8xbf16> to vector<2x8x8xbf16>
    %59 = vector.shape_cast %58 : vector<2x8x8xbf16> to vector<16x8xbf16>
    %c0_22 = arith.constant 0 : index
    %c0_23 = arith.constant 0 : index
    %c0_24 = arith.constant 0 : index
    %60 = vector.load %arg7[%c0_22, %c0_23, %c0_24] : memref<4x8x32xbf16, #tpu.memory_space<vmem>>, vector<1x8x32xbf16>
    %61 = vector.shape_cast %60 : vector<1x8x32xbf16> to vector<8x32xbf16>
    %cst_25 = arith.constant dense<0.000000e+00> : vector<16x32xf32>
    %62 = tpu.matmul %59, %61, %cst_25 {dimension_numbers = #tpu.dot_dimension_numbers<[1], [0], [0], [1], [0, 0, 1, 1], [], []>} : vector<16x8xbf16>, vector<8x32xbf16>, vector<16x32xf32> -> vector<16x32xf32>
    %63 = vector.extract_strided_slice %56 {offsets = [0, 1, 0, 0], sizes = [2, 1, 8, 8], strides = [1, 1, 1, 1]} : vector<2x4x8x8xbf16> to vector<2x1x8x8xbf16>
    %64 = vector.shape_cast %63 : vector<2x1x8x8xbf16> to vector<2x8x8xbf16>
    %65 = vector.shape_cast %64 : vector<2x8x8xbf16> to vector<16x8xbf16>
    %c1 = arith.constant 1 : index
    %c0_26 = arith.constant 0 : index
    %c0_27 = arith.constant 0 : index
    %66 = vector.load %arg7[%c1, %c0_26, %c0_27] : memref<4x8x32xbf16, #tpu.memory_space<vmem>>, vector<1x8x32xbf16>
    %67 = vector.shape_cast %66 : vector<1x8x32xbf16> to vector<8x32xbf16>
    %cst_28 = arith.constant dense<0.000000e+00> : vector<16x32xf32>
    %68 = tpu.matmul %65, %67, %cst_28 {dimension_numbers = #tpu.dot_dimension_numbers<[1], [0], [0], [1], [0, 0, 1, 1], [], []>} : vector<16x8xbf16>, vector<8x32xbf16>, vector<16x32xf32> -> vector<16x32xf32>
    %69 = arith.addf %62, %68 : vector<16x32xf32>
    %70 = vector.extract_strided_slice %56 {offsets = [0, 2, 0, 0], sizes = [2, 1, 8, 8], strides = [1, 1, 1, 1]} : vector<2x4x8x8xbf16> to vector<2x1x8x8xbf16>
    %71 = vector.shape_cast %70 : vector<2x1x8x8xbf16> to vector<2x8x8xbf16>
    %72 = vector.shape_cast %71 : vector<2x8x8xbf16> to vector<16x8xbf16>
    %c2 = arith.constant 2 : index
    %c0_29 = arith.constant 0 : index
    %c0_30 = arith.constant 0 : index
    %73 = vector.load %arg7[%c2, %c0_29, %c0_30] : memref<4x8x32xbf16, #tpu.memory_space<vmem>>, vector<1x8x32xbf16>
    %74 = vector.shape_cast %73 : vector<1x8x32xbf16> to vector<8x32xbf16>
    %cst_31 = arith.constant dense<0.000000e+00> : vector<16x32xf32>
    %75 = tpu.matmul %72, %74, %cst_31 {dimension_numbers = #tpu.dot_dimension_numbers<[1], [0], [0], [1], [0, 0, 1, 1], [], []>} : vector<16x8xbf16>, vector<8x32xbf16>, vector<16x32xf32> -> vector<16x32xf32>
    %76 = arith.addf %69, %75 : vector<16x32xf32>
    %77 = vector.extract_strided_slice %56 {offsets = [0, 3, 0, 0], sizes = [2, 1, 8, 8], strides = [1, 1, 1, 1]} : vector<2x4x8x8xbf16> to vector<2x1x8x8xbf16>
    %78 = vector.shape_cast %77 : vector<2x1x8x8xbf16> to vector<2x8x8xbf16>
    %79 = vector.shape_cast %78 : vector<2x8x8xbf16> to vector<16x8xbf16>
    %c3 = arith.constant 3 : index
    %c0_32 = arith.constant 0 : index
    %c0_33 = arith.constant 0 : index
    %80 = vector.load %arg7[%c3, %c0_32, %c0_33] : memref<4x8x32xbf16, #tpu.memory_space<vmem>>, vector<1x8x32xbf16>
    %81 = vector.shape_cast %80 : vector<1x8x32xbf16> to vector<8x32xbf16>
    %cst_34 = arith.constant dense<0.000000e+00> : vector<16x32xf32>
    %82 = tpu.matmul %79, %81, %cst_34 {dimension_numbers = #tpu.dot_dimension_numbers<[1], [0], [0], [1], [0, 0, 1, 1], [], []>} : vector<16x8xbf16>, vector<8x32xbf16>, vector<16x32xf32> -> vector<16x32xf32>
    %83 = arith.addf %76, %82 : vector<16x32xf32>
    %84 = vector.shape_cast %83 : vector<16x32xf32> to vector<2x8x32xf32>
    %85 = arith.addf %0, %84 : vector<2x8x32xf32>
    %c0_35 = arith.constant 0 : index
    %c0_36 = arith.constant 0 : index
    %c0_37 = arith.constant 0 : index
    %86 = vector.load %arg8[%c0_35, %c0_36, %c0_37] : memref<2x8x32xf32, #tpu.memory_space<vmem>>, vector<2x8x32xf32>
    tpu.vector_store %arg8[%c0_35, %c0_36, %c0_37], %85 {strides = array<i32>} : memref<2x8x32xf32, #tpu.memory_space<vmem>>, vector<2x8x32xf32>,
    return
  }
  func.func @transform_0(%arg0: i32) -> (i32, i32, i32) {
    %c0_i32 = arith.constant 0 : i32
    %c0_i32_0 = arith.constant 0 : i32
    %c0_i32_1 = arith.constant 0 : i32
    return %arg0, %c0_i32, %c0_i32_0 : i32, i32, i32
  }
  func.func @transform_1(%arg0: i32) -> (i32, i32, i32) {
    %c0_i32 = arith.constant 0 : i32
    %c0_i32_0 = arith.constant 0 : i32
    %c0_i32_1 = arith.constant 0 : i32
    return %arg0, %c0_i32, %c0_i32_0 : i32, i32, i32
  }
  func.func @transform_2(%arg0: i32) -> (i32, i32, i32) {
    %c0_i32 = arith.constant 0 : i32
    %c0_i32_0 = arith.constant 0 : i32
    %c0_i32_1 = arith.constant 0 : i32
    return %arg0, %c0_i32, %c0_i32_0 : i32, i32, i32
  }
  func.func @transform_3(%arg0: i32) -> (i32, i32) {
    %c0_i32 = arith.constant 0 : i32
    %c0_i32_0 = arith.constant 0 : i32
    %c0_i32_1 = arith.constant 0 : i32
    return %c0_i32, %c0_i32_0 : i32, i32
  }
  func.func @transform_4(%arg0: i32) -> (i32, i32) {
    %c0_i32 = arith.constant 0 : i32
    %c0_i32_0 = arith.constant 0 : i32
    %c0_i32_1 = arith.constant 0 : i32
    return %c0_i32, %c0_i32_0 : i32, i32
  }
  func.func @transform_5(%arg0: i32) -> (i32, i32) {
    %c0_i32 = arith.constant 0 : i32
    %c0_i32_0 = arith.constant 0 : i32
    %c0_i32_1 = arith.constant 0 : i32
    return %c0_i32, %c0_i32_0 : i32, i32
  }
  func.func @transform_6(%arg0: i32) -> (i32, i32, i32) {
    %c0_i32 = arith.constant 0 : i32
    %c0_i32_0 = arith.constant 0 : i32
    %c0_i32_1 = arith.constant 0 : i32
    %c0_i32_2 = arith.constant 0 : i32
    return %c0_i32, %c0_i32_0, %c0_i32_1 : i32, i32, i32
  }
  func.func @transform_7(%arg0: i32) -> (i32, i32, i32) {
    %c0_i32 = arith.constant 0 : i32
    %c0_i32_0 = arith.constant 0 : i32
    %c0_i32_1 = arith.constant 0 : i32
    return %arg0, %c0_i32, %c0_i32_0 : i32, i32, i32
  }
}

module attributes {stable_mosaic.version = 11 : i64} {
  func.func @cross_attn_kernel(%arg0: i32, %arg1: memref<2x8x32xf32, #tpu.memory_space<vmem>>, %arg2: memref<2x16x32xbf16, #tpu.memory_space<vmem>>, %arg3: memref<2x1x16xf32, #tpu.memory_space<vmem>>, %arg4: memref<1x32xf32, #tpu.memory_space<vmem>>, %arg5: memref<32x32xbf16, #tpu.memory_space<vmem>>, %arg6: memref<32x64xbf16, #tpu.memory_space<vmem>>, %arg7: memref<4x8x32xbf16, #tpu.memory_space<vmem>>, %arg8: memref<2x8x32xf32, #tpu.memory_space<vmem>>) attributes {dimension_semantics = [#tpu.dimension_semantics<parallel>], iteration_bounds = array<i64: 2>, scalar_prefetch = 0 : i64, scratch_operands = 0 : i64, tpu.core_type = #tpu.core_type<tc>, window_params = [{transform_indices = @transform_0, window_bounds = array<i64: 2, 8, 32>}, {transform_indices = @transform_1, window_bounds = array<i64: 2, 16, 32>}, {transform_indices = @transform_2, window_bounds = array<i64: 2, 1, 16>}, {pipeline_mode = #tpu.pipeline_mode<synchronous>, transform_indices = @transform_3, window_bounds = array<i64: 1, 32>}, {pipeline_mode = #tpu.pipeline_mode<synchronous>, transform_indices = @transform_4, window_bounds = array<i64: 32, 32>}, {pipeline_mode = #tpu.pipeline_mode<synchronous>, transform_indices = @transform_5, window_bounds = array<i64: 32, 64>}, {pipeline_mode = #tpu.pipeline_mode<synchronous>, transform_indices = @transform_6, window_bounds = array<i64: 4, 8, 32>}, {transform_indices = @transform_7, window_bounds = array<i64: 2, 8, 32>}]} {
    %c0 = arith.constant 0 : index
    %c0_0 = arith.constant 0 : index
    %c0_1 = arith.constant 0 : index
    %0 = vector.load %arg1[%c0, %c0_0, %c0_1] : memref<2x8x32xf32, #tpu.memory_space<vmem>>, vector<2x8x32xf32>
    %c0_2 = arith.constant 0 : index
    %c0_3 = arith.constant 0 : index
    %1 = vector.load %arg4[%c0_2, %c0_3] : memref<1x32xf32, #tpu.memory_space<vmem>>, vector<1x32xf32>
    %2 = arith.mulf %0, %0 : vector<2x8x32xf32>
    %cst = arith.constant dense<0.000000e+00> : vector<2x8xf32>
    %3 = vector.multi_reduction <add>, %2, %cst [2] : vector<2x8x32xf32> to vector<2x8xf32>
    %4 = vector.shape_cast %3 : vector<2x8xf32> to vector<2x8x1xf32>
    %cst_4 = arith.constant 3.200000e+01 : f32
    %5 = vector.broadcast %cst_4 : f32 to vector<2x8x1xf32>
    %6 = arith.divf %4, %5 : vector<2x8x1xf32>
    %cst_5 = arith.constant 9.99999997E-7 : f32
    %7 = vector.broadcast %cst_5 : f32 to vector<2x8x1xf32>
    %8 = arith.addf %6, %7 : vector<2x8x1xf32>
    %9 = math.rsqrt %8 : vector<2x8x1xf32>
    %10 = vector.broadcast %9 : vector<2x8x1xf32> to vector<2x8x32xf32>
    %11 = arith.mulf %0, %10 : vector<2x8x32xf32>
    %12 = vector.shape_cast %1 : vector<1x32xf32> to vector<1x1x32xf32>
    %13 = vector.broadcast %12 : vector<1x1x32xf32> to vector<2x8x32xf32>
    %14 = arith.mulf %11, %13 : vector<2x8x32xf32>
    %15 = vector.shape_cast %14 : vector<2x8x32xf32> to vector<16x32xf32>
    %16 = arith.truncf %15 : vector<16x32xf32> to vector<16x32xbf16>
    %c0_6 = arith.constant 0 : index
    %c0_7 = arith.constant 0 : index
    %c0_8 = arith.constant 0 : index
    %17 = vector.load %arg2[%c0_6, %c0_7, %c0_8] : memref<2x16x32xbf16, #tpu.memory_space<vmem>>, vector<2x16x32xbf16>
    %18 = vector.shape_cast %17 : vector<2x16x32xbf16> to vector<32x32xbf16>
    %c0_9 = arith.constant 0 : index
    %c0_10 = arith.constant 0 : index
    %19 = vector.load %arg5[%c0_9, %c0_10] : memref<32x32xbf16, #tpu.memory_space<vmem>>, vector<32x32xbf16>
    %cst_11 = arith.constant dense<0.000000e+00> : vector<16x32xf32>
    %20 = tpu.matmul %16, %19, %cst_11 {dimension_numbers = #tpu.dot_dimension_numbers<[1], [0], [0], [1], [0, 0, 1, 1], [], []>} : vector<16x32xbf16>, vector<32x32xbf16>, vector<16x32xf32> -> vector<16x32xf32>
    %c0_12 = arith.constant 0 : index
    %c0_13 = arith.constant 0 : index
    %21 = vector.load %arg6[%c0_12, %c0_13] : memref<32x64xbf16, #tpu.memory_space<vmem>>, vector<32x64xbf16>
    %cst_14 = arith.constant dense<0.000000e+00> : vector<32x64xf32>
    %22 = tpu.matmul %18, %21, %cst_14 {dimension_numbers = #tpu.dot_dimension_numbers<[1], [0], [0], [1], [0, 0, 1, 1], [], []>} : vector<32x32xbf16>, vector<32x64xbf16>, vector<32x64xf32> -> vector<32x64xf32>
    %23 = vector.shape_cast %20 : vector<16x32xf32> to vector<2x8x32xf32>
    %24 = tpu.transpose %23, [0, 2, 1] : vector<2x8x32xf32> -> vector<2x32x8xf32>
    %25 = vector.shape_cast %24 : vector<2x32x8xf32> to vector<8x8x8xf32>
    %26 = tpu.transpose %25, [0, 2, 1] : vector<8x8x8xf32> -> vector<8x8x8xf32>
    %27 = vector.shape_cast %22 : vector<32x64xf32> to vector<2x16x64xf32>
    %28 = tpu.transpose %27, [0, 2, 1] : vector<2x16x64xf32> -> vector<2x64x16xf32>
    %29 = vector.extract_strided_slice %28 {offsets = [0, 0, 0], sizes = [2, 32, 16], strides = [1, 1, 1]} : vector<2x64x16xf32> to vector<2x32x16xf32>
    %30 = vector.shape_cast %29 : vector<2x32x16xf32> to vector<8x8x16xf32>
    %31 = vector.extract_strided_slice %28 {offsets = [0, 32, 0], sizes = [2, 32, 16], strides = [1, 1, 1]} : vector<2x64x16xf32> to vector<2x32x16xf32>
    %32 = vector.shape_cast %31 : vector<2x32x16xf32> to vector<8x8x16xf32>
    %33 = arith.truncf %26 : vector<8x8x8xf32> to vector<8x8x8xbf16>
    %34 = arith.truncf %30 : vector<8x8x16xf32> to vector<8x8x16xbf16>
    "tpu.trace_start"() <{level = 10 : i32, message = "bqd,bdk->bqk"}> : () -> ()
    %cst_15 = arith.constant dense<0.000000e+00> : vector<8x8x16xf32>
    %35 = tpu.matmul %33, %34, %cst_15 {dimension_numbers = #tpu.dot_dimension_numbers<[2], [1], [1], [2], [0, 0, 0, 1, 1, 2], [0], [0]>} : vector<8x8x8xbf16>, vector<8x8x16xbf16>, vector<8x8x16xf32> -> vector<8x8x16xf32>
    "tpu.trace_stop"() : () -> ()
    %c0_16 = arith.constant 0 : index
    %c0_17 = arith.constant 0 : index
    %c0_18 = arith.constant 0 : index
    %36 = vector.load %arg3[%c0_16, %c0_17, %c0_18] : memref<2x1x16xf32, #tpu.memory_space<vmem>>, vector<2x1x16xf32>
    %37 = vector.shape_cast %35 : vector<8x8x16xf32> to vector<2x4x8x16xf32>
    %38 = vector.shape_cast %36 : vector<2x1x16xf32> to vector<2x1x1x16xf32>
    %39 = vector.broadcast %38 : vector<2x1x1x16xf32> to vector<2x4x8x16xf32>
    %40 = arith.addf %37, %39 : vector<2x4x8x16xf32>
    %41 = vector.shape_cast %40 : vector<2x4x8x16xf32> to vector<8x8x16xf32>
    %cst_19 = arith.constant dense<0xFF800000> : vector<8x8xf32>
    %42 = vector.multi_reduction <maximumf>, %41, %cst_19 [2] : vector<8x8x16xf32> to vector<8x8xf32>
    %43 = vector.shape_cast %42 : vector<8x8xf32> to vector<8x8x1xf32>
    %44 = vector.broadcast %43 : vector<8x8x1xf32> to vector<8x8x16xf32>
    %45 = arith.subf %41, %44 : vector<8x8x16xf32>
    %46 = math.exp %45 : vector<8x8x16xf32>
    %cst_20 = arith.constant dense<0.000000e+00> : vector<8x8xf32>
    %47 = vector.multi_reduction <add>, %46, %cst_20 [2] : vector<8x8x16xf32> to vector<8x8xf32>
    %48 = vector.shape_cast %47 : vector<8x8xf32> to vector<8x8x1xf32>
    %49 = tpu.reciprocal %48 {approx = true} : vector<8x8x1xf32> -> vector<8x8x1xf32>
    %50 = vector.broadcast %49 : vector<8x8x1xf32> to vector<8x8x16xf32>
    %51 = arith.mulf %46, %50 : vector<8x8x16xf32>
    %52 = arith.truncf %51 : vector<8x8x16xf32> to vector<8x8x16xbf16>
    %53 = arith.truncf %32 : vector<8x8x16xf32> to vector<8x8x16xbf16>
    "tpu.trace_start"() <{level = 10 : i32, message = "bqk,bdk->bqd"}> : () -> ()
    %cst_21 = arith.constant dense<0.000000e+00> : vector<8x8x8xf32>
    %54 = tpu.matmul %52, %53, %cst_21 {dimension_numbers = #tpu.dot_dimension_numbers<[2], [2], [1], [1], [0, 0, 0, 1, 1, 1], [0], [0]>} : vector<8x8x16xbf16>, vector<8x8x16xbf16>, vector<8x8x8xf32> -> vector<8x8x8xf32>
    "tpu.trace_stop"() : () -> ()
    %55 = arith.truncf %54 : vector<8x8x8xf32> to vector<8x8x8xbf16>
    %56 = vector.shape_cast %55 : vector<8x8x8xbf16> to vector<2x4x8x8xbf16>
    %57 = vector.extract_strided_slice %56 {offsets = [0, 0, 0, 0], sizes = [2, 1, 8, 8], strides = [1, 1, 1, 1]} : vector<2x4x8x8xbf16> to vector<2x1x8x8xbf16>
    %58 = vector.shape_cast %57 : vector<2x1x8x8xbf16> to vector<2x8x8xbf16>
    %59 = vector.shape_cast %58 : vector<2x8x8xbf16> to vector<16x8xbf16>
    %c0_22 = arith.constant 0 : index
    %c0_23 = arith.constant 0 : index
    %c0_24 = arith.constant 0 : index
    %60 = vector.load %arg7[%c0_22, %c0_23, %c0_24] : memref<4x8x32xbf16, #tpu.memory_space<vmem>>, vector<1x8x32xbf16>
    %61 = vector.shape_cast %60 : vector<1x8x32xbf16> to vector<8x32xbf16>
    %cst_25 = arith.constant dense<0.000000e+00> : vector<16x32xf32>
    %62 = tpu.matmul %59, %61, %cst_25 {dimension_numbers = #tpu.dot_dimension_numbers<[1], [0], [0], [1], [0, 0, 1, 1], [], []>} : vector<16x8xbf16>, vector<8x32xbf16>, vector<16x32xf32> -> vector<16x32xf32>
    %63 = vector.extract_strided_slice %56 {offsets = [0, 1, 0, 0], sizes = [2, 1, 8, 8], strides = [1, 1, 1, 1]} : vector<2x4x8x8xbf16> to vector<2x1x8x8xbf16>
    %64 = vector.shape_cast %63 : vector<2x1x8x8xbf16> to vector<2x8x8xbf16>
    %65 = vector.shape_cast %64 : vector<2x8x8xbf16> to vector<16x8xbf16>
    %c1 = arith.constant 1 : index
    %c0_26 = arith.constant 0 : index
    %c0_27 = arith.constant 0 : index
    %66 = vector.load %arg7[%c1, %c0_26, %c0_27] : memref<4x8x32xbf16, #tpu.memory_space<vmem>>, vector<1x8x32xbf16>
    %67 = vector.shape_cast %66 : vector<1x8x32xbf16> to vector<8x32xbf16>
    %cst_28 = arith.constant dense<0.000000e+00> : vector<16x32xf32>
    %68 = tpu.matmul %65, %67, %cst_28 {dimension_numbers = #tpu.dot_dimension_numbers<[1], [0], [0], [1], [0, 0, 1, 1], [], []>} : vector<16x8xbf16>, vector<8x32xbf16>, vector<16x32xf32> -> vector<16x32xf32>
    %69 = arith.addf %62, %68 : vector<16x32xf32>
    %70 = vector.extract_strided_slice %56 {offsets = [0, 2, 0, 0], sizes = [2, 1, 8, 8], strides = [1, 1, 1, 1]} : vector<2x4x8x8xbf16> to vector<2x1x8x8xbf16>
    %71 = vector.shape_cast %70 : vector<2x1x8x8xbf16> to vector<2x8x8xbf16>
    %72 = vector.shape_cast %71 : vector<2x8x8xbf16> to vector<16x8xbf16>
    %c2 = arith.constant 2 : index
    %c0_29 = arith.constant 0 : index
    %c0_30 = arith.constant 0 : index
    %73 = vector.load %arg7[%c2, %c0_29, %c0_30] : memref<4x8x32xbf16, #tpu.memory_space<vmem>>, vector<1x8x32xbf16>
    %74 = vector.shape_cast %73 : vector<1x8x32xbf16> to vector<8x32xbf16>
    %cst_31 = arith.constant dense<0.000000e+00> : vector<16x32xf32>
    %75 = tpu.matmul %72, %74, %cst_31 {dimension_numbers = #tpu.dot_dimension_numbers<[1], [0], [0], [1], [0, 0, 1, 1], [], []>} : vector<16x8xbf16>, vector<8x32xbf16>, vector<16x32xf32> -> vector<16x32xf32>
    %76 = arith.addf %69, %75 : vector<16x32xf32>
    %77 = vector.extract_strided_slice %56 {offsets = [0, 3, 0, 0], sizes = [2, 1, 8, 8], strides = [1, 1, 1, 1]} : vector<2x4x8x8xbf16> to vector<2x1x8x8xbf16>
    %78 = vector.shape_cast %77 : vector<2x1x8x8xbf16> to vector<2x8x8xbf16>
    %79 = vector.shape_cast %78 : vector<2x8x8xbf16> to vector<16x8xbf16>
    %c3 = arith.constant 3 : index
    %c0_32 = arith.constant 0 : index
    %c0_33 = arith.constant 0 : index
    %80 = vector.load %arg7[%c3, %c0_32, %c0_33] : memref<4x8x32xbf16, #tpu.memory_space<vmem>>, vector<1x8x32xbf16>
    %81 = vector.shape_cast %80 : vector<1x8x32xbf16> to vector<8x32xbf16>
    %cst_34 = arith.constant dense<0.000000e+00> : vector<16x32xf32>
    %82 = tpu.matmul %79, %81, %cst_34 {dimension_numbers = #tpu.dot_dimension_numbers<[1], [0], [0], [1], [0, 0, 1, 1], [], []>} : vector<16x8xbf16>, vector<8x32xbf16>, vector<16x32xf32> -> vector<16x32xf32>
    %83 = arith.addf %76, %82 : vector<16x32xf32>
    %84 = vector.shape_cast %83 : vector<16x32xf32> to vector<2x8x32xf32>
    %85 = arith.addf %0, %84 : vector<2x8x32xf32>
    %c0_35 = arith.constant 0 : index
    %c0_36 = arith.constant 0 : index
    %c0_37 = arith.constant 0 : index
    %86 = vector.load %arg8[%c0_35, %c0_36, %c0_37] : memref<2x8x32xf32, #tpu.memory_space<vmem>>, vector<2x8x32xf32>
    tpu.vector_store %arg8[%c0_35, %c0_36, %c0_37], %85 {strides = array<i32>} : memref<2x8x32xf32, #tpu.memory_space<vmem>>, vector<2x8x32xf32>,
    return
  }
  func.func @transform_0(%arg0: i32) -> (i32, i32, i32) {
    %c0_i32 = arith.constant 0 : i32
    %c0_i32_0 = arith.constant 0 : i32
    %c0_i32_1 = arith.constant 0 : i32
    return %arg0, %c0_i32, %c0_i32_0 : i32, i32, i32
  }
  func.func @transform_1(%arg0: i32) -> (i32, i32, i32) {
    %c0_i32 = arith.constant 0 : i32
    %c0_i32_0 = arith.constant 0 : i32
    %c0_i32_1 = arith.constant 0 : i32
    return %arg0, %c0_i32, %c0_i32_0 : i32, i32, i32
  }
  func.func @transform_2(%arg0: i32) -> (i32, i32, i32) {
    %c0_i32 = arith.constant 0 : i32
    %c0_i32_0 = arith.constant 0 : i32
    %c0_i32_1 = arith.constant 0 : i32
    return %arg0, %c0_i32, %c0_i32_0 : i32, i32, i32
  }
  func.func @transform_3(%arg0: i32) -> (i32, i32) {
    %c0_i32 = arith.constant 0 : i32
    %c0_i32_0 = arith.constant 0 : i32
    %c0_i32_1 = arith.constant 0 : i32
    return %c0_i32, %c0_i32_0 : i32, i32
  }
  func.func @transform_4(%arg0: i32) -> (i32, i32) {
    %c0_i32 = arith.constant 0 : i32
    %c0_i32_0 = arith.constant 0 : i32
    %c0_i32_1 = arith.constant 0 : i32
    return %c0_i32, %c0_i32_0 : i32, i32
  }
  func.func @transform_5(%arg0: i32) -> (i32, i32) {
    %c0_i32 = arith.constant 0 : i32
    %c0_i32_0 = arith.constant 0 : i32
    %c0_i32_1 = arith.constant 0 : i32
    return %c0_i32, %c0_i32_0 : i32, i32
  }
  func.func @transform_6(%arg0: i32) -> (i32, i32, i32) {
    %c0_i32 = arith.constant 0 : i32
    %c0_i32_0 = arith.constant 0 : i32
    %c0_i32_1 = arith.constant 0 : i32
    %c0_i32_2 = arith.constant 0 : i32
    return %c0_i32, %c0_i32_0, %c0_i32_1 : i32, i32, i32
  }
  func.func @transform_7(%arg0: i32) -> (i32, i32, i32) {
    %c0_i32 = arith.constant 0 : i32
    %c0_i32_0 = arith.constant 0 : i32
    %c0_i32_1 = arith.constant 0 : i32
    return %arg0, %c0_i32, %c0_i32_0 : i32, i32, i32
  }
}

</mosaic_0001>

<bundles_post_ra>
// kernel: tpu_custom_call.1
= control target key start
LH: loop header
LB: loop body
LE: loop exit
PB: predicated region body
PF: predicated region fallthrough
CT: control target
= control target key end

     0   :  { %s3331_s0 = inlined_call_operand.hbm [shape: f32[4,8,32], index: 0, kind: input, shape index: {}]   ;;  %s3332_s1 = inlined_call_operand.hbm [shape: bf16[4,16,32], index: 1, kind: input, shape index: {}]   ;;  %s3333_s2 = inlined_call_operand.hbm [shape: f32[4,1,16], index: 2, kind: input, shape index: {}]   ;;  %s3334_s3 = inlined_call_operand.vmem [shape: f32[1,32], index: 3, kind: input, shape index: {}]   ;;  %s3335_s4 = inlined_call_operand.hbm [shape: bf16[32,32], index: 4, kind: input, shape index: {}]   ;;  %s3336_s5 = inlined_call_operand.hbm [shape: bf16[32,64], index: 5, kind: input, shape index: {}]   ;;  %s3337_s6 = inlined_call_operand.hbm [shape: bf16[4,8,32], index: 6, kind: input, shape index: {}]   ;;  %s3338_s7 = inlined_call_operand.hbm [shape: f32[4,8,32], index: 7, kind: output, shape index: {}]  }
   0x1   :  { %3354 = sst [smem:[#allocation22_spill]] %s3331_s0 }
   0x2   :  { %3355 = sst [smem:[#allocation23_spill]] %s3332_s1 }
   0x3   :  { %12 = vsyncpa [#allocation3], 0 }
   0x4   :  { %14 = vsyncpa [#allocation3 + $0x1], 0 }
   0x5   :  { %15 = vsyncpa [#allocation6], 0 }
   0x6   :  { %17 = vsyncpa [#allocation6 + $0x1], 0 }
   0x7   :  { %18 = vsyncpa [#allocation9], 0 }
   0x8   :  { %19 = vsyncpa [#allocation12], 0 }
   0x9   :  { %20 = vsyncpa [#allocation4], 0 }
   0xa   :  { %22 = vsyncpa [#allocation4 + $0x1], 0  ;;  %s2838_s24 = smov 0   ;;  %s2840_s25 = smov 0  }
   0xb   :  { %s2842_s26 = smov 0   ;;  %s2844_s27 = smov 0  }
   0xc LB: > { %3356 = sst [smem:[#allocation19_spill]] %s2775_s26  ;;  %s2859_s28 = sadd.s32 4294967295, %s2779_s27   ;;  %s2779_s27 = sphi %s2844_s27, %s3386_s27   ;;  %s2775_s26 = sphi %s2842_s26, %s3388_s26   ;;  %s2771_s25 = sphi %s2840_s25, %s3390_s25   ;;  %s2767_s24 = sphi %s2838_s24, %s3389_s24  }
   0xd   : > { %s2116_s29 = sadd.s32 4294967294, %s2779_s27   ;;  %s2863_s30 = sadd.s32 1, %s2779_s27  }
   0xe   : > { %3357 = sst [smem:[#allocation20_spill]] %s2863_s30  ;;  %s35_s8 = sadd.s32 1, %s2775_s26 }
   0xf   : > { %s32_s9 = ssub.s32 %s2779_s27, %s2863_s30  ;;  %p42_p0 = scmp.ne.s32.totalorder %s2775_s26, %s2771_s25 }
  0x10   : > { %p33_p1 = scmp.eq.s32.totalorder %s32_s9, 0  ;;  %p43_p2 = scmp.eq.s32.totalorder %s2779_s27, 0 }
  0x11   : > { %p48_p3 = scmp.ne.s32.totalorder %s2771_s25, %s2767_s24  ;;  %p3339_p4 = scmp.eq.s32.totalorder %s2859_s28, 0 }
  0x12   : > { %s2875_s10 = scalar_select %p33_p1, %s2775_s26, %s35_s8  }
  0x13   : > { %p2877_p5 = por %p43_p2, %p42_p0  ;;  %p2883_p6 = por %p3339_p4, %p48_p3 }
  0x14   : > { %3358 = sst [smem:[#allocation21_spill]] %s2875_s10  ;;  %p208_p7 = scmp.eq.s32.totalorder %s2859_s28, 1 }
  0x15   : > { %s3360_s12 = scalar_select %p2883_p6, 1, 0 }
  0x16   : > { %p214_p8 = scmp.eq.s32.totalorder %s2116_s29, 1  ;;  %p2117_p9 = scmp.ge.s32.totalorder %s2779_s27, 1 }
  0x17   : > { %p221_p10 = scmp.lt.s32.totalorder %s2779_s27, 3  ;;  %p2890_p11 = por %p208_p7, %p42_p0 }
  0x18   : > { %p2894_p12 = por %p214_p8, %p48_p3  ;;  %s2781_s16 = smov [#allocation8]  }
  0x19   : > { %s3361_s13 = scalar_select %p2890_p11, 1, 0 }
  0x1a   : > { %s3362_s14 = scalar_select %p2894_p12, 1, 0 }
  0x1b   : > { %p2898_p13 = pnand %p2117_p9, %p221_p10  ;;  %s236_s17 = sshll.u32 %s2781_s16, 4  ;;  %s237_s17 = int_to_ptr.vmem [resolvable:$true] %s236_s17 }
  0x1c   : > { %p2448_p3 = scmp.lt.s32.totalorder %s2779_s27, 2  ;;  %s2913_s19 = sand.u32 1, %s2775_s26  }
  0x1d   : > { %s3363_s15 = scalar_select %p2898_p13, 1, 0 }
  0x1e   : > { %p2421_p1 = pneg %p2898_p13  ;;  %s2552_s21 = scalar_lea.vmem %s237_s17, 256 }
  0x1f   : > { %p2553_p8 = scmp.ne.s32.totalorder %s237_s17, %s2552_s21 }
  0x20   : > { %p2906_p2 = pnand %p2421_p1, %p3339_p4  ;;  %p2560_p1 = scmp.lt.s32.totalorder %s237_s17, %s237_s17 }
  0x21   : > { %p2561_p4 = scmp.lt.s32.totalorder %s2552_s21, %s2552_s21 }
  0x22   : > { %s3364_s18 = scalar_select %p2906_p2, 1, 0 }
  0x23   : > { %p3349_p7 = pneg %p2906_p2  ;;  %p2562_p12 = por %p2561_p4, %p2560_p1 }
  0x25   : > { %p2555_p9 = pnand %p2553_p8, %p3349_p7 }
  0x27   : > { %p2556_p10 = pneg %p2555_p9 }
  0x29   : > { %p2563_p11 = pnand %p2562_p12, %p2556_p10 }
  0x2b   : > { %2566 = shalt.err (!%p2563_p11)
}
  0x2c   : > { %s3344_s22 = smov 64   ;;  %s3347_s23 = smov 4  }
  0x2d   : > { %2424 = dma.hbm_to_vmem [thread:$0]  (!%p2906_p2), %s3335_s4, 256, %s237_s17, [#allocation9], %s3344_s22, %s3344_s22, %s3347_s23  }
  0x2e   : > { %s3346_s9 = sshll.u32 %s2779_s27, 8  ;;  %p2934_p4 = pnand %p2448_p3, %p2877_p5 }
  0x2f   : > { %s297_s21 = sand.u32 1, %s2779_s27   ;;  %s3366_s1 = sld [smem:[#allocation23_spill]] }
  0x30   : > { %s3367_s30 = sshll.u32 %s2913_s19, 4  ;;  %s2950_s11 = scalar_lea.sflag [#allocation6], %s297_s21 }
  0x31   : > { %s301_s17 = scalar_lea.vmem [#allocation5], %s3367_s30  ;;  %p2956_p11 = pneg %p2934_p4 }
  0x32   : > { %s309_s29 = sshll.u32 %s301_s17, 4  ;;  %s2948_s29 = int_to_ptr.vmem [resolvable:$true] %s309_s29 }
  0x35   : > { %s2944_s26 = scalar_lea.hbm %s3366_s1, %s3346_s9  ;;  %s2572_s30 = scalar_lea.hbm %s3366_s1, 512 }
  0x36   : > { %s2567_s8 = scalar_lea.hbm %s2944_s26, 256  ;;  %p2573_p8 = scmp.lt.s32.totalorder %s2944_s26, %s3366_s1 }
  0x37   : > { %p2568_p5 = scmp.ne.s32.totalorder %s2944_s26, %s2567_s8  ;;  %p2574_p9 = scmp.lt.s32.totalorder %s2572_s30, %s2567_s8 }
  0x39   : > { %p2570_p12 = pnand %p2956_p11, %p2568_p5  ;;  %p2575_p10 = por %p2574_p9, %p2573_p8 }
  0x3b   : > { %p2571_p3 = pneg %p2570_p12 }
  0x3d   : > { %p2576_p1 = pnand %p2575_p10, %p2571_p3 }
  0x3f   : > { %2579 = shalt.err (!%p2576_p1)
}
  0x40   : > { %s2580_s21 = scalar_lea.vmem %s2948_s29, 256  ;;  %s2784_s23 = smov [#allocation5]  }
  0x41   : > { %p2581_p0 = scmp.ne.s32.totalorder %s2948_s29, %s2580_s21  ;;  %s2585_s10 = sshll.u32 %s2784_s23, 4  ;;  %s2586_s10 = int_to_ptr.vmem [resolvable:$false] %s2585_s10 }
  0x42   : > { %s2587_s20 = scalar_lea.vmem %s2586_s10, 512  ;;  %p2588_p7 = scmp.lt.s32.totalorder %s2948_s29, %s2586_s10 }
  0x43   : > { %p2583_p5 = pnand %p2581_p0, %p2956_p11  ;;  %p2589_p6 = scmp.lt.s32.totalorder %s2587_s20, %s2580_s21 }
  0x45   : > { %p2584_p12 = pneg %p2583_p5  ;;  %p2590_p13 = por %p2589_p6, %p2588_p7 }
  0x47   : > { %p2591_p2 = pnand %p2590_p13, %p2584_p12 }
  0x49   : > { %2594 = shalt.err (!%p2591_p2)
}
  0x4a   : > { %s3369_s9 = smov 4   ;;  %s3370_s8 = smov 64  }
  0x4b   : > { %2437 = dma.hbm_to_vmem [thread:$0]  (!%p2934_p4), %s2944_s26, 256, %s2948_s29, %s2950_s11, %s3370_s8, %s3370_s8, %s3369_s9  }
  0x4c   : > { %s2785_s30 = smov [#allocation10]   ;;  %s2786_s23 = smov [#allocation11]  }
  0x4d   : > { %s249_s17 = sshll.u32 %s2785_s30, 4  ;;  %s262_s1 = sshll.u32 %s2786_s23, 4  ;;  %s250_s17 = int_to_ptr.vmem [resolvable:$true] %s249_s17  ;;  %s263_s1 = int_to_ptr.vmem [resolvable:$true] %s262_s1 }
  0x4e   : > { %s2606_s10 = scalar_lea.vmem %s250_s17, 256  ;;  %p3371_p6 = scmp.ne.s32.totalorder %s3364_s18, 0 }
  0x4f   : > { %p2607_p0 = scmp.ne.s32.totalorder %s250_s17, %s2606_s10  ;;  %p2614_p3 = scmp.lt.s32.totalorder %s250_s17, %s250_s17 }
  0x50   : > { %p3372_p13 = pneg %p3371_p6  ;;  %p2615_p8 = scmp.lt.s32.totalorder %s2606_s10, %s2606_s10 }
  0x52   : > { %p2609_p2 = pnand %p2607_p0, %p3372_p13  ;;  %p2616_p9 = por %p2615_p8, %p2614_p3 }
  0x54   : > { %p2610_p7 = pneg %p2609_p2 }
  0x56   : > { %p2617_p10 = pnand %p2616_p9, %p2610_p7 }
  0x58   : > { %2620 = shalt.err (!%p2617_p10)
}
  0x59   : > { %2427 = dma.hbm_to_vmem [thread:$0]  (!%p3371_p6), %s3336_s5, 256, %s250_s17, [#allocation9], %s3370_s8, %s3370_s8, %s3369_s9  }
  0x5a   : > { %s2632_s21 = scalar_lea.vmem %s263_s1, 256  ;;  %p3373_p5 = pmov %p3372_p13 }
  0x5b   : > { %p2633_p1 = scmp.ne.s32.totalorder %s263_s1, %s2632_s21  ;;  %p2640_p13 = scmp.lt.s32.totalorder %s263_s1, %s263_s1 }
  0x5c   : > { %p2641_p2 = scmp.lt.s32.totalorder %s2632_s21, %s2632_s21 }
  0x5d   : > { %p2635_p12 = pnand %p2633_p1, %p3373_p5 }
  0x5e   : > { %p2642_p7 = por %p2641_p2, %p2640_p13 }
  0x5f   : > { %p2636_p0 = pneg %p2635_p12 }
  0x61   : > { %p2643_p3 = pnand %p2642_p7, %p2636_p0 }
  0x63   : > { %2646 = shalt.err (!%p2643_p3)
}
  0x64   : > { %2430 = dma.hbm_to_vmem [thread:$0]  (!%p3371_p6), %s3337_s6, 256, %s263_s1, [#allocation12], %s3370_s8, %s3370_s8, %s3369_s9  }
  0x65   : > { %s3374_s17 = sshll.u32 %s2779_s27, 8  ;;  %s3375_s0 = sld [smem:[#allocation22_spill]] }
  0x66   : > { %s3376_s29 = sshll.u32 %s2913_s19, 4  ;;  %s277_s20 = scalar_lea.sflag [#allocation3], %s2913_s19 }
  0x67   : > { %s280_s18 = scalar_lea.vmem [#allocation2], %s3376_s29 }
  0x68   : > { %s287_s21 = sshll.u32 %s280_s18, 4  ;;  %s3013_s21 = int_to_ptr.vmem [resolvable:$true] %s287_s21 }
  0x6b   : > { %s3009_s26 = scalar_lea.hbm %s3375_s0, %s3374_s17  ;;  %s2652_s8 = scalar_lea.hbm %s3375_s0, 512 }
  0x6c   : > { %s2647_s30 = scalar_lea.hbm %s3009_s26, 256  ;;  %p2653_p10 = scmp.lt.s32.totalorder %s3009_s26, %s3375_s0 }
  0x6d   : > { %p2648_p8 = scmp.ne.s32.totalorder %s3009_s26, %s2647_s30  ;;  %p2654_p1 = scmp.lt.s32.totalorder %s2652_s8, %s2647_s30 }
  0x6f   : > { %p2650_p9 = pnand %p2648_p8, %p2956_p11  ;;  %p2655_p5 = por %p2654_p1, %p2653_p10 }
  0x71   : > { %p2651_p6 = pneg %p2650_p9 }
  0x73   : > { %p2656_p12 = pnand %p2655_p5, %p2651_p6 }
  0x75   : > { %2659 = shalt.err (!%p2656_p12)
}
  0x76   : > { %s2660_s10 = scalar_lea.vmem %s3013_s21, 256  ;;  %s2787_s29 = smov [#allocation2]  }
  0x77   : > { %p2661_p0 = scmp.ne.s32.totalorder %s3013_s21, %s2660_s10  ;;  %s2665_s18 = sshll.u32 %s2787_s29, 4  ;;  %s2666_s18 = int_to_ptr.vmem [resolvable:$false] %s2665_s18 }
  0x78   : > { %s2667_s1 = scalar_lea.vmem %s2666_s18, 512  ;;  %p2668_p7 = scmp.lt.s32.totalorder %s3013_s21, %s2666_s18 }
  0x79   : > { %p2663_p13 = pnand %p2661_p0, %p2956_p11  ;;  %p2669_p3 = scmp.lt.s32.totalorder %s2667_s1, %s2660_s10 }
  0x7b   : > { %p2664_p2 = pneg %p2663_p13  ;;  %p2670_p8 = por %p2669_p3, %p2668_p7 }
  0x7d   : > { %p2671_p9 = pnand %p2670_p8, %p2664_p2 }
  0x7f   : > { %2674 = shalt.err (!%p2671_p9)
}
  0x80   : > { %s2788_s30 = smov 128   ;;  %s2789_s9 = smov 8  }
  0x81   : > { %2434 = dma.hbm_to_vmem [thread:$0]  (!%p2934_p4), %s3009_s26, 256, %s3013_s21, %s277_s20, %s2788_s30, %s2788_s30, %s2789_s9  }
  0x82   : > { %s2129_s8 = sshll.u32 %s2913_s19, 1  ;;  %s2210_s17 = sshll.u32 %s2779_s27, 5 }
  0x83   : > { %s3043_s10 = scalar_lea.hbm %s3333_s2, %s2210_s17  ;;  %s323_s18 = scalar_lea.vmem [#allocation7], %s2129_s8 }
  0x84   : > { %s330_s1 = sshll.u32 %s323_s18, 4  ;;  %s2675_s0 = scalar_lea.hbm %s3043_s10, 32  ;;  %s3045_s1 = int_to_ptr.vmem [resolvable:$true] %s330_s1 }
  0x85   : > { %p2676_p6 = scmp.ne.s32.totalorder %s3043_s10, %s2675_s0  ;;  %s2680_s21 = scalar_lea.hbm %s3333_s2, 64 }
  0x86   : > { %p2681_p5 = scmp.lt.s32.totalorder %s3043_s10, %s3333_s2  ;;  %p2682_p12 = scmp.lt.s32.totalorder %s2680_s21, %s2675_s0 }
  0x87   : > { %p2678_p10 = pnand %p2676_p6, %p2956_p11 }
  0x88   : > { %p2683_p0 = por %p2682_p12, %p2681_p5 }
  0x89   : > { %p2679_p1 = pneg %p2678_p10 }
  0x8b   : > { %p2684_p13 = pnand %p2683_p0, %p2679_p1 }
  0x8d   : > { %2687 = shalt.err (!%p2684_p13)
}
  0x8e   : > { %s2688_s9 = scalar_lea.vmem %s3045_s1, 32  ;;  %s2790_s8 = smov [#allocation7]  }
  0x8f   : > { %p2689_p2 = scmp.ne.s32.totalorder %s3045_s1, %s2688_s9  ;;  %s2693_s17 = sshll.u32 %s2790_s8, 4  ;;  %s2694_s17 = int_to_ptr.vmem [resolvable:$false] %s2693_s17 }
  0x90   : > { %s2695_s23 = scalar_lea.vmem %s2694_s17, 64  ;;  %p2696_p8 = scmp.lt.s32.totalorder %s3045_s1, %s2694_s17 }
  0x91   : > { %p2691_p7 = pnand %p2689_p2, %p2956_p11  ;;  %p2697_p9 = scmp.lt.s32.totalorder %s2695_s23, %s2688_s9 }
  0x93   : > { %p2692_p3 = pneg %p2691_p7  ;;  %p2698_p6 = por %p2697_p9, %p2696_p8 }
  0x95   : > { %p2699_p10 = pnand %p2698_p6, %p2692_p3 }
  0x97   : > { %2702 = shalt.err (!%p2699_p10)
}
  0x98   : > { %s2791_s0 = smov 16   ;;  %s2792_s29 = smov 1  }
  0x99   : > { %2440 = dma.hbm_to_vmem [thread:$0]  (!%p2934_p4), %s3043_s10, 32, %s3045_s1, %s2950_s11, %s2791_s0, %s2791_s0, %s2792_s29  }
  0x9a   : > { %p3377_p11 = scmp.ne.s32.totalorder %s3363_s15, 0 }
  0x9b   : > { %s3071_s22 = sand.u32 (!%p3377_p11), 1, %s2771_s25   ;;  %p3378_p1 = scmp.ne.s32.totalorder (!%p3377_p11), %s3360_s12, 0 }
  0x9c   : > { %342 = sbr.rel (%p3377_p11) target bundleno = 1685 (0x695), region = 48  ;;  %s3074_s18 = sshll.u32 (!%p3377_p11), %s3071_s22, 4 }
  0x9d   : > { %s345_s26 = scalar_lea.sflag (!%p3377_p11), [#allocation3], %s3071_s22  ;;  %s348_s19 = scalar_lea.vmem (!%p3377_p11), [#allocation2], %s3074_s18 }
  0xa1   : > { %2746 = dma.done.wait (%p3378_p1), %s345_s26, 256  }
  0xa2   : > { %2748 = vsyncadd (%p3378_p1), %s345_s26, 4294967040  ;;  %s353_s15 = sand.u32 1, %s2859_s28   ;;  %s357_s11 = scalar_lea.vmem [#allocation5], %s3074_s18 }
  0xa3   : > { %s354_s16 = scalar_lea.sflag [#allocation6], %s353_s15 }
  0xa4   : > { %2750 = dma.done.wait (%p3378_p1), %s354_s16, 288  }
  0xa5   : > { %2752 = vsyncadd (%p3378_p1), %s354_s16, 4294967008  ;;  %s2135_s10 = sshll.u32 %s3071_s22, 1  ;;  %p3379_p4 = scmp.eq.s32.totalorder %s2859_s28, 0 }
  0xa6   : > { %s3089_s1 = scalar_lea.vmem [#allocation7], %s2135_s10 }
  0xa7   : > { %2754 = dma.done.wait (%p3379_p4), [#allocation9], 512   ;;  %p3380_p5 = pmov %p3379_p4 }
  0xa8   : > { %p3381_p12 = pmov %p3379_p4 }
  0xa9   : > { %2756 = vsyncadd (%p3380_p5), [#allocation9], 4294966784 }
  0xaa   : > { %2758 = dma.done.wait (%p3381_p12), [#allocation12], 256   ;;  %p3382_p0 = pmov %p3379_p4 }
  0xab   : > { %v3099_v0 = vld [vmem:[%s348_s19] sm:$0xff]  ;;  %vm429_vm0 = vcmask 261120   ;;  %v3101_v1 = vld [vmem:[%s348_s19 + $0x8] sm:$0xff]  ;;  %v2793_v7 = vmov 0.0   ;;  %vm2794_vm1 = vmmov 0   ;;  %vm873_vm2 = vcmask 1043456  }
  0xac   : > { %2760 = vsyncadd (%p3382_p0), [#allocation12], 4294967040  ;;  %v427_v2 = vmul.f32 %v3099_v0, %v3099_v0  ;;  %v428_v3 = vmul.f32 %v3101_v1, %v3101_v1  ;;  %v2499_v6 = vld [vmem:[#allocation8 + $0x8] sm:$0xff]   ;;  %2265 = vmatprep.subr.bf16.mxu0 %v2793_v7  ;;  %2269 = vmatprep.mubr.msk.bf16.mxu0 %vm2794_vm1, %v2793_v7  ;;  %v2500_v8 = vld [vmem:[#allocation8] sm:$0xff]   ;;  %vm869_vm3 = vcmask 64512   ;;  %vm1261_vm4 = vcmask 130048  }
  0xad   : > { %2266 = vmatpush3.bf16.msra.mxu0 %v2499_v6  ;;  %v2501_v9 = vld [vmem:[#allocation10 + $0x8] sm:$0xff]   ;;  %v2502_v10 = vld [vmem:[#allocation10] sm:$0xff]   ;;  %s2217_s20 = sshll.u32 %s2859_s28, 8  ;;  %s418_s30 = scalar_lea.vmem [#allocation13], %s3074_s18 }
  0xae   : > { %v430_v4 = vsel %vm429_vm0, %v427_v2, 0.0  ;;  %v433_v5 = vsel %vm429_vm0, %v428_v3, 0.0  ;;  %2267 = vmatprep.subr.bf16.mxu0 %v2793_v7  ;;  %v2503_v11 = vld [vmem:[%s357_s11] sm:$0xff]   ;;  %2273 = vmatprep.subr.bf16.mxu1 %v2501_v9  ;;  %v2504_v12 = vld [vmem:[%s357_s11 + $0x8] sm:$0xff]   ;;  %s1971_s9 = sshll.u32 %s418_s30, 4  ;;  %s3284_s23 = scalar_lea.hbm %s3338_s7, %s2217_s20  ;;  %s3286_s9 = int_to_ptr.vmem [resolvable:$true] %s1971_s9 }
  0xaf   : > { %431 = vadd.xlane.f32.xlu0 %v430_v4  ;;  %2277 = vmatprep.mubr.msk.bf16.mxu1 %vm429_vm0, %v2503_v11  ;;  %v2140_v22 = vld [vmem:[%s3334_s3] ss:$0 sm:$0xff]  ;;  %s1958_s28 = scalar_lea.sflag [#allocation4], %s3071_s22  ;;  %s2703_s0 = scalar_lea.vmem %s3286_s9, 256 }
  0xb0   : > { %2274 = vmatpush3.bf16.msra.mxu1 %v2501_v9  ;;  %p2704_p13 = scmp.ne.s32.totalorder %s3286_s9, %s2703_s0  ;;  %p3383_p2 = scmp.ne.s32.totalorder %s3361_s13, 0 }
  0xb1   : > { %2268 = vmatpush3.bf16.msra.mxu0 %v2500_v8  ;;  %2275 = vmatprep.subr.bf16.mxu1 %v2502_v10  ;;  %s2795_s29 = smov [#allocation13]  }
  0xb2   : > { %2281 = vmatprep.subr.bf16.mxu0 %v2793_v7  ;;  %p2705_p7 = pnand %p2704_p13, %p3383_p2  ;;  %s2707_s18 = sshll.u32 %s2795_s29, 4  ;;  %s2708_s18 = int_to_ptr.vmem [resolvable:$false] %s2707_s18 }
  0xb3   : > { %434 = vadd.xlane.f32.xlu0 %v433_v5  ;;  %s2709_s26 = scalar_lea.vmem %s2708_s18, 512  ;;  %p2710_p8 = scmp.lt.s32.totalorder %s3286_s9, %s2708_s18 }
  0xb4   : > { %2276 = vmatpush3.bf16.msra.mxu1 %v2502_v10  ;;  %p2706_p3 = pneg %p2705_p7  ;;  %p2711_p9 = scmp.lt.s32.totalorder %s2709_s26, %s2703_s0 }
  0xb5   : > { %2287 = vmatprep.subr.bf16.mxu1 %v2793_v7 }
  0xb6   : > { %p2712_p6 = por %p2711_p9, %p2710_p8 }
  0xb7   : > { %2278 = vmatmul.mubr.msk.bf16.vlgmr.msra.gmra.mxu1 %vm429_vm0, %v2504_v12 }
  0xb8   : > { %2289 = vmatprep.mubr.msk.bf16.mxu1 %vm2794_vm1, %v2793_v7  ;;  %p2713_p10 = pnand %p2712_p6, %p2706_p3 }
 0x138   : > { %v432_v13 = vpop.xlane.xlu0 %431 }
 0x139   : > { %v437_v14 = vmul.f32 0.03125, %v432_v13 }
 0x13b   : > { %v439_v15 = vadd.f32 1e-06, %v437_v14 }
 0x13c   : > { %v435_v16 = vpop.xlane.xlu0 %434 }
 0x13d   : > { %2505 = vrsqrt.f32 %v439_v15  ;;  %v438_v17 = vmul.f32 0.03125, %v435_v16 }
 0x13f   : > { %v440_v18 = vadd.f32 1e-06, %v438_v17 }
 0x141   : > { %2507 = vrsqrt.f32 %v440_v18 }
 0x14a   : > { %v2506_v19 = vpop.eup %2505 }
 0x14b   : > { %v443_v20 = vmul.f32 %v2506_v19, %v3099_v0 }
 0x14d   : > { %v451_v24 = vmul.f32 %v2140_v22, %v443_v20 }
 0x14e   : > { %v2508_v21 = vpop.eup %2507 }
 0x14f   : > { %v444_v23 = vmul.f32 %v2508_v21, %v3101_v1 }
 0x151   : > { %v452_v25 = vmul.f32 %v2140_v22, %v444_v23 }
 0x153   : > { %v453_v26 = vpack.c.bf16 %v452_v25, %v451_v24  ;;  %v2184_v25 = vld [vmem:[%s3089_s1] ss:$0 sm:$0xff] }
 0x155   : > { %2270 = vmatmul.mubr.msk.bf16.vlgmr.msra.gmra.mxu0 %vm429_vm0, %v453_v26 }
 0x156   : > { %2283 = vmatprep.mubr.msk.bf16.mxu0 %vm2794_vm1, %v2793_v7 }
 0x177   : > { %v2279_v27 = vpop.f32.mrf.mxu1 }
 0x179   : > { %v585_v28 = vpop.f32.mrf.mxu1 }
 0x17b   : > { %v2280_v29 = vpop.f32.mrf.mxu1 }
 0x17c   : > { %v601_v30 = vpack.c.bf16 %v2280_v29, %v2279_v27 }
 0x17d   : > { %v588_v31 = vpop.f32.mrf.mxu1 }
 0x17e   : > { %v600_v32 = vpack.c.bf16 %v588_v31, %v585_v28 }
 0x180   : > { %797 = vxpose.xlu0.c.b16.start.end [1/1] (short) (narrow) %v600_v32, 64 }
 0x1e2   : > { %v805_v37 = vpop.trf.xlu0 }
 0x1e3   : > { %v2160_v39 = vcombine.low %v805_v37, %v805_v37  ;;  %v2161_v40 = vcombine.high %v805_v37, %v805_v37 }
 0x1e5   : > { %v875_v42 = vsel %vm873_vm2, %v2160_v39, 0  ;;  %v921_v43 = vsel %vm873_vm2, %v2161_v40, 0 }
 0x1e6   : > { %2282 = vmatpush3.bf16.msra.mxu0 %v875_v42  ;;  %2288 = vmatpush3.bf16.msra.mxu1 %v921_v43  ;;  %v806_v59 = vpop.trf.xlu0 }
 0x1e7   : > { %2293 = vmatprep.subr.bf16.mxu0 %v2793_v7  ;;  %2299 = vmatprep.subr.bf16.mxu1 %v2793_v7  ;;  %v2162_v61 = vcombine.low %v806_v59, %v806_v59  ;;  %v2163_v62 = vcombine.high %v806_v59, %v806_v59 }
 0x1e9   : > { %v967_v63 = vsel %vm873_vm2, %v2162_v61, 0  ;;  %v1013_v3 = vsel %vm873_vm2, %v2163_v62, 0 }
 0x1ea   : > { %v807_v20 = vpop.trf.xlu0 }
 0x1eb   : > { %v2168_v21 = vcombine.low %v807_v20, %v807_v20  ;;  %v2169_v22 = vcombine.high %v807_v20, %v807_v20 }
 0x1ed   : > { %v1362_v23 = vsel %vm1261_vm4, %v2168_v21, 0  ;;  %v1408_v24 = vsel %vm1261_vm4, %v2169_v22, 0 }
 0x215   : > { %v511_v33 = vpop.f32.mrf.mxu0 }
 0x216   : > { %v2211_v34 = vpack.c.bf16 %v511_v33, %v511_v33 }
 0x217   : > { %v2271_v35 = vpop.f32.mrf.mxu0 }
 0x218   : > { %609 = vxpose.xlu1.c.b16.start.end [1/1] (short) (narrow) %v2211_v34, 32 }
 0x219   : > { %v514_v36 = vpop.f32.mrf.mxu0 }
 0x21a   : > { %v2212_v38 = vpack.c.bf16 %v514_v36, %v514_v36 }
 0x21b   : > { %v2272_v41 = vpop.f32.mrf.mxu0 }
 0x21d   : > { %625 = vxpose.xlu1.c.b16.start.end [1/1] (short) (narrow) %v2212_v38, 32 }
 0x222   : > { %813 = vxpose.xlu1.c.b16.start.end [1/1] (short) (narrow) %v601_v30, 64 }
 0x27a   : > { %v617_v44 = vpop.trf.xlu1 }
 0x27b   : > { %v2152_v45 = vcombine.low %v617_v44, %v617_v44  ;;  %v2153_v47 = vcombine.high %v617_v44, %v617_v44 }
 0x27d   : > { %669 = vxpose.xlu1.c.b16.start.end [1/1] (short) (narrow) %v2152_v45, 16 }
 0x27e   : > { %v618_v46 = vpop.trf.xlu1 }
 0x27f   : > { %v2154_v48 = vcombine.low %v618_v46, %v618_v46  ;;  %v2155_v50 = vcombine.high %v618_v46, %v618_v46 }
 0x281   : > { %685 = vxpose.xlu1.c.b16.start.end [1/1] (short) (narrow) %v2153_v47, 16  ;;  %v2185_v47 = vld [vmem:[%s3089_s1 + $0x1] ss:$0 sm:$0xff] }
 0x282   : > { %v633_v49 = vpop.trf.xlu1 }
 0x283   : > { %v2156_v51 = vcombine.low %v633_v49, %v633_v49  ;;  %v2157_v53 = vcombine.high %v633_v49, %v633_v49 }
 0x285   : > { %701 = vxpose.xlu1.c.b16.start.end [1/1] (short) (narrow) %v2154_v48, 16 }
 0x286   : > { %v634_v52 = vpop.trf.xlu1 }
 0x287   : > { %v2158_v54 = vcombine.low %v634_v52, %v634_v52  ;;  %v2159_v55 = vcombine.high %v634_v52, %v634_v52 }
 0x289   : > { %717 = vxpose.xlu1.c.b16.start.end [1/1] (short) (narrow) %v2155_v50, 16 }
 0x28a   : > { %v821_v56 = vpop.trf.xlu1 }
 0x28b   : > { %v2164_v5 = vcombine.low %v821_v56, %v821_v56  ;;  %v2165_v8 = vcombine.high %v821_v56, %v821_v56 }
 0x28d   : > { %733 = vxpose.xlu1.c.b16.start.end [1/1] (short) (narrow) %v2156_v51, 16  ;;  %v1059_v9 = vsel %vm873_vm2, %v2164_v5, 0  ;;  %v1105_v12 = vsel %vm873_vm2, %v2165_v8, 0 }
 0x28e   : > { %v822_v57 = vpop.trf.xlu1 }
 0x28f   : > { %v2166_v11 = vcombine.low %v822_v57, %v822_v57  ;;  %v2167_v14 = vcombine.high %v822_v57, %v822_v57 }
 0x291   : > { %749 = vxpose.xlu1.c.b16.start.end [1/1] (short) (narrow) %v2157_v53, 16  ;;  %v1151_v15 = vsel %vm873_vm2, %v2166_v11, 0  ;;  %v1197_v17 = vsel %vm873_vm2, %v2167_v14, 0 }
 0x292   : > { %v3135_v58 = vpop.trf.xlu1 }
 0x295   : > { %765 = vxpose.xlu1.c.b16.start.end [1/1] (short) (narrow) %v2158_v54, 16 }
 0x296   : > { %v3137_v60 = vpop.trf.xlu1 }
 0x299   : > { %781 = vxpose.xlu1.c.b16.start.end [1/1] (short) (narrow) %v2159_v55, 16 }
 0x2df   : > { %v677_v2 = vpop.trf.xlu1 }
 0x2e0   : > { %2284 = vmatmul.mubr.msk.bf16.vlgmr.msra.gmra.mxu0 %vm869_vm3, %v677_v2 }
 0x2e1   : > { %2294 = vmatpush3.bf16.msra.mxu0 %v967_v63  ;;  %2295 = vmatprep.mubr.msk.bf16.mxu0 %vm2794_vm1, %v2793_v7 }
 0x2e2   : > { %2305 = vmatprep.subr.bf16.mxu0 %v2793_v7 }
 0x2e3   : > { %v693_v4 = vpop.trf.xlu1 }
 0x2e4   : > { %2290 = vmatmul.mubr.msk.bf16.vlgmr.msra.gmra.mxu1 %vm869_vm3, %v693_v4 }
 0x2e5   : > { %2300 = vmatpush3.bf16.msra.mxu1 %v1013_v3  ;;  %2301 = vmatprep.mubr.msk.bf16.mxu1 %vm2794_vm1, %v2793_v7 }
 0x2e6   : > { %2311 = vmatprep.subr.bf16.mxu1 %v2793_v7 }
 0x2e7   : > { %v709_v6 = vpop.trf.xlu1 }
 0x2e8   : > { %2296 = vmatmul.mubr.msk.bf16.vlgmr.msra.gmra.mxu0 %vm869_vm3, %v709_v6 }
 0x2e9   : > { %2306 = vmatpush3.bf16.msra.mxu0 %v1059_v9  ;;  %2307 = vmatprep.mubr.msk.bf16.mxu0 %vm2794_vm1, %v2793_v7 }
 0x2ea   : > { %2317 = vmatprep.subr.bf16.mxu0 %v2793_v7 }
 0x2eb   : > { %v725_v10 = vpop.trf.xlu1 }
 0x2ec   : > { %2302 = vmatmul.mubr.msk.bf16.vlgmr.msra.gmra.mxu1 %vm869_vm3, %v725_v10 }
 0x2ed   : > { %2312 = vmatpush3.bf16.msra.mxu1 %v1105_v12  ;;  %2313 = vmatprep.mubr.msk.bf16.mxu1 %vm2794_vm1, %v2793_v7 }
 0x2ee   : > { %2323 = vmatprep.subr.bf16.mxu1 %v2793_v7 }
 0x2ef   : > { %v741_v13 = vpop.trf.xlu1 }
 0x2f0   : > { %2308 = vmatmul.mubr.msk.bf16.vlgmr.msra.gmra.mxu0 %vm869_vm3, %v741_v13 }
 0x2f1   : > { %2318 = vmatpush3.bf16.msra.mxu0 %v1151_v15  ;;  %2319 = vmatprep.mubr.msk.bf16.mxu0 %vm2794_vm1, %v2793_v7 }
 0x2f2   : > { %2329 = vmatprep.subr.bf16.mxu0 %v2793_v7 }
 0x2f3   : > { %v757_v16 = vpop.trf.xlu1 }
 0x2f4   : > { %2314 = vmatmul.mubr.msk.bf16.vlgmr.msra.gmra.mxu1 %vm869_vm3, %v757_v16  ;;  %v3189_v16 = vpop.trf.xlu0 }
 0x2f5   : > { %2324 = vmatpush3.bf16.msra.mxu1 %v1197_v17  ;;  %2325 = vmatprep.mubr.msk.bf16.mxu1 %vm2794_vm1, %v2793_v7 }
 0x2f6   : > { %2335 = vmatprep.subr.bf16.mxu1 %v2793_v7 }
 0x2f7   : > { %v773_v18 = vpop.trf.xlu1 }
 0x2f8   : > { %2320 = vmatmul.mubr.msk.bf16.vlgmr.msra.gmra.mxu0 %vm869_vm3, %v773_v18 }
 0x2f9   : > { %2331 = vmatprep.mubr.msk.bf16.mxu0 %vm2794_vm1, %v2793_v7  ;;  %2330 = vmatpush3.bf16.xpose.msra.mxu0 %v1362_v23 }
 0x2fa   : > { %2341 = vmatprep.subr.bf16.mxu0 %v2793_v7 }
 0x2fb   : > { %v789_v19 = vpop.trf.xlu1 }
 0x2fc   : > { %2326 = vmatmul.mubr.msk.bf16.vlgmr.msra.gmra.mxu1 %vm869_vm3, %v789_v19 }
 0x2fd   : > { %2337 = vmatprep.mubr.msk.bf16.mxu1 %vm2794_vm1, %v2793_v7  ;;  %2336 = vmatpush3.bf16.xpose.msra.mxu1 %v1408_v24 }
 0x2fe   : > { %2347 = vmatprep.subr.bf16.mxu1 %v2793_v7 }
 0x3a0   : > { %v911_v26 = vpop.f32.mrf.mxu0 }
 0x3a1   : > { %v1253_v27 = vadd.f32 %v2184_v25, %v911_v26 }
 0x3a2   : > { %v2285_v28 = vpop.f32.mrf.mxu0 }
 0x3a3   : > { %v1262_v29 = vsel %vm1261_vm4, %v1253_v27, -inf }
 0x3a4   : > { %v957_v30 = vpop.f32.mrf.mxu1  ;;  %1263 = vmax.xlane.f32.xlu0 %v1262_v29  ;;  %v914_v31 = vpop.f32.mrf.mxu0 }
 0x3a5   : > { %v1254_v32 = vadd.f32 %v2184_v25, %v957_v30 }
 0x3a6   : > { %v2286_v33 = vpop.f32.mrf.mxu0  ;;  %v2291_v34 = vpop.f32.mrf.mxu1 }
 0x3a7   : > { %v1265_v35 = vsel %vm1261_vm4, %v1254_v32, -inf }
 0x3a8   : > { %1266 = vmax.xlane.f32.xlu1 %v1265_v35  ;;  %v960_v36 = vpop.f32.mrf.mxu1  ;;  %v1003_v37 = vpop.f32.mrf.mxu0 }
 0x3a9   : > { %v1255_v38 = vadd.f32 %v2184_v25, %v1003_v37 }
 0x3aa   : > { %v2292_v39 = vpop.f32.mrf.mxu1  ;;  %v2297_v40 = vpop.f32.mrf.mxu0 }
 0x3ab   : > { %v1268_v41 = vsel %vm1261_vm4, %v1255_v38, -inf }
 0x3ac   : > { %v1049_v42 = vpop.f32.mrf.mxu1  ;;  %1269 = vmax.xlane.f32.xlu1 %v1268_v41  ;;  %v1006_v43 = vpop.f32.mrf.mxu0 }
 0x3ad   : > { %v1256_v44 = vadd.f32 %v2184_v25, %v1049_v42 }
 0x3ae   : > { %v2298_v45 = vpop.f32.mrf.mxu0  ;;  %v2303_v46 = vpop.f32.mrf.mxu1 }
 0x3af   : > { %v1271_v48 = vsel %vm1261_vm4, %v1256_v44, -inf }
 0x3b0   : > { %v1052_v49 = vpop.f32.mrf.mxu1  ;;  %1272 = vmax.xlane.f32.xlu1 %v1271_v48  ;;  %v1095_v50 = vpop.f32.mrf.mxu0 }
 0x3b1   : > { %v1257_v51 = vadd.f32 %v2185_v47, %v1095_v50 }
 0x3b2   : > { %v2304_v52 = vpop.f32.mrf.mxu1  ;;  %v2309_v53 = vpop.f32.mrf.mxu0 }
 0x3b3   : > { %v1274_v54 = vsel %vm1261_vm4, %v1257_v51, -inf }
 0x3b4   : > { %v1141_v55 = vpop.f32.mrf.mxu1  ;;  %1275 = vmax.xlane.f32.xlu1 %v1274_v54  ;;  %v1098_v56 = vpop.f32.mrf.mxu0 }
 0x3b5   : > { %v1258_v57 = vadd.f32 %v2185_v47, %v1141_v55 }
 0x3b6   : > { %v2310_v59 = vpop.f32.mrf.mxu0  ;;  %v2315_v61 = vpop.f32.mrf.mxu1 }
 0x3b7   : > { %v1277_v62 = vsel %vm1261_vm4, %v1258_v57, -inf }
 0x3b8   : > { %1278 = vmax.xlane.f32.xlu0 %v1277_v62  ;;  %v1144_v63 = vpop.f32.mrf.mxu1  ;;  %v1187_v2 = vpop.f32.mrf.mxu0 }
 0x3b9   : > { %v1259_v3 = vadd.f32 %v2185_v47, %v1187_v2  ;;  %v2170_v2 = vcombine.low %v3189_v16, %v3189_v16 }
 0x3ba   : > { %v2316_v4 = vpop.f32.mrf.mxu1  ;;  %v2321_v5 = vpop.f32.mrf.mxu0 }
 0x3bb   : > { %v1280_v6 = vsel %vm1261_vm4, %v1259_v3, -inf }
 0x3bc   : > { %v1233_v8 = vpop.f32.mrf.mxu1  ;;  %1281 = vmax.xlane.f32.xlu1 %v1280_v6  ;;  %v1190_v9 = vpop.f32.mrf.mxu0 }
 0x3bd   : > { %v1260_v10 = vadd.f32 %v2185_v47, %v1233_v8  ;;  %v2171_v8 = vcombine.high %v3189_v16, %v3189_v16  ;;  %v1454_v9 = vsel %vm1261_vm4, %v2170_v2, 0 }
 0x3be   : > { %v2322_v11 = vpop.f32.mrf.mxu0  ;;  %v2327_v12 = vpop.f32.mrf.mxu1 }
 0x3bf   : > { %v1283_v13 = vsel %vm1261_vm4, %v1260_v10, -inf }
 0x3c0   : > { %1284 = vmax.xlane.f32.xlu0 %v1283_v13  ;;  %v1236_v14 = vpop.f32.mrf.mxu1 }
 0x3c1   : > { %v2172_v14 = vcombine.low %v3135_v58, %v3135_v58 }
 0x3c2   : > { %v2328_v15 = vpop.f32.mrf.mxu1 }
 0x3c3   : > { %v1500_v15 = vsel %vm1261_vm4, %v2171_v8, 0 }
 0x42d   : > { %v1264_v17 = vpop.xlane.xlu0 %1263 }
 0x42e   : > { %v1286_v18 = vsub.f32 %v1253_v27, %v1264_v17 }
 0x430   : > { %v1294_v19 = vmul.f32 1.442695, %v1286_v18 }
 0x431   : > { %v1267_v20 = vpop.xlane.xlu1 %1266 }
 0x432   : > { %2509 = vpow2.f32 %v1294_v19  ;;  %v1287_v21 = vsub.f32 %v1254_v32, %v1267_v20  ;;  %v2173_v20 = vcombine.high %v3135_v58, %v3135_v58 }
 0x434   : > { %v1296_v22 = vmul.f32 1.442695, %v1287_v21  ;;  %v1546_v21 = vsel %vm1261_vm4, %v2172_v14, 0  ;;  %v1592_v58 = vsel %vm1261_vm4, %v2173_v20, 0 }
 0x435   : > { %v1270_v23 = vpop.xlane.xlu1 %1269 }
 0x436   : > { %2511 = vpow2.f32 %v1296_v22  ;;  %v1288_v24 = vsub.f32 %v1255_v38, %v1270_v23 }
 0x438   : > { %v1298_v25 = vmul.f32 1.442695, %v1288_v24 }
 0x439   : > { %v1273_v26 = vpop.xlane.xlu1 %1272 }
 0x43a   : > { %2513 = vpow2.f32 %v1298_v25  ;;  %v1289_v28 = vsub.f32 %v1256_v44, %v1273_v26  ;;  %v2174_v26 = vcombine.low %v3137_v60, %v3137_v60 }
 0x43c   : > { %v1300_v29 = vmul.f32 1.442695, %v1289_v28 }
 0x43d   : > { %v1276_v30 = vpop.xlane.xlu1 %1275 }
 0x43e   : > { %2515 = vpow2.f32 %v1300_v29  ;;  %v1290_v31 = vsub.f32 %v1257_v51, %v1276_v30 }
 0x43f   : > { %v2510_v33 = vpop.eup %2509 }
 0x440   : > { %v1302_v34 = vmul.f32 1.442695, %v1290_v31  ;;  %v1310_v27 = vsel %vm1261_vm4, %v2510_v33, 0.0  ;;  %v2175_v31 = vcombine.high %v3137_v60, %v3137_v60 }
 0x441   : > { %1311 = vadd.xlane.f32.xlu1 %v1310_v27  ;;  %v1279_v35 = vpop.xlane.xlu0 %1278 }
 0x442   : > { %2517 = vpow2.f32 %v1302_v34  ;;  %v1291_v32 = vsub.f32 %v1258_v57, %v1279_v35 }
 0x443   : > { %v2512_v36 = vpop.eup %2511 }
 0x444   : > { %v1304_v37 = vmul.f32 1.442695, %v1291_v32  ;;  %v1313_v38 = vsel %vm1261_vm4, %v2512_v36, 0.0  ;;  %v1684_v32 = vsel %vm1261_vm4, %v2175_v31, 0 }
 0x445   : > { %1314 = vadd.xlane.f32.xlu0 %v1313_v38  ;;  %v1282_v39 = vpop.xlane.xlu1 %1281 }
 0x446   : > { %2519 = vpow2.f32 %v1304_v37  ;;  %v1292_v40 = vsub.f32 %v1259_v3, %v1282_v39 }
 0x447   : > { %v2514_v41 = vpop.eup %2513 }
 0x448   : > { %v1306_v42 = vmul.f32 1.442695, %v1292_v40  ;;  %v1316_v43 = vsel %vm1261_vm4, %v2514_v41, 0.0  ;;  %v1736_v40 = vld [vmem:[#allocation11 + $0x4] sm:$0xf] }
 0x449   : > { %1317 = vadd.xlane.f32.xlu1 %v1316_v43  ;;  %v1285_v44 = vpop.xlane.xlu0 %1284 }
 0x44a   : > { %2521 = vpow2.f32 %v1306_v42  ;;  %v1293_v45 = vsub.f32 %v1260_v10, %v1285_v44  ;;  %v1734_v42 = vld [vmem:[#allocation11] sm:$0xf] }
 0x44b   : > { %v2516_v46 = vpop.eup %2515  ;;  %v1798_v43 = vsel %vm873_vm2, %v1734_v42, 0 }
 0x44c   : > { %v1308_v47 = vmul.f32 1.442695, %v1293_v45  ;;  %v1319_v48 = vsel %vm1261_vm4, %v2516_v46, 0.0 }
 0x44d   : > { %1320 = vadd.xlane.f32.xlu0 %v1319_v48 }
 0x44e   : > { %2523 = vpow2.f32 %v1308_v47 }
 0x44f   : > { %v3195_v49 = vpop.eup %2517 }
 0x450   : > { %v1322_v50 = vsel %vm1261_vm4, %v3195_v49, 0.0 }
 0x451   : > { %1323 = vadd.xlane.f32.xlu1 %v1322_v50 }
 0x453   : > { %v3199_v51 = vpop.eup %2519 }
 0x454   : > { %v1325_v52 = vsel %vm1261_vm4, %v3199_v51, 0.0 }
 0x455   : > { %1326 = vadd.xlane.f32.xlu0 %v1325_v52 }
 0x457   : > { %v3203_v53 = vpop.eup %2521 }
 0x458   : > { %v1328_v54 = vsel %vm1261_vm4, %v3203_v53, 0.0 }
 0x459   : > { %1329 = vadd.xlane.f32.xlu1 %v1328_v54 }
 0x45b   : > { %v3207_v55 = vpop.eup %2523 }
 0x45c   : > { %v1331_v56 = vsel %vm1261_vm4, %v3207_v55, 0.0 }
 0x45d   : > { %1332 = vadd.xlane.f32.xlu0 %v1331_v56 }
 0x4ca   : > { %v1312_v57 = vpop.xlane.xlu1 %1311 }
 0x4cb   : > { %2525 = vrcp.f32 %v1312_v57 }
 0x4ce   : > { %v1315_v59 = vpop.xlane.xlu0 %1314 }
 0x4cf   : > { %2527 = vrcp.f32 %v1315_v59  ;;  %v1898_v59 = vld [vmem:[#allocation11 + $0xc] sm:$0xf] }
 0x4d0   : > { %v1908_v2 = vsel %vm873_vm2, %v1898_v59, 0 }
 0x4d2   : > { %v1318_v61 = vpop.xlane.xlu1 %1317 }
 0x4d3   : > { %2529 = vrcp.f32 %v1318_v61 }
 0x4d6   : > { %v1321_v62 = vpop.xlane.xlu0 %1320 }
 0x4d7   : > { %2531 = vrcp.f32 %v1321_v62 }
 0x4d8   : > { %v2526_v63 = vpop.eup %2525 }
 0x4d9   : > { %v1342_v3 = vmul.f32 %v2526_v63, %v2510_v33  ;;  %v1638_v33 = vsel %vm1261_vm4, %v2174_v26, 0 }
 0x4da   : > { %v1324_v4 = vpop.xlane.xlu1 %1323 }
 0x4db   : > { %2533 = vrcp.f32 %v1324_v4  ;;  %v1350_v5 = vpack.c.bf16 %v1342_v3, %v1342_v3 }
 0x4dc   : > { %v2528_v6 = vpop.eup %2527 }
 0x4dd   : > { %2332 = vmatmul.mubr.msk.bf16.vlgmr.msra.gmra.mxu0 %vm1261_vm4, %v1350_v5  ;;  %v1343_v10 = vmul.f32 %v2528_v6, %v2512_v36  ;;  %v1842_v5 = vld [vmem:[#allocation11 + $0x8] sm:$0xf] }
 0x4de   : > { %2342 = vmatpush3.bf16.xpose.msra.mxu0 %v1454_v9  ;;  %v1327_v11 = vpop.xlane.xlu0 %1326  ;;  %2343 = vmatprep.mubr.msk.bf16.mxu0 %vm2794_vm1, %v2793_v7 }
 0x4df   : > { %2535 = vrcp.f32 %v1327_v11  ;;  %v1351_v12 = vpack.c.bf16 %v1343_v10, %v1343_v10  ;;  %2353 = vmatprep.subr.bf16.mxu0 %v2793_v7  ;;  %v1852_v10 = vsel %vm873_vm2, %v1842_v5, 0 }
 0x4e0   : > { %v2530_v13 = vpop.eup %2529 }
 0x4e1   : > { %2338 = vmatmul.mubr.msk.bf16.vlgmr.msra.gmra.mxu1 %vm1261_vm4, %v1351_v12  ;;  %v1344_v16 = vmul.f32 %v2530_v13, %v2514_v41  ;;  %v1746_v41 = vsel %vm873_vm2, %v1736_v40, 0 }
 0x4e2   : > { %2348 = vmatpush3.bf16.xpose.msra.mxu1 %v1500_v15  ;;  %v1330_v17 = vpop.xlane.xlu1 %1329  ;;  %2349 = vmatprep.mubr.msk.bf16.mxu1 %vm2794_vm1, %v2793_v7 }
 0x4e3   : > { %2537 = vrcp.f32 %v1330_v17  ;;  %v1352_v18 = vpack.c.bf16 %v1344_v16, %v1344_v16  ;;  %2359 = vmatprep.subr.bf16.mxu1 %v2793_v7 }
 0x4e4   : > { %v2532_v19 = vpop.eup %2531 }
 0x4e5   : > { %2344 = vmatmul.mubr.msk.bf16.vlgmr.msra.gmra.mxu0 %vm1261_vm4, %v1352_v18  ;;  %v1345_v22 = vmul.f32 %v2532_v19, %v2516_v46 }
 0x4e6   : > { %2354 = vmatpush3.bf16.xpose.msra.mxu0 %v1546_v21  ;;  %v1333_v23 = vpop.xlane.xlu0 %1332  ;;  %2355 = vmatprep.mubr.msk.bf16.mxu0 %vm2794_vm1, %v2793_v7 }
 0x4e7   : > { %2539 = vrcp.f32 %v1333_v23  ;;  %v1353_v24 = vpack.c.bf16 %v1345_v22, %v1345_v22  ;;  %2365 = vmatprep.subr.bf16.mxu0 %v2793_v7 }
 0x4e8   : > { %v2534_v25 = vpop.eup %2533 }
 0x4e9   : > { %2350 = vmatmul.mubr.msk.bf16.vlgmr.msra.gmra.mxu1 %vm1261_vm4, %v1353_v24  ;;  %v1346_v28 = vmul.f32 %v2534_v25, %v3195_v49 }
 0x4ea   : > { %2360 = vmatpush3.bf16.xpose.msra.mxu1 %v1592_v58  ;;  %2361 = vmatprep.mubr.msk.bf16.mxu1 %vm2794_vm1, %v2793_v7 }
 0x4eb   : > { %v1354_v29 = vpack.c.bf16 %v1346_v28, %v1346_v28  ;;  %2371 = vmatprep.subr.bf16.mxu1 %v2793_v7 }
 0x4ec   : > { %v2536_v30 = vpop.eup %2535 }
 0x4ed   : > { %2356 = vmatmul.mubr.msk.bf16.vlgmr.msra.gmra.mxu0 %vm1261_vm4, %v1354_v29  ;;  %v1347_v34 = vmul.f32 %v2536_v30, %v3199_v51 }
 0x4ee   : > { %2366 = vmatpush3.bf16.xpose.msra.mxu0 %v1638_v33  ;;  %2367 = vmatprep.mubr.msk.bf16.mxu0 %vm2794_vm1, %v2793_v7 }
 0x4ef   : > { %v1355_v27 = vpack.c.bf16 %v1347_v34, %v1347_v34  ;;  %2377 = vmatprep.subr.bf16.mxu0 %v2793_v7 }
 0x4f0   : > { %v2538_v35 = vpop.eup %2537 }
 0x4f1   : > { %2362 = vmatmul.mubr.msk.bf16.vlgmr.msra.gmra.mxu1 %vm1261_vm4, %v1355_v27  ;;  %v1348_v60 = vmul.f32 %v2538_v35, %v3203_v53 }
 0x4f2   : > { %2372 = vmatpush3.bf16.xpose.msra.mxu1 %v1684_v32  ;;  %2373 = vmatprep.mubr.msk.bf16.mxu1 %vm2794_vm1, %v2793_v7 }
 0x4f3   : > { %v1356_v36 = vpack.c.bf16 %v1348_v60, %v1348_v60  ;;  %2383 = vmatprep.subr.bf16.mxu1 %v2793_v7 }
 0x4f4   : > { %v2540_v37 = vpop.eup %2539 }
 0x4f5   : > { %2368 = vmatmul.mubr.msk.bf16.vlgmr.msra.gmra.mxu0 %vm1261_vm4, %v1356_v36  ;;  %v1349_v38 = vmul.f32 %v2540_v37, %v3207_v55 }
 0x4f6   : > { %2379 = vmatprep.mubr.msk.bf16.mxu0 %vm2794_vm1, %v2793_v7  ;;  %2378 = vmatpush3.bf16.msra.mxu0 %v1746_v41 }
 0x4f7   : > { %v1357_v39 = vpack.c.bf16 %v1349_v38, %v1349_v38  ;;  %2389 = vmatprep.subr.bf16.mxu0 %v2793_v7 }
 0x4f9   : > { %2374 = vmatmul.mubr.msk.bf16.vlgmr.msra.gmra.mxu1 %vm1261_vm4, %v1357_v39 }
 0x4fa   : > { %2385 = vmatprep.mubr.msk.bf16.mxu1 %vm2794_vm1, %v2793_v7  ;;  %2384 = vmatpush3.bf16.msra.mxu1 %v1798_v43 }
 0x4fb   : > { %2395 = vmatprep.subr.bf16.mxu1 %v2793_v7 }
 0x59d   : > { %v1398_v44 = vpop.f32.mrf.mxu0 }
 0x59f   : > { %v2333_v45 = vpop.f32.mrf.mxu0 }
 0x5a1   : > { %v1401_v46 = vpop.f32.mrf.mxu0  ;;  %v1444_v47 = vpop.f32.mrf.mxu1 }
 0x5a3   : > { %v2334_v48 = vpop.f32.mrf.mxu0  ;;  %v2339_v49 = vpop.f32.mrf.mxu1 }
 0x5a5   : > { %v1447_v50 = vpop.f32.mrf.mxu1  ;;  %v1490_v51 = vpop.f32.mrf.mxu0 }
 0x5a7   : > { %v2340_v52 = vpop.f32.mrf.mxu1  ;;  %v2345_v53 = vpop.f32.mrf.mxu0 }
 0x5a9   : > { %v1493_v54 = vpop.f32.mrf.mxu0  ;;  %v1536_v55 = vpop.f32.mrf.mxu1 }
 0x5ab   : > { %v2346_v56 = vpop.f32.mrf.mxu0  ;;  %v2351_v57 = vpop.f32.mrf.mxu1 }
 0x5ad   : > { %v1539_v61 = vpop.f32.mrf.mxu1  ;;  %v1582_v62 = vpop.f32.mrf.mxu0 }
 0x5ae   : > { %v2214_v63 = vpack.c.bf16 %v1582_v62, %v1398_v44 }
 0x5af   : > { %v2352_v3 = vpop.f32.mrf.mxu1  ;;  %v2357_v4 = vpop.f32.mrf.mxu0 }
 0x5b0   : > { %2386 = vmatmul.mubr.msk.bf16.vlgmr.msra.gmra.mxu1 %vm869_vm3, %v2214_v63 }
 0x5b1   : > { %v1585_v6 = vpop.f32.mrf.mxu0  ;;  %v1628_v8 = vpop.f32.mrf.mxu1  ;;  %2396 = vmatpush3.bf16.msra.mxu1 %v1908_v2  ;;  %2397 = vmatprep.mubr.msk.bf16.mxu1 %vm2794_vm1, %v2793_v7 }
 0x5b2   : > { %v2213_v9 = vpack.c.bf16 %v1628_v8, %v1444_v47 }
 0x5b3   : > { %v2358_v11 = vpop.f32.mrf.mxu0  ;;  %v2363_v12 = vpop.f32.mrf.mxu1 }
 0x5b4   : > { %2380 = vmatmul.mubr.msk.bf16.vlgmr.msra.gmra.mxu0 %vm869_vm3, %v2213_v9 }
 0x5b5   : > { %2390 = vmatpush3.bf16.msra.mxu0 %v1852_v10  ;;  %v1631_v13 = vpop.f32.mrf.mxu1  ;;  %v1674_v14 = vpop.f32.mrf.mxu0  ;;  %2391 = vmatprep.mubr.msk.bf16.mxu0 %vm2794_vm1, %v2793_v7 }
 0x5b6   : > { %v2215_v19 = vpack.c.bf16 %v1674_v14, %v1490_v51 }
 0x5b7   : > { %v2364_v15 = vpop.f32.mrf.mxu1  ;;  %v2369_v16 = vpop.f32.mrf.mxu0 }
 0x5b9   : > { %v1677_v17 = vpop.f32.mrf.mxu0  ;;  %v1720_v18 = vpop.f32.mrf.mxu1 }
 0x5ba   : > { %v2216_v20 = vpack.c.bf16 %v1720_v18, %v1536_v55 }
 0x5bb   : > { %v2370_v21 = vpop.f32.mrf.mxu0  ;;  %v2375_v22 = vpop.f32.mrf.mxu1 }
 0x5bc   : > { %2392 = vmatmul.mubr.msk.bf16.vlgmr.msra.gmra.mxu0 %vm869_vm3, %v2215_v19  ;;  %2398 = vmatmul.mubr.msk.bf16.vlgmr.msra.gmra.mxu1 %vm869_vm3, %v2216_v20 }
 0x5bd   : > { %v1723_v23 = vpop.f32.mrf.mxu1 }
 0x5bf   : > { %v2376_v24 = vpop.f32.mrf.mxu1 }
 0x670   : > { %v1834_v25 = vpop.f32.mrf.mxu1 }
 0x672   : > { %v2387_v26 = vpop.f32.mrf.mxu1 }
 0x674   : > { %v1782_v58 = vpop.f32.mrf.mxu0  ;;  %v1837_v28 = vpop.f32.mrf.mxu1 }
 0x675   : > { %v1835_v33 = vadd.f32 %v1834_v25, %v1782_v58 }
 0x676   : > { %v2381_v29 = vpop.f32.mrf.mxu0  ;;  %v2388_v7 = vpop.f32.mrf.mxu1 }
 0x678   : > { %v1785_v30 = vpop.f32.mrf.mxu0 }
 0x679   : > { %v1838_v36 = vadd.f32 %v1837_v28, %v1785_v30 }
 0x67a   : > { %v2382_v31 = vpop.f32.mrf.mxu0 }
 0x67c   : > { %v1888_v34 = vpop.f32.mrf.mxu0  ;;  %v1944_v27 = vpop.f32.mrf.mxu1 }
 0x67d   : > { %v1895_v35 = vadd.f32 %v1888_v34, %v1835_v33 }
 0x67e   : > { %v2393_v32 = vpop.f32.mrf.mxu0  ;;  %v2399_v60 = vpop.f32.mrf.mxu1 }
 0x67f   : > { %v1951_v37 = vadd.f32 %v1944_v27, %v1895_v35 }
 0x680   : > { %v1891_v38 = vpop.f32.mrf.mxu0  ;;  %v1947_v39 = vpop.f32.mrf.mxu1 }
 0x681   : > { %v1953_v40 = vadd.f32 %v1951_v37, %v3099_v0  ;;  %v1896_v41 = vadd.f32 %v1891_v38, %v1838_v36 }
 0x682   : > { %v2394_v42 = vpop.f32.mrf.mxu0  ;;  %v2400_v43 = vpop.f32.mrf.mxu1 }
 0x683   : > { %1955 = vst.msk [vmem:[%s418_s30] sm:$0xff] %vm429_vm0, %v1953_v40  ;;  %v1952_v44 = vadd.f32 %v1947_v39, %v1896_v41 }
 0x685   : > { %v1954_v0 = vadd.f32 %v1952_v44, %v3101_v1 }
 0x687   : > { %1956 = vst.msk [vmem:[%s418_s30 + $0x8] sm:$0xff] %vm429_vm0, %v1954_v0 }
 0x688   : > { %2716 = shalt.err (!%p2713_p10)
}
 0x689   : > { %s2717_s19 = scalar_lea.hbm %s3284_s23, 256  ;;  %s2721_s11 = scalar_lea.hbm %s3338_s7, 512 }
 0x68a   : > { %p2718_p11 = scmp.ne.s32.totalorder %s3284_s23, %s2717_s19  ;;  %p2722_p5 = scmp.lt.s32.totalorder %s3284_s23, %s3338_s7 }
 0x68b   : > { %p2723_p12 = scmp.lt.s32.totalorder %s2721_s11, %s2717_s19 }
 0x68c   : > { %p2719_p1 = pnand %p2718_p11, %p3383_p2 }
 0x68d   : > { %p2724_p0 = por %p2723_p12, %p2722_p5 }
 0x68e   : > { %p2720_p4 = pneg %p2719_p1 }
 0x690   : > { %p2725_p13 = pnand %p2724_p0, %p2720_p4 }
 0x692   : > { %2728 = shalt.err (!%p2725_p13)
}
 0x693   : > { %s2796_s12 = smov 128   ;;  %s2797_s21 = smov 8  }
 0x694   : > { %2419 = dma.vmem_to_hbm [thread:$0]  (%p3383_p2), %s3286_s9, 256, %s3284_s23, %s1958_s28, %s2796_s12, %s2796_s12, %s2797_s21  }
 0x695 PF: > { %s1986_s20 = sand.u32 1, %s2767_s24   ;;  %p3384_p7 = scmp.ne.s32.totalorder %s3362_s14, 0 }
 0x696   : > { %p3385_p3 = scmp.ge.s32.totalorder %s2779_s27, 2  ;;  %s1987_s30 = scalar_lea.sflag [#allocation4], %s1986_s20 }
 0x698   : > { %p2442_p8 = pnand %p3385_p3, %p3384_p7 }
 0x69a   : > { %p2443_p9 = pneg %p2442_p8 }
 0x69c   : > { %2762 = dma.done.wait (%p2443_p9), %s1987_s30, 256  }
 0x69d   : > { %2764 = vsyncadd (%p2443_p9), %s1987_s30, 4294967040  ;;  %s3386_s27 = sld [smem:[#allocation20_spill]]  ;;  %s3389_s24 = smov %s2771_s25 }
 0x69e   : > { %s3387_s8 = sld [smem:[#allocation19_spill]] }
 0x69f   : > { %s3388_s26 = sld [smem:[#allocation21_spill]] }
 0x6a3   : > { %p25_p6 = scmp.ge.s32.totalorder %s3386_s27, 4  }
 0x6a4   : > { %s3390_s25 = smov %s3387_s8 }
 0x6a5   :  { %27 = sbr.rel (!%p25_p6) target bundleno = 12 (0xc), region = 132 }
 0x6aa   :  { %1992 = vsyncpa [#allocation3], 1 }
 0x6ab   :  { %1994 = vsyncpa [#allocation3 + $0x1], 1 }
 0x6ac   :  { %1995 = vsyncpa [#allocation6], 1 }
 0x6ad   :  { %1997 = vsyncpa [#allocation6 + $0x1], 1 }
 0x6ae   :  { %1998 = vsyncpa [#allocation9], 1 }
 0x6af   :  { %1999 = vsyncpa [#allocation12], 1 }
 0x6b0   :  { %2000 = vsyncpa [#allocation4], 1 }
 0x6b1   :  { %2002 = vsyncpa [#allocation4 + $0x1], 1 }

// kernel: tpu_custom_call.1
= control target key start
LH: loop header
LB: loop body
LE: loop exit
PB: predicated region body
PF: predicated region fallthrough
CT: control target
= control target key end

     0   :  { %s3331_s0 = inlined_call_operand.hbm [shape: f32[4,8,32], index: 0, kind: input, shape index: {}]   ;;  %s3332_s1 = inlined_call_operand.hbm [shape: bf16[4,16,32], index: 1, kind: input, shape index: {}]   ;;  %s3333_s2 = inlined_call_operand.hbm [shape: f32[4,1,16], index: 2, kind: input, shape index: {}]   ;;  %s3334_s3 = inlined_call_operand.vmem [shape: f32[1,32], index: 3, kind: input, shape index: {}]   ;;  %s3335_s4 = inlined_call_operand.hbm [shape: bf16[32,32], index: 4, kind: input, shape index: {}]   ;;  %s3336_s5 = inlined_call_operand.hbm [shape: bf16[32,64], index: 5, kind: input, shape index: {}]   ;;  %s3337_s6 = inlined_call_operand.hbm [shape: bf16[4,8,32], index: 6, kind: input, shape index: {}]   ;;  %s3338_s7 = inlined_call_operand.hbm [shape: f32[4,8,32], index: 7, kind: output, shape index: {}]  }
   0x1   :  { %3354 = sst [smem:[#allocation22_spill]] %s3331_s0 }
   0x2   :  { %3355 = sst [smem:[#allocation23_spill]] %s3332_s1 }
   0x3   :  { %12 = vsyncpa [#allocation3], 0 }
   0x4   :  { %14 = vsyncpa [#allocation3 + $0x1], 0 }
   0x5   :  { %15 = vsyncpa [#allocation6], 0 }
   0x6   :  { %17 = vsyncpa [#allocation6 + $0x1], 0 }
   0x7   :  { %18 = vsyncpa [#allocation9], 0 }
   0x8   :  { %19 = vsyncpa [#allocation12], 0 }
   0x9   :  { %20 = vsyncpa [#allocation4], 0 }
   0xa   :  { %22 = vsyncpa [#allocation4 + $0x1], 0  ;;  %s2838_s24 = smov 0   ;;  %s2840_s25 = smov 0  }
   0xb   :  { %s2842_s26 = smov 0   ;;  %s2844_s27 = smov 0  }
   0xc LB: > { %3356 = sst [smem:[#allocation19_spill]] %s2775_s26  ;;  %s2859_s28 = sadd.s32 4294967295, %s2779_s27   ;;  %s2779_s27 = sphi %s2844_s27, %s3386_s27   ;;  %s2775_s26 = sphi %s2842_s26, %s3388_s26   ;;  %s2771_s25 = sphi %s2840_s25, %s3390_s25   ;;  %s2767_s24 = sphi %s2838_s24, %s3389_s24  }
   0xd   : > { %s2116_s29 = sadd.s32 4294967294, %s2779_s27   ;;  %s2863_s30 = sadd.s32 1, %s2779_s27  }
   0xe   : > { %3357 = sst [smem:[#allocation20_spill]] %s2863_s30  ;;  %s35_s8 = sadd.s32 1, %s2775_s26 }
   0xf   : > { %s32_s9 = ssub.s32 %s2779_s27, %s2863_s30  ;;  %p42_p0 = scmp.ne.s32.totalorder %s2775_s26, %s2771_s25 }
  0x10   : > { %p33_p1 = scmp.eq.s32.totalorder %s32_s9, 0  ;;  %p43_p2 = scmp.eq.s32.totalorder %s2779_s27, 0 }
  0x11   : > { %p48_p3 = scmp.ne.s32.totalorder %s2771_s25, %s2767_s24  ;;  %p3339_p4 = scmp.eq.s32.totalorder %s2859_s28, 0 }
  0x12   : > { %s2875_s10 = scalar_select %p33_p1, %s2775_s26, %s35_s8  }
  0x13   : > { %p2877_p5 = por %p43_p2, %p42_p0  ;;  %p2883_p6 = por %p3339_p4, %p48_p3 }
  0x14   : > { %3358 = sst [smem:[#allocation21_spill]] %s2875_s10  ;;  %p208_p7 = scmp.eq.s32.totalorder %s2859_s28, 1 }
  0x15   : > { %s3360_s12 = scalar_select %p2883_p6, 1, 0 }
  0x16   : > { %p214_p8 = scmp.eq.s32.totalorder %s2116_s29, 1  ;;  %p2117_p9 = scmp.ge.s32.totalorder %s2779_s27, 1 }
  0x17   : > { %p221_p10 = scmp.lt.s32.totalorder %s2779_s27, 3  ;;  %p2890_p11 = por %p208_p7, %p42_p0 }
  0x18   : > { %p2894_p12 = por %p214_p8, %p48_p3  ;;  %s2781_s16 = smov [#allocation8]  }
  0x19   : > { %s3361_s13 = scalar_select %p2890_p11, 1, 0 }
  0x1a   : > { %s3362_s14 = scalar_select %p2894_p12, 1, 0 }
  0x1b   : > { %p2898_p13 = pnand %p2117_p9, %p221_p10  ;;  %s236_s17 = sshll.u32 %s2781_s16, 4  ;;  %s237_s17 = int_to_ptr.vmem [resolvable:$true] %s236_s17 }
  0x1c   : > { %p2448_p3 = scmp.lt.s32.totalorder %s2779_s27, 2  ;;  %s2913_s19 = sand.u32 1, %s2775_s26  }
  0x1d   : > { %s3363_s15 = scalar_select %p2898_p13, 1, 0 }
  0x1e   : > { %p2421_p1 = pneg %p2898_p13  ;;  %s2552_s21 = scalar_lea.vmem %s237_s17, 256 }
  0x1f   : > { %p2553_p8 = scmp.ne.s32.totalorder %s237_s17, %s2552_s21 }
  0x20   : > { %p2906_p2 = pnand %p2421_p1, %p3339_p4  ;;  %p2560_p1 = scmp.lt.s32.totalorder %s237_s17, %s237_s17 }
  0x21   : > { %p2561_p4 = scmp.lt.s32.totalorder %s2552_s21, %s2552_s21 }
  0x22   : > { %s3364_s18 = scalar_select %p2906_p2, 1, 0 }
  0x23   : > { %p3349_p7 = pneg %p2906_p2  ;;  %p2562_p12 = por %p2561_p4, %p2560_p1 }
  0x25   : > { %p2555_p9 = pnand %p2553_p8, %p3349_p7 }
  0x27   : > { %p2556_p10 = pneg %p2555_p9 }
  0x29   : > { %p2563_p11 = pnand %p2562_p12, %p2556_p10 }
  0x2b   : > { %2566 = shalt.err (!%p2563_p11)
}
  0x2c   : > { %s3344_s22 = smov 64   ;;  %s3347_s23 = smov 4  }
  0x2d   : > { %2424 = dma.hbm_to_vmem [thread:$0]  (!%p2906_p2), %s3335_s4, 256, %s237_s17, [#allocation9], %s3344_s22, %s3344_s22, %s3347_s23  }
  0x2e   : > { %s3346_s9 = sshll.u32 %s2779_s27, 8  ;;  %p2934_p4 = pnand %p2448_p3, %p2877_p5 }
  0x2f   : > { %s297_s21 = sand.u32 1, %s2779_s27   ;;  %s3366_s1 = sld [smem:[#allocation23_spill]] }
  0x30   : > { %s3367_s30 = sshll.u32 %s2913_s19, 4  ;;  %s2950_s11 = scalar_lea.sflag [#allocation6], %s297_s21 }
  0x31   : > { %s301_s17 = scalar_lea.vmem [#allocation5], %s3367_s30  ;;  %p2956_p11 = pneg %p2934_p4 }
  0x32   : > { %s309_s29 = sshll.u32 %s301_s17, 4  ;;  %s2948_s29 = int_to_ptr.vmem [resolvable:$true] %s309_s29 }
  0x35   : > { %s2944_s26 = scalar_lea.hbm %s3366_s1, %s3346_s9  ;;  %s2572_s30 = scalar_lea.hbm %s3366_s1, 512 }
  0x36   : > { %s2567_s8 = scalar_lea.hbm %s2944_s26, 256  ;;  %p2573_p8 = scmp.lt.s32.totalorder %s2944_s26, %s3366_s1 }
  0x37   : > { %p2568_p5 = scmp.ne.s32.totalorder %s2944_s26, %s2567_s8  ;;  %p2574_p9 = scmp.lt.s32.totalorder %s2572_s30, %s2567_s8 }
  0x39   : > { %p2570_p12 = pnand %p2956_p11, %p2568_p5  ;;  %p2575_p10 = por %p2574_p9, %p2573_p8 }
  0x3b   : > { %p2571_p3 = pneg %p2570_p12 }
  0x3d   : > { %p2576_p1 = pnand %p2575_p10, %p2571_p3 }
  0x3f   : > { %2579 = shalt.err (!%p2576_p1)
}
  0x40   : > { %s2580_s21 = scalar_lea.vmem %s2948_s29, 256  ;;  %s2784_s23 = smov [#allocation5]  }
  0x41   : > { %p2581_p0 = scmp.ne.s32.totalorder %s2948_s29, %s2580_s21  ;;  %s2585_s10 = sshll.u32 %s2784_s23, 4  ;;  %s2586_s10 = int_to_ptr.vmem [resolvable:$false] %s2585_s10 }
  0x42   : > { %s2587_s20 = scalar_lea.vmem %s2586_s10, 512  ;;  %p2588_p7 = scmp.lt.s32.totalorder %s2948_s29, %s2586_s10 }
  0x43   : > { %p2583_p5 = pnand %p2581_p0, %p2956_p11  ;;  %p2589_p6 = scmp.lt.s32.totalorder %s2587_s20, %s2580_s21 }
  0x45   : > { %p2584_p12 = pneg %p2583_p5  ;;  %p2590_p13 = por %p2589_p6, %p2588_p7 }
  0x47   : > { %p2591_p2 = pnand %p2590_p13, %p2584_p12 }
  0x49   : > { %2594 = shalt.err (!%p2591_p2)
}
  0x4a   : > { %s3369_s9 = smov 4   ;;  %s3370_s8 = smov 64  }
  0x4b   : > { %2437 = dma.hbm_to_vmem [thread:$0]  (!%p2934_p4), %s2944_s26, 256, %s2948_s29, %s2950_s11, %s3370_s8, %s3370_s8, %s3369_s9  }
  0x4c   : > { %s2785_s30 = smov [#allocation10]   ;;  %s2786_s23 = smov [#allocation11]  }
  0x4d   : > { %s249_s17 = sshll.u32 %s2785_s30, 4  ;;  %s262_s1 = sshll.u32 %s2786_s23, 4  ;;  %s250_s17 = int_to_ptr.vmem [resolvable:$true] %s249_s17  ;;  %s263_s1 = int_to_ptr.vmem [resolvable:$true] %s262_s1 }
  0x4e   : > { %s2606_s10 = scalar_lea.vmem %s250_s17, 256  ;;  %p3371_p6 = scmp.ne.s32.totalorder %s3364_s18, 0 }
  0x4f   : > { %p2607_p0 = scmp.ne.s32.totalorder %s250_s17, %s2606_s10  ;;  %p2614_p3 = scmp.lt.s32.totalorder %s250_s17, %s250_s17 }
  0x50   : > { %p3372_p13 = pneg %p3371_p6  ;;  %p2615_p8 = scmp.lt.s32.totalorder %s2606_s10, %s2606_s10 }
  0x52   : > { %p2609_p2 = pnand %p2607_p0, %p3372_p13  ;;  %p2616_p9 = por %p2615_p8, %p2614_p3 }
  0x54   : > { %p2610_p7 = pneg %p2609_p2 }
  0x56   : > { %p2617_p10 = pnand %p2616_p9, %p2610_p7 }
  0x58   : > { %2620 = shalt.err (!%p2617_p10)
}
  0x59   : > { %2427 = dma.hbm_to_vmem [thread:$0]  (!%p3371_p6), %s3336_s5, 256, %s250_s17, [#allocation9], %s3370_s8, %s3370_s8, %s3369_s9  }
  0x5a   : > { %s2632_s21 = scalar_lea.vmem %s263_s1, 256  ;;  %p3373_p5 = pmov %p3372_p13 }
  0x5b   : > { %p2633_p1 = scmp.ne.s32.totalorder %s263_s1, %s2632_s21  ;;  %p2640_p13 = scmp.lt.s32.totalorder %s263_s1, %s263_s1 }
  0x5c   : > { %p2641_p2 = scmp.lt.s32.totalorder %s2632_s21, %s2632_s21 }
  0x5d   : > { %p2635_p12 = pnand %p2633_p1, %p3373_p5 }
  0x5e   : > { %p2642_p7 = por %p2641_p2, %p2640_p13 }
  0x5f   : > { %p2636_p0 = pneg %p2635_p12 }
  0x61   : > { %p2643_p3 = pnand %p2642_p7, %p2636_p0 }
  0x63   : > { %2646 = shalt.err (!%p2643_p3)
}
  0x64   : > { %2430 = dma.hbm_to_vmem [thread:$0]  (!%p3371_p6), %s3337_s6, 256, %s263_s1, [#allocation12], %s3370_s8, %s3370_s8, %s3369_s9  }
  0x65   : > { %s3374_s17 = sshll.u32 %s2779_s27, 8  ;;  %s3375_s0 = sld [smem:[#allocation22_spill]] }
  0x66   : > { %s3376_s29 = sshll.u32 %s2913_s19, 4  ;;  %s277_s20 = scalar_lea.sflag [#allocation3], %s2913_s19 }
  0x67   : > { %s280_s18 = scalar_lea.vmem [#allocation2], %s3376_s29 }
  0x68   : > { %s287_s21 = sshll.u32 %s280_s18, 4  ;;  %s3013_s21 = int_to_ptr.vmem [resolvable:$true] %s287_s21 }
  0x6b   : > { %s3009_s26 = scalar_lea.hbm %s3375_s0, %s3374_s17  ;;  %s2652_s8 = scalar_lea.hbm %s3375_s0, 512 }
  0x6c   : > { %s2647_s30 = scalar_lea.hbm %s3009_s26, 256  ;;  %p2653_p10 = scmp.lt.s32.totalorder %s3009_s26, %s3375_s0 }
  0x6d   : > { %p2648_p8 = scmp.ne.s32.totalorder %s3009_s26, %s2647_s30  ;;  %p2654_p1 = scmp.lt.s32.totalorder %s2652_s8, %s2647_s30 }
  0x6f   : > { %p2650_p9 = pnand %p2648_p8, %p2956_p11  ;;  %p2655_p5 = por %p2654_p1, %p2653_p10 }
  0x71   : > { %p2651_p6 = pneg %p2650_p9 }
  0x73   : > { %p2656_p12 = pnand %p2655_p5, %p2651_p6 }
  0x75   : > { %2659 = shalt.err (!%p2656_p12)
}
  0x76   : > { %s2660_s10 = scalar_lea.vmem %s3013_s21, 256  ;;  %s2787_s29 = smov [#allocation2]  }
  0x77   : > { %p2661_p0 = scmp.ne.s32.totalorder %s3013_s21, %s2660_s10  ;;  %s2665_s18 = sshll.u32 %s2787_s29, 4  ;;  %s2666_s18 = int_to_ptr.vmem [resolvable:$false] %s2665_s18 }
  0x78   : > { %s2667_s1 = scalar_lea.vmem %s2666_s18, 512  ;;  %p2668_p7 = scmp.lt.s32.totalorder %s3013_s21, %s2666_s18 }
  0x79   : > { %p2663_p13 = pnand %p2661_p0, %p2956_p11  ;;  %p2669_p3 = scmp.lt.s32.totalorder %s2667_s1, %s2660_s10 }
  0x7b   : > { %p2664_p2 = pneg %p2663_p13  ;;  %p2670_p8 = por %p2669_p3, %p2668_p7 }
  0x7d   : > { %p2671_p9 = pnand %p2670_p8, %p2664_p2 }
  0x7f   : > { %2674 = shalt.err (!%p2671_p9)
}
  0x80   : > { %s2788_s30 = smov 128   ;;  %s2789_s9 = smov 8  }
  0x81   : > { %2434 = dma.hbm_to_vmem [thread:$0]  (!%p2934_p4), %s3009_s26, 256, %s3013_s21, %s277_s20, %s2788_s30, %s2788_s30, %s2789_s9  }
  0x82   : > { %s2129_s8 = sshll.u32 %s2913_s19, 1  ;;  %s2210_s17 = sshll.u32 %s2779_s27, 5 }
  0x83   : > { %s3043_s10 = scalar_lea.hbm %s3333_s2, %s2210_s17  ;;  %s323_s18 = scalar_lea.vmem [#allocation7], %s2129_s8 }
  0x84   : > { %s330_s1 = sshll.u32 %s323_s18, 4  ;;  %s2675_s0 = scalar_lea.hbm %s3043_s10, 32  ;;  %s3045_s1 = int_to_ptr.vmem [resolvable:$true] %s330_s1 }
  0x85   : > { %p2676_p6 = scmp.ne.s32.totalorder %s3043_s10, %s2675_s0  ;;  %s2680_s21 = scalar_lea.hbm %s3333_s2, 64 }
  0x86   : > { %p2681_p5 = scmp.lt.s32.totalorder %s3043_s10, %s3333_s2  ;;  %p2682_p12 = scmp.lt.s32.totalorder %s2680_s21, %s2675_s0 }
  0x87   : > { %p2678_p10 = pnand %p2676_p6, %p2956_p11 }
  0x88   : > { %p2683_p0 = por %p2682_p12, %p2681_p5 }
  0x89   : > { %p2679_p1 = pneg %p2678_p10 }
  0x8b   : > { %p2684_p13 = pnand %p2683_p0, %p2679_p1 }
  0x8d   : > { %2687 = shalt.err (!%p2684_p13)
}
  0x8e   : > { %s2688_s9 = scalar_lea.vmem %s3045_s1, 32  ;;  %s2790_s8 = smov [#allocation7]  }
  0x8f   : > { %p2689_p2 = scmp.ne.s32.totalorder %s3045_s1, %s2688_s9  ;;  %s2693_s17 = sshll.u32 %s2790_s8, 4  ;;  %s2694_s17 = int_to_ptr.vmem [resolvable:$false] %s2693_s17 }
  0x90   : > { %s2695_s23 = scalar_lea.vmem %s2694_s17, 64  ;;  %p2696_p8 = scmp.lt.s32.totalorder %s3045_s1, %s2694_s17 }
  0x91   : > { %p2691_p7 = pnand %p2689_p2, %p2956_p11  ;;  %p2697_p9 = scmp.lt.s32.totalorder %s2695_s23, %s2688_s9 }
  0x93   : > { %p2692_p3 = pneg %p2691_p7  ;;  %p2698_p6 = por %p2697_p9, %p2696_p8 }
  0x95   : > { %p2699_p10 = pnand %p2698_p6, %p2692_p3 }
  0x97   : > { %2702 = shalt.err (!%p2699_p10)
}
  0x98   : > { %s2791_s0 = smov 16   ;;  %s2792_s29 = smov 1  }
  0x99   : > { %2440 = dma.hbm_to_vmem [thread:$0]  (!%p2934_p4), %s3043_s10, 32, %s3045_s1, %s2950_s11, %s2791_s0, %s2791_s0, %s2792_s29  }
  0x9a   : > { %p3377_p11 = scmp.ne.s32.totalorder %s3363_s15, 0 }
  0x9b   : > { %s3071_s22 = sand.u32 (!%p3377_p11), 1, %s2771_s25   ;;  %p3378_p1 = scmp.ne.s32.totalorder (!%p3377_p11), %s3360_s12, 0 }
  0x9c   : > { %342 = sbr.rel (%p3377_p11) target bundleno = 1685 (0x695), region = 48  ;;  %s3074_s18 = sshll.u32 (!%p3377_p11), %s3071_s22, 4 }
  0x9d   : > { %s345_s26 = scalar_lea.sflag (!%p3377_p11), [#allocation3], %s3071_s22  ;;  %s348_s19 = scalar_lea.vmem (!%p3377_p11), [#allocation2], %s3074_s18 }
  0xa1   : > { %2746 = dma.done.wait (%p3378_p1), %s345_s26, 256  }
  0xa2   : > { %2748 = vsyncadd (%p3378_p1), %s345_s26, 4294967040  ;;  %s353_s15 = sand.u32 1, %s2859_s28   ;;  %s357_s11 = scalar_lea.vmem [#allocation5], %s3074_s18 }
  0xa3   : > { %s354_s16 = scalar_lea.sflag [#allocation6], %s353_s15 }
  0xa4   : > { %2750 = dma.done.wait (%p3378_p1), %s354_s16, 288  }
  0xa5   : > { %2752 = vsyncadd (%p3378_p1), %s354_s16, 4294967008  ;;  %s2135_s10 = sshll.u32 %s3071_s22, 1  ;;  %p3379_p4 = scmp.eq.s32.totalorder %s2859_s28, 0 }
  0xa6   : > { %s3089_s1 = scalar_lea.vmem [#allocation7], %s2135_s10 }
  0xa7   : > { %2754 = dma.done.wait (%p3379_p4), [#allocation9], 512   ;;  %p3380_p5 = pmov %p3379_p4 }
  0xa8   : > { %p3381_p12 = pmov %p3379_p4 }
  0xa9   : > { %2756 = vsyncadd (%p3380_p5), [#allocation9], 4294966784 }
  0xaa   : > { %2758 = dma.done.wait (%p3381_p12), [#allocation12], 256   ;;  %p3382_p0 = pmov %p3379_p4 }
  0xab   : > { %v3099_v0 = vld [vmem:[%s348_s19] sm:$0xff]  ;;  %vm429_vm0 = vcmask 261120   ;;  %v3101_v1 = vld [vmem:[%s348_s19 + $0x8] sm:$0xff]  ;;  %v2793_v7 = vmov 0.0   ;;  %vm2794_vm1 = vmmov 0   ;;  %vm873_vm2 = vcmask 1043456  }
  0xac   : > { %2760 = vsyncadd (%p3382_p0), [#allocation12], 4294967040  ;;  %v427_v2 = vmul.f32 %v3099_v0, %v3099_v0  ;;  %v428_v3 = vmul.f32 %v3101_v1, %v3101_v1  ;;  %v2499_v6 = vld [vmem:[#allocation8 + $0x8] sm:$0xff]   ;;  %2265 = vmatprep.subr.bf16.mxu0 %v2793_v7  ;;  %2269 = vmatprep.mubr.msk.bf16.mxu0 %vm2794_vm1, %v2793_v7  ;;  %v2500_v8 = vld [vmem:[#allocation8] sm:$0xff]   ;;  %vm869_vm3 = vcmask 64512   ;;  %vm1261_vm4 = vcmask 130048  }
  0xad   : > { %2266 = vmatpush3.bf16.msra.mxu0 %v2499_v6  ;;  %v2501_v9 = vld [vmem:[#allocation10 + $0x8] sm:$0xff]   ;;  %v2502_v10 = vld [vmem:[#allocation10] sm:$0xff]   ;;  %s2217_s20 = sshll.u32 %s2859_s28, 8  ;;  %s418_s30 = scalar_lea.vmem [#allocation13], %s3074_s18 }
  0xae   : > { %v430_v4 = vsel %vm429_vm0, %v427_v2, 0.0  ;;  %v433_v5 = vsel %vm429_vm0, %v428_v3, 0.0  ;;  %2267 = vmatprep.subr.bf16.mxu0 %v2793_v7  ;;  %v2503_v11 = vld [vmem:[%s357_s11] sm:$0xff]   ;;  %2273 = vmatprep.subr.bf16.mxu1 %v2501_v9  ;;  %v2504_v12 = vld [vmem:[%s357_s11 + $0x8] sm:$0xff]   ;;  %s1971_s9 = sshll.u32 %s418_s30, 4  ;;  %s3284_s23 = scalar_lea.hbm %s3338_s7, %s2217_s20  ;;  %s3286_s9 = int_to_ptr.vmem [resolvable:$true] %s1971_s9 }
  0xaf   : > { %431 = vadd.xlane.f32.xlu0 %v430_v4  ;;  %2277 = vmatprep.mubr.msk.bf16.mxu1 %vm429_vm0, %v2503_v11  ;;  %v2140_v22 = vld [vmem:[%s3334_s3] ss:$0 sm:$0xff]  ;;  %s1958_s28 = scalar_lea.sflag [#allocation4], %s3071_s22  ;;  %s2703_s0 = scalar_lea.vmem %s3286_s9, 256 }
  0xb0   : > { %2274 = vmatpush3.bf16.msra.mxu1 %v2501_v9  ;;  %p2704_p13 = scmp.ne.s32.totalorder %s3286_s9, %s2703_s0  ;;  %p3383_p2 = scmp.ne.s32.totalorder %s3361_s13, 0 }
  0xb1   : > { %2268 = vmatpush3.bf16.msra.mxu0 %v2500_v8  ;;  %2275 = vmatprep.subr.bf16.mxu1 %v2502_v10  ;;  %s2795_s29 = smov [#allocation13]  }
  0xb2   : > { %2281 = vmatprep.subr.bf16.mxu0 %v2793_v7  ;;  %p2705_p7 = pnand %p2704_p13, %p3383_p2  ;;  %s2707_s18 = sshll.u32 %s2795_s29, 4  ;;  %s2708_s18 = int_to_ptr.vmem [resolvable:$false] %s2707_s18 }
  0xb3   : > { %434 = vadd.xlane.f32.xlu0 %v433_v5  ;;  %s2709_s26 = scalar_lea.vmem %s2708_s18, 512  ;;  %p2710_p8 = scmp.lt.s32.totalorder %s3286_s9, %s2708_s18 }
  0xb4   : > { %2276 = vmatpush3.bf16.msra.mxu1 %v2502_v10  ;;  %p2706_p3 = pneg %p2705_p7  ;;  %p2711_p9 = scmp.lt.s32.totalorder %s2709_s26, %s2703_s0 }
  0xb5   : > { %2287 = vmatprep.subr.bf16.mxu1 %v2793_v7 }
  0xb6   : > { %p2712_p6 = por %p2711_p9, %p2710_p8 }
  0xb7   : > { %2278 = vmatmul.mubr.msk.bf16.vlgmr.msra.gmra.mxu1 %vm429_vm0, %v2504_v12 }
  0xb8   : > { %2289 = vmatprep.mubr.msk.bf16.mxu1 %vm2794_vm1, %v2793_v7  ;;  %p2713_p10 = pnand %p2712_p6, %p2706_p3 }
 0x138   : > { %v432_v13 = vpop.xlane.xlu0 %431 }
 0x139   : > { %v437_v14 = vmul.f32 0.03125, %v432_v13 }
 0x13b   : > { %v439_v15 = vadd.f32 1e-06, %v437_v14 }
 0x13c   : > { %v435_v16 = vpop.xlane.xlu0 %434 }
 0x13d   : > { %2505 = vrsqrt.f32 %v439_v15  ;;  %v438_v17 = vmul.f32 0.03125, %v435_v16 }
 0x13f   : > { %v440_v18 = vadd.f32 1e-06, %v438_v17 }
 0x141   : > { %2507 = vrsqrt.f32 %v440_v18 }
 0x14a   : > { %v2506_v19 = vpop.eup %2505 }
 0x14b   : > { %v443_v20 = vmul.f32 %v2506_v19, %v3099_v0 }
 0x14d   : > { %v451_v24 = vmul.f32 %v2140_v22, %v443_v20 }
 0x14e   : > { %v2508_v21 = vpop.eup %2507 }
 0x14f   : > { %v444_v23 = vmul.f32 %v2508_v21, %v3101_v1 }
 0x151   : > { %v452_v25 = vmul.f32 %v2140_v22, %v444_v23 }
 0x153   : > { %v453_v26 = vpack.c.bf16 %v452_v25, %v451_v24  ;;  %v2184_v25 = vld [vmem:[%s3089_s1] ss:$0 sm:$0xff] }
 0x155   : > { %2270 = vmatmul.mubr.msk.bf16.vlgmr.msra.gmra.mxu0 %vm429_vm0, %v453_v26 }
 0x156   : > { %2283 = vmatprep.mubr.msk.bf16.mxu0 %vm2794_vm1, %v2793_v7 }
 0x177   : > { %v2279_v27 = vpop.f32.mrf.mxu1 }
 0x179   : > { %v585_v28 = vpop.f32.mrf.mxu1 }
 0x17b   : > { %v2280_v29 = vpop.f32.mrf.mxu1 }
 0x17c   : > { %v601_v30 = vpack.c.bf16 %v2280_v29, %v2279_v27 }
 0x17d   : > { %v588_v31 = vpop.f32.mrf.mxu1 }
 0x17e   : > { %v600_v32 = vpack.c.bf16 %v588_v31, %v585_v28 }
 0x180   : > { %797 = vxpose.xlu0.c.b16.start.end [1/1] (short) (narrow) %v600_v32, 64 }
 0x1e2   : > { %v805_v37 = vpop.trf.xlu0 }
 0x1e3   : > { %v2160_v39 = vcombine.low %v805_v37, %v805_v37  ;;  %v2161_v40 = vcombine.high %v805_v37, %v805_v37 }
 0x1e5   : > { %v875_v42 = vsel %vm873_vm2, %v2160_v39, 0  ;;  %v921_v43 = vsel %vm873_vm2, %v2161_v40, 0 }
 0x1e6   : > { %2282 = vmatpush3.bf16.msra.mxu0 %v875_v42  ;;  %2288 = vmatpush3.bf16.msra.mxu1 %v921_v43  ;;  %v806_v59 = vpop.trf.xlu0 }
 0x1e7   : > { %2293 = vmatprep.subr.bf16.mxu0 %v2793_v7  ;;  %2299 = vmatprep.subr.bf16.mxu1 %v2793_v7  ;;  %v2162_v61 = vcombine.low %v806_v59, %v806_v59  ;;  %v2163_v62 = vcombine.high %v806_v59, %v806_v59 }
 0x1e9   : > { %v967_v63 = vsel %vm873_vm2, %v2162_v61, 0  ;;  %v1013_v3 = vsel %vm873_vm2, %v2163_v62, 0 }
 0x1ea   : > { %v807_v20 = vpop.trf.xlu0 }
 0x1eb   : > { %v2168_v21 = vcombine.low %v807_v20, %v807_v20  ;;  %v2169_v22 = vcombine.high %v807_v20, %v807_v20 }
 0x1ed   : > { %v1362_v23 = vsel %vm1261_vm4, %v2168_v21, 0  ;;  %v1408_v24 = vsel %vm1261_vm4, %v2169_v22, 0 }
 0x215   : > { %v511_v33 = vpop.f32.mrf.mxu0 }
 0x216   : > { %v2211_v34 = vpack.c.bf16 %v511_v33, %v511_v33 }
 0x217   : > { %v2271_v35 = vpop.f32.mrf.mxu0 }
 0x218   : > { %609 = vxpose.xlu1.c.b16.start.end [1/1] (short) (narrow) %v2211_v34, 32 }
 0x219   : > { %v514_v36 = vpop.f32.mrf.mxu0 }
 0x21a   : > { %v2212_v38 = vpack.c.bf16 %v514_v36, %v514_v36 }
 0x21b   : > { %v2272_v41 = vpop.f32.mrf.mxu0 }
 0x21d   : > { %625 = vxpose.xlu1.c.b16.start.end [1/1] (short) (narrow) %v2212_v38, 32 }
 0x222   : > { %813 = vxpose.xlu1.c.b16.start.end [1/1] (short) (narrow) %v601_v30, 64 }
 0x27a   : > { %v617_v44 = vpop.trf.xlu1 }
 0x27b   : > { %v2152_v45 = vcombine.low %v617_v44, %v617_v44  ;;  %v2153_v47 = vcombine.high %v617_v44, %v617_v44 }
 0x27d   : > { %669 = vxpose.xlu1.c.b16.start.end [1/1] (short) (narrow) %v2152_v45, 16 }
 0x27e   : > { %v618_v46 = vpop.trf.xlu1 }
 0x27f   : > { %v2154_v48 = vcombine.low %v618_v46, %v618_v46  ;;  %v2155_v50 = vcombine.high %v618_v46, %v618_v46 }
 0x281   : > { %685 = vxpose.xlu1.c.b16.start.end [1/1] (short) (narrow) %v2153_v47, 16  ;;  %v2185_v47 = vld [vmem:[%s3089_s1 + $0x1] ss:$0 sm:$0xff] }
 0x282   : > { %v633_v49 = vpop.trf.xlu1 }
 0x283   : > { %v2156_v51 = vcombine.low %v633_v49, %v633_v49  ;;  %v2157_v53 = vcombine.high %v633_v49, %v633_v49 }
 0x285   : > { %701 = vxpose.xlu1.c.b16.start.end [1/1] (short) (narrow) %v2154_v48, 16 }
 0x286   : > { %v634_v52 = vpop.trf.xlu1 }
 0x287   : > { %v2158_v54 = vcombine.low %v634_v52, %v634_v52  ;;  %v2159_v55 = vcombine.high %v634_v52, %v634_v52 }
 0x289   : > { %717 = vxpose.xlu1.c.b16.start.end [1/1] (short) (narrow) %v2155_v50, 16 }
 0x28a   : > { %v821_v56 = vpop.trf.xlu1 }
 0x28b   : > { %v2164_v5 = vcombine.low %v821_v56, %v821_v56  ;;  %v2165_v8 = vcombine.high %v821_v56, %v821_v56 }
 0x28d   : > { %733 = vxpose.xlu1.c.b16.start.end [1/1] (short) (narrow) %v2156_v51, 16  ;;  %v1059_v9 = vsel %vm873_vm2, %v2164_v5, 0  ;;  %v1105_v12 = vsel %vm873_vm2, %v2165_v8, 0 }
 0x28e   : > { %v822_v57 = vpop.trf.xlu1 }
 0x28f   : > { %v2166_v11 = vcombine.low %v822_v57, %v822_v57  ;;  %v2167_v14 = vcombine.high %v822_v57, %v822_v57 }
 0x291   : > { %749 = vxpose.xlu1.c.b16.start.end [1/1] (short) (narrow) %v2157_v53, 16  ;;  %v1151_v15 = vsel %vm873_vm2, %v2166_v11, 0  ;;  %v1197_v17 = vsel %vm873_vm2, %v2167_v14, 0 }
 0x292   : > { %v3135_v58 = vpop.trf.xlu1 }
 0x295   : > { %765 = vxpose.xlu1.c.b16.start.end [1/1] (short) (narrow) %v2158_v54, 16 }
 0x296   : > { %v3137_v60 = vpop.trf.xlu1 }
 0x299   : > { %781 = vxpose.xlu1.c.b16.start.end [1/1] (short) (narrow) %v2159_v55, 16 }
 0x2df   : > { %v677_v2 = vpop.trf.xlu1 }
 0x2e0   : > { %2284 = vmatmul.mubr.msk.bf16.vlgmr.msra.gmra.mxu0 %vm869_vm3, %v677_v2 }
 0x2e1   : > { %2294 = vmatpush3.bf16.msra.mxu0 %v967_v63  ;;  %2295 = vmatprep.mubr.msk.bf16.mxu0 %vm2794_vm1, %v2793_v7 }
 0x2e2   : > { %2305 = vmatprep.subr.bf16.mxu0 %v2793_v7 }
 0x2e3   : > { %v693_v4 = vpop.trf.xlu1 }
 0x2e4   : > { %2290 = vmatmul.mubr.msk.bf16.vlgmr.msra.gmra.mxu1 %vm869_vm3, %v693_v4 }
 0x2e5   : > { %2300 = vmatpush3.bf16.msra.mxu1 %v1013_v3  ;;  %2301 = vmatprep.mubr.msk.bf16.mxu1 %vm2794_vm1, %v2793_v7 }
 0x2e6   : > { %2311 = vmatprep.subr.bf16.mxu1 %v2793_v7 }
 0x2e7   : > { %v709_v6 = vpop.trf.xlu1 }
 0x2e8   : > { %2296 = vmatmul.mubr.msk.bf16.vlgmr.msra.gmra.mxu0 %vm869_vm3, %v709_v6 }
 0x2e9   : > { %2306 = vmatpush3.bf16.msra.mxu0 %v1059_v9  ;;  %2307 = vmatprep.mubr.msk.bf16.mxu0 %vm2794_vm1, %v2793_v7 }
 0x2ea   : > { %2317 = vmatprep.subr.bf16.mxu0 %v2793_v7 }
 0x2eb   : > { %v725_v10 = vpop.trf.xlu1 }
 0x2ec   : > { %2302 = vmatmul.mubr.msk.bf16.vlgmr.msra.gmra.mxu1 %vm869_vm3, %v725_v10 }
 0x2ed   : > { %2312 = vmatpush3.bf16.msra.mxu1 %v1105_v12  ;;  %2313 = vmatprep.mubr.msk.bf16.mxu1 %vm2794_vm1, %v2793_v7 }
 0x2ee   : > { %2323 = vmatprep.subr.bf16.mxu1 %v2793_v7 }
 0x2ef   : > { %v741_v13 = vpop.trf.xlu1 }
 0x2f0   : > { %2308 = vmatmul.mubr.msk.bf16.vlgmr.msra.gmra.mxu0 %vm869_vm3, %v741_v13 }
 0x2f1   : > { %2318 = vmatpush3.bf16.msra.mxu0 %v1151_v15  ;;  %2319 = vmatprep.mubr.msk.bf16.mxu0 %vm2794_vm1, %v2793_v7 }
 0x2f2   : > { %2329 = vmatprep.subr.bf16.mxu0 %v2793_v7 }
 0x2f3   : > { %v757_v16 = vpop.trf.xlu1 }
 0x2f4   : > { %2314 = vmatmul.mubr.msk.bf16.vlgmr.msra.gmra.mxu1 %vm869_vm3, %v757_v16  ;;  %v3189_v16 = vpop.trf.xlu0 }
 0x2f5   : > { %2324 = vmatpush3.bf16.msra.mxu1 %v1197_v17  ;;  %2325 = vmatprep.mubr.msk.bf16.mxu1 %vm2794_vm1, %v2793_v7 }
 0x2f6   : > { %2335 = vmatprep.subr.bf16.mxu1 %v2793_v7 }
 0x2f7   : > { %v773_v18 = vpop.trf.xlu1 }
 0x2f8   : > { %2320 = vmatmul.mubr.msk.bf16.vlgmr.msra.gmra.mxu0 %vm869_vm3, %v773_v18 }
 0x2f9   : > { %2331 = vmatprep.mubr.msk.bf16.mxu0 %vm2794_vm1, %v2793_v7  ;;  %2330 = vmatpush3.bf16.xpose.msra.mxu0 %v1362_v23 }
 0x2fa   : > { %2341 = vmatprep.subr.bf16.mxu0 %v2793_v7 }
 0x2fb   : > { %v789_v19 = vpop.trf.xlu1 }
 0x2fc   : > { %2326 = vmatmul.mubr.msk.bf16.vlgmr.msra.gmra.mxu1 %vm869_vm3, %v789_v19 }
 0x2fd   : > { %2337 = vmatprep.mubr.msk.bf16.mxu1 %vm2794_vm1, %v2793_v7  ;;  %2336 = vmatpush3.bf16.xpose.msra.mxu1 %v1408_v24 }
 0x2fe   : > { %2347 = vmatprep.subr.bf16.mxu1 %v2793_v7 }
 0x3a0   : > { %v911_v26 = vpop.f32.mrf.mxu0 }
 0x3a1   : > { %v1253_v27 = vadd.f32 %v2184_v25, %v911_v26 }
 0x3a2   : > { %v2285_v28 = vpop.f32.mrf.mxu0 }
 0x3a3   : > { %v1262_v29 = vsel %vm1261_vm4, %v1253_v27, -inf }
 0x3a4   : > { %v957_v30 = vpop.f32.mrf.mxu1  ;;  %1263 = vmax.xlane.f32.xlu0 %v1262_v29  ;;  %v914_v31 = vpop.f32.mrf.mxu0 }
 0x3a5   : > { %v1254_v32 = vadd.f32 %v2184_v25, %v957_v30 }
 0x3a6   : > { %v2286_v33 = vpop.f32.mrf.mxu0  ;;  %v2291_v34 = vpop.f32.mrf.mxu1 }
 0x3a7   : > { %v1265_v35 = vsel %vm1261_vm4, %v1254_v32, -inf }
 0x3a8   : > { %1266 = vmax.xlane.f32.xlu1 %v1265_v35  ;;  %v960_v36 = vpop.f32.mrf.mxu1  ;;  %v1003_v37 = vpop.f32.mrf.mxu0 }
 0x3a9   : > { %v1255_v38 = vadd.f32 %v2184_v25, %v1003_v37 }
 0x3aa   : > { %v2292_v39 = vpop.f32.mrf.mxu1  ;;  %v2297_v40 = vpop.f32.mrf.mxu0 }
 0x3ab   : > { %v1268_v41 = vsel %vm1261_vm4, %v1255_v38, -inf }
 0x3ac   : > { %v1049_v42 = vpop.f32.mrf.mxu1  ;;  %1269 = vmax.xlane.f32.xlu1 %v1268_v41  ;;  %v1006_v43 = vpop.f32.mrf.mxu0 }
 0x3ad   : > { %v1256_v44 = vadd.f32 %v2184_v25, %v1049_v42 }
 0x3ae   : > { %v2298_v45 = vpop.f32.mrf.mxu0  ;;  %v2303_v46 = vpop.f32.mrf.mxu1 }
 0x3af   : > { %v1271_v48 = vsel %vm1261_vm4, %v1256_v44, -inf }
 0x3b0   : > { %v1052_v49 = vpop.f32.mrf.mxu1  ;;  %1272 = vmax.xlane.f32.xlu1 %v1271_v48  ;;  %v1095_v50 = vpop.f32.mrf.mxu0 }
 0x3b1   : > { %v1257_v51 = vadd.f32 %v2185_v47, %v1095_v50 }
 0x3b2   : > { %v2304_v52 = vpop.f32.mrf.mxu1  ;;  %v2309_v53 = vpop.f32.mrf.mxu0 }
 0x3b3   : > { %v1274_v54 = vsel %vm1261_vm4, %v1257_v51, -inf }
 0x3b4   : > { %v1141_v55 = vpop.f32.mrf.mxu1  ;;  %1275 = vmax.xlane.f32.xlu1 %v1274_v54  ;;  %v1098_v56 = vpop.f32.mrf.mxu0 }
 0x3b5   : > { %v1258_v57 = vadd.f32 %v2185_v47, %v1141_v55 }
 0x3b6   : > { %v2310_v59 = vpop.f32.mrf.mxu0  ;;  %v2315_v61 = vpop.f32.mrf.mxu1 }
 0x3b7   : > { %v1277_v62 = vsel %vm1261_vm4, %v1258_v57, -inf }
 0x3b8   : > { %1278 = vmax.xlane.f32.xlu0 %v1277_v62  ;;  %v1144_v63 = vpop.f32.mrf.mxu1  ;;  %v1187_v2 = vpop.f32.mrf.mxu0 }
 0x3b9   : > { %v1259_v3 = vadd.f32 %v2185_v47, %v1187_v2  ;;  %v2170_v2 = vcombine.low %v3189_v16, %v3189_v16 }
 0x3ba   : > { %v2316_v4 = vpop.f32.mrf.mxu1  ;;  %v2321_v5 = vpop.f32.mrf.mxu0 }
 0x3bb   : > { %v1280_v6 = vsel %vm1261_vm4, %v1259_v3, -inf }
 0x3bc   : > { %v1233_v8 = vpop.f32.mrf.mxu1  ;;  %1281 = vmax.xlane.f32.xlu1 %v1280_v6  ;;  %v1190_v9 = vpop.f32.mrf.mxu0 }
 0x3bd   : > { %v1260_v10 = vadd.f32 %v2185_v47, %v1233_v8  ;;  %v2171_v8 = vcombine.high %v3189_v16, %v3189_v16  ;;  %v1454_v9 = vsel %vm1261_vm4, %v2170_v2, 0 }
 0x3be   : > { %v2322_v11 = vpop.f32.mrf.mxu0  ;;  %v2327_v12 = vpop.f32.mrf.mxu1 }
 0x3bf   : > { %v1283_v13 = vsel %vm1261_vm4, %v1260_v10, -inf }
 0x3c0   : > { %1284 = vmax.xlane.f32.xlu0 %v1283_v13  ;;  %v1236_v14 = vpop.f32.mrf.mxu1 }
 0x3c1   : > { %v2172_v14 = vcombine.low %v3135_v58, %v3135_v58 }
 0x3c2   : > { %v2328_v15 = vpop.f32.mrf.mxu1 }
 0x3c3   : > { %v1500_v15 = vsel %vm1261_vm4, %v2171_v8, 0 }
 0x42d   : > { %v1264_v17 = vpop.xlane.xlu0 %1263 }
 0x42e   : > { %v1286_v18 = vsub.f32 %v1253_v27, %v1264_v17 }
 0x430   : > { %v1294_v19 = vmul.f32 1.442695, %v1286_v18 }
 0x431   : > { %v1267_v20 = vpop.xlane.xlu1 %1266 }
 0x432   : > { %2509 = vpow2.f32 %v1294_v19  ;;  %v1287_v21 = vsub.f32 %v1254_v32, %v1267_v20  ;;  %v2173_v20 = vcombine.high %v3135_v58, %v3135_v58 }
 0x434   : > { %v1296_v22 = vmul.f32 1.442695, %v1287_v21  ;;  %v1546_v21 = vsel %vm1261_vm4, %v2172_v14, 0  ;;  %v1592_v58 = vsel %vm1261_vm4, %v2173_v20, 0 }
 0x435   : > { %v1270_v23 = vpop.xlane.xlu1 %1269 }
 0x436   : > { %2511 = vpow2.f32 %v1296_v22  ;;  %v1288_v24 = vsub.f32 %v1255_v38, %v1270_v23 }
 0x438   : > { %v1298_v25 = vmul.f32 1.442695, %v1288_v24 }
 0x439   : > { %v1273_v26 = vpop.xlane.xlu1 %1272 }
 0x43a   : > { %2513 = vpow2.f32 %v1298_v25  ;;  %v1289_v28 = vsub.f32 %v1256_v44, %v1273_v26  ;;  %v2174_v26 = vcombine.low %v3137_v60, %v3137_v60 }
 0x43c   : > { %v1300_v29 = vmul.f32 1.442695, %v1289_v28 }
 0x43d   : > { %v1276_v30 = vpop.xlane.xlu1 %1275 }
 0x43e   : > { %2515 = vpow2.f32 %v1300_v29  ;;  %v1290_v31 = vsub.f32 %v1257_v51, %v1276_v30 }
 0x43f   : > { %v2510_v33 = vpop.eup %2509 }
 0x440   : > { %v1302_v34 = vmul.f32 1.442695, %v1290_v31  ;;  %v1310_v27 = vsel %vm1261_vm4, %v2510_v33, 0.0  ;;  %v2175_v31 = vcombine.high %v3137_v60, %v3137_v60 }
 0x441   : > { %1311 = vadd.xlane.f32.xlu1 %v1310_v27  ;;  %v1279_v35 = vpop.xlane.xlu0 %1278 }
 0x442   : > { %2517 = vpow2.f32 %v1302_v34  ;;  %v1291_v32 = vsub.f32 %v1258_v57, %v1279_v35 }
 0x443   : > { %v2512_v36 = vpop.eup %2511 }
 0x444   : > { %v1304_v37 = vmul.f32 1.442695, %v1291_v32  ;;  %v1313_v38 = vsel %vm1261_vm4, %v2512_v36, 0.0  ;;  %v1684_v32 = vsel %vm1261_vm4, %v2175_v31, 0 }
 0x445   : > { %1314 = vadd.xlane.f32.xlu0 %v1313_v38  ;;  %v1282_v39 = vpop.xlane.xlu1 %1281 }
 0x446   : > { %2519 = vpow2.f32 %v1304_v37  ;;  %v1292_v40 = vsub.f32 %v1259_v3, %v1282_v39 }
 0x447   : > { %v2514_v41 = vpop.eup %2513 }
 0x448   : > { %v1306_v42 = vmul.f32 1.442695, %v1292_v40  ;;  %v1316_v43 = vsel %vm1261_vm4, %v2514_v41, 0.0  ;;  %v1736_v40 = vld [vmem:[#allocation11 + $0x4] sm:$0xf] }
 0x449   : > { %1317 = vadd.xlane.f32.xlu1 %v1316_v43  ;;  %v1285_v44 = vpop.xlane.xlu0 %1284 }
 0x44a   : > { %2521 = vpow2.f32 %v1306_v42  ;;  %v1293_v45 = vsub.f32 %v1260_v10, %v1285_v44  ;;  %v1734_v42 = vld [vmem:[#allocation11] sm:$0xf] }
 0x44b   : > { %v2516_v46 = vpop.eup %2515  ;;  %v1798_v43 = vsel %vm873_vm2, %v1734_v42, 0 }
 0x44c   : > { %v1308_v47 = vmul.f32 1.442695, %v1293_v45  ;;  %v1319_v48 = vsel %vm1261_vm4, %v2516_v46, 0.0 }
 0x44d   : > { %1320 = vadd.xlane.f32.xlu0 %v1319_v48 }
 0x44e   : > { %2523 = vpow2.f32 %v1308_v47 }
 0x44f   : > { %v3195_v49 = vpop.eup %2517 }
 0x450   : > { %v1322_v50 = vsel %vm1261_vm4, %v3195_v49, 0.0 }
 0x451   : > { %1323 = vadd.xlane.f32.xlu1 %v1322_v50 }
 0x453   : > { %v3199_v51 = vpop.eup %2519 }
 0x454   : > { %v1325_v52 = vsel %vm1261_vm4, %v3199_v51, 0.0 }
 0x455   : > { %1326 = vadd.xlane.f32.xlu0 %v1325_v52 }
 0x457   : > { %v3203_v53 = vpop.eup %2521 }
 0x458   : > { %v1328_v54 = vsel %vm1261_vm4, %v3203_v53, 0.0 }
 0x459   : > { %1329 = vadd.xlane.f32.xlu1 %v1328_v54 }
 0x45b   : > { %v3207_v55 = vpop.eup %2523 }
 0x45c   : > { %v1331_v56 = vsel %vm1261_vm4, %v3207_v55, 0.0 }
 0x45d   : > { %1332 = vadd.xlane.f32.xlu0 %v1331_v56 }
 0x4ca   : > { %v1312_v57 = vpop.xlane.xlu1 %1311 }
 0x4cb   : > { %2525 = vrcp.f32 %v1312_v57 }
 0x4ce   : > { %v1315_v59 = vpop.xlane.xlu0 %1314 }
 0x4cf   : > { %2527 = vrcp.f32 %v1315_v59  ;;  %v1898_v59 = vld [vmem:[#allocation11 + $0xc] sm:$0xf] }
 0x4d0   : > { %v1908_v2 = vsel %vm873_vm2, %v1898_v59, 0 }
 0x4d2   : > { %v1318_v61 = vpop.xlane.xlu1 %1317 }
 0x4d3   : > { %2529 = vrcp.f32 %v1318_v61 }
 0x4d6   : > { %v1321_v62 = vpop.xlane.xlu0 %1320 }
 0x4d7   : > { %2531 = vrcp.f32 %v1321_v62 }
 0x4d8   : > { %v2526_v63 = vpop.eup %2525 }
 0x4d9   : > { %v1342_v3 = vmul.f32 %v2526_v63, %v2510_v33  ;;  %v1638_v33 = vsel %vm1261_vm4, %v2174_v26, 0 }
 0x4da   : > { %v1324_v4 = vpop.xlane.xlu1 %1323 }
 0x4db   : > { %2533 = vrcp.f32 %v1324_v4  ;;  %v1350_v5 = vpack.c.bf16 %v1342_v3, %v1342_v3 }
 0x4dc   : > { %v2528_v6 = vpop.eup %2527 }
 0x4dd   : > { %2332 = vmatmul.mubr.msk.bf16.vlgmr.msra.gmra.mxu0 %vm1261_vm4, %v1350_v5  ;;  %v1343_v10 = vmul.f32 %v2528_v6, %v2512_v36  ;;  %v1842_v5 = vld [vmem:[#allocation11 + $0x8] sm:$0xf] }
 0x4de   : > { %2342 = vmatpush3.bf16.xpose.msra.mxu0 %v1454_v9  ;;  %v1327_v11 = vpop.xlane.xlu0 %1326  ;;  %2343 = vmatprep.mubr.msk.bf16.mxu0 %vm2794_vm1, %v2793_v7 }
 0x4df   : > { %2535 = vrcp.f32 %v1327_v11  ;;  %v1351_v12 = vpack.c.bf16 %v1343_v10, %v1343_v10  ;;  %2353 = vmatprep.subr.bf16.mxu0 %v2793_v7  ;;  %v1852_v10 = vsel %vm873_vm2, %v1842_v5, 0 }
 0x4e0   : > { %v2530_v13 = vpop.eup %2529 }
 0x4e1   : > { %2338 = vmatmul.mubr.msk.bf16.vlgmr.msra.gmra.mxu1 %vm1261_vm4, %v1351_v12  ;;  %v1344_v16 = vmul.f32 %v2530_v13, %v2514_v41  ;;  %v1746_v41 = vsel %vm873_vm2, %v1736_v40, 0 }
 0x4e2   : > { %2348 = vmatpush3.bf16.xpose.msra.mxu1 %v1500_v15  ;;  %v1330_v17 = vpop.xlane.xlu1 %1329  ;;  %2349 = vmatprep.mubr.msk.bf16.mxu1 %vm2794_vm1, %v2793_v7 }
 0x4e3   : > { %2537 = vrcp.f32 %v1330_v17  ;;  %v1352_v18 = vpack.c.bf16 %v1344_v16, %v1344_v16  ;;  %2359 = vmatprep.subr.bf16.mxu1 %v2793_v7 }
 0x4e4   : > { %v2532_v19 = vpop.eup %2531 }
 0x4e5   : > { %2344 = vmatmul.mubr.msk.bf16.vlgmr.msra.gmra.mxu0 %vm1261_vm4, %v1352_v18  ;;  %v1345_v22 = vmul.f32 %v2532_v19, %v2516_v46 }
 0x4e6   : > { %2354 = vmatpush3.bf16.xpose.msra.mxu0 %v1546_v21  ;;  %v1333_v23 = vpop.xlane.xlu0 %1332  ;;  %2355 = vmatprep.mubr.msk.bf16.mxu0 %vm2794_vm1, %v2793_v7 }
 0x4e7   : > { %2539 = vrcp.f32 %v1333_v23  ;;  %v1353_v24 = vpack.c.bf16 %v1345_v22, %v1345_v22  ;;  %2365 = vmatprep.subr.bf16.mxu0 %v2793_v7 }
 0x4e8   : > { %v2534_v25 = vpop.eup %2533 }
 0x4e9   : > { %2350 = vmatmul.mubr.msk.bf16.vlgmr.msra.gmra.mxu1 %vm1261_vm4, %v1353_v24  ;;  %v1346_v28 = vmul.f32 %v2534_v25, %v3195_v49 }
 0x4ea   : > { %2360 = vmatpush3.bf16.xpose.msra.mxu1 %v1592_v58  ;;  %2361 = vmatprep.mubr.msk.bf16.mxu1 %vm2794_vm1, %v2793_v7 }
 0x4eb   : > { %v1354_v29 = vpack.c.bf16 %v1346_v28, %v1346_v28  ;;  %2371 = vmatprep.subr.bf16.mxu1 %v2793_v7 }
 0x4ec   : > { %v2536_v30 = vpop.eup %2535 }
 0x4ed   : > { %2356 = vmatmul.mubr.msk.bf16.vlgmr.msra.gmra.mxu0 %vm1261_vm4, %v1354_v29  ;;  %v1347_v34 = vmul.f32 %v2536_v30, %v3199_v51 }
 0x4ee   : > { %2366 = vmatpush3.bf16.xpose.msra.mxu0 %v1638_v33  ;;  %2367 = vmatprep.mubr.msk.bf16.mxu0 %vm2794_vm1, %v2793_v7 }
 0x4ef   : > { %v1355_v27 = vpack.c.bf16 %v1347_v34, %v1347_v34  ;;  %2377 = vmatprep.subr.bf16.mxu0 %v2793_v7 }
 0x4f0   : > { %v2538_v35 = vpop.eup %2537 }
 0x4f1   : > { %2362 = vmatmul.mubr.msk.bf16.vlgmr.msra.gmra.mxu1 %vm1261_vm4, %v1355_v27  ;;  %v1348_v60 = vmul.f32 %v2538_v35, %v3203_v53 }
 0x4f2   : > { %2372 = vmatpush3.bf16.xpose.msra.mxu1 %v1684_v32  ;;  %2373 = vmatprep.mubr.msk.bf16.mxu1 %vm2794_vm1, %v2793_v7 }
 0x4f3   : > { %v1356_v36 = vpack.c.bf16 %v1348_v60, %v1348_v60  ;;  %2383 = vmatprep.subr.bf16.mxu1 %v2793_v7 }
 0x4f4   : > { %v2540_v37 = vpop.eup %2539 }
 0x4f5   : > { %2368 = vmatmul.mubr.msk.bf16.vlgmr.msra.gmra.mxu0 %vm1261_vm4, %v1356_v36  ;;  %v1349_v38 = vmul.f32 %v2540_v37, %v3207_v55 }
 0x4f6   : > { %2379 = vmatprep.mubr.msk.bf16.mxu0 %vm2794_vm1, %v2793_v7  ;;  %2378 = vmatpush3.bf16.msra.mxu0 %v1746_v41 }
 0x4f7   : > { %v1357_v39 = vpack.c.bf16 %v1349_v38, %v1349_v38  ;;  %2389 = vmatprep.subr.bf16.mxu0 %v2793_v7 }
 0x4f9   : > { %2374 = vmatmul.mubr.msk.bf16.vlgmr.msra.gmra.mxu1 %vm1261_vm4, %v1357_v39 }
 0x4fa   : > { %2385 = vmatprep.mubr.msk.bf16.mxu1 %vm2794_vm1, %v2793_v7  ;;  %2384 = vmatpush3.bf16.msra.mxu1 %v1798_v43 }
 0x4fb   : > { %2395 = vmatprep.subr.bf16.mxu1 %v2793_v7 }
 0x59d   : > { %v1398_v44 = vpop.f32.mrf.mxu0 }
 0x59f   : > { %v2333_v45 = vpop.f32.mrf.mxu0 }
 0x5a1   : > { %v1401_v46 = vpop.f32.mrf.mxu0  ;;  %v1444_v47 = vpop.f32.mrf.mxu1 }
 0x5a3   : > { %v2334_v48 = vpop.f32.mrf.mxu0  ;;  %v2339_v49 = vpop.f32.mrf.mxu1 }
 0x5a5   : > { %v1447_v50 = vpop.f32.mrf.mxu1  ;;  %v1490_v51 = vpop.f32.mrf.mxu0 }
 0x5a7   : > { %v2340_v52 = vpop.f32.mrf.mxu1  ;;  %v2345_v53 = vpop.f32.mrf.mxu0 }
 0x5a9   : > { %v1493_v54 = vpop.f32.mrf.mxu0  ;;  %v1536_v55 = vpop.f32.mrf.mxu1 }
 0x5ab   : > { %v2346_v56 = vpop.f32.mrf.mxu0  ;;  %v2351_v57 = vpop.f32.mrf.mxu1 }
 0x5ad   : > { %v1539_v61 = vpop.f32.mrf.mxu1  ;;  %v1582_v62 = vpop.f32.mrf.mxu0 }
 0x5ae   : > { %v2214_v63 = vpack.c.bf16 %v1582_v62, %v1398_v44 }
 0x5af   : > { %v2352_v3 = vpop.f32.mrf.mxu1  ;;  %v2357_v4 = vpop.f32.mrf.mxu0 }
 0x5b0   : > { %2386 = vmatmul.mubr.msk.bf16.vlgmr.msra.gmra.mxu1 %vm869_vm3, %v2214_v63 }
 0x5b1   : > { %v1585_v6 = vpop.f32.mrf.mxu0  ;;  %v1628_v8 = vpop.f32.mrf.mxu1  ;;  %2396 = vmatpush3.bf16.msra.mxu1 %v1908_v2  ;;  %2397 = vmatprep.mubr.msk.bf16.mxu1 %vm2794_vm1, %v2793_v7 }
 0x5b2   : > { %v2213_v9 = vpack.c.bf16 %v1628_v8, %v1444_v47 }
 0x5b3   : > { %v2358_v11 = vpop.f32.mrf.mxu0  ;;  %v2363_v12 = vpop.f32.mrf.mxu1 }
 0x5b4   : > { %2380 = vmatmul.mubr.msk.bf16.vlgmr.msra.gmra.mxu0 %vm869_vm3, %v2213_v9 }
 0x5b5   : > { %2390 = vmatpush3.bf16.msra.mxu0 %v1852_v10  ;;  %v1631_v13 = vpop.f32.mrf.mxu1  ;;  %v1674_v14 = vpop.f32.mrf.mxu0  ;;  %2391 = vmatprep.mubr.msk.bf16.mxu0 %vm2794_vm1, %v2793_v7 }
 0x5b6   : > { %v2215_v19 = vpack.c.bf16 %v1674_v14, %v1490_v51 }
 0x5b7   : > { %v2364_v15 = vpop.f32.mrf.mxu1  ;;  %v2369_v16 = vpop.f32.mrf.mxu0 }
 0x5b9   : > { %v1677_v17 = vpop.f32.mrf.mxu0  ;;  %v1720_v18 = vpop.f32.mrf.mxu1 }
 0x5ba   : > { %v2216_v20 = vpack.c.bf16 %v1720_v18, %v1536_v55 }
 0x5bb   : > { %v2370_v21 = vpop.f32.mrf.mxu0  ;;  %v2375_v22 = vpop.f32.mrf.mxu1 }
 0x5bc   : > { %2392 = vmatmul.mubr.msk.bf16.vlgmr.msra.gmra.mxu0 %vm869_vm3, %v2215_v19  ;;  %2398 = vmatmul.mubr.msk.bf16.vlgmr.msra.gmra.mxu1 %vm869_vm3, %v2216_v20 }
 0x5bd   : > { %v1723_v23 = vpop.f32.mrf.mxu1 }
 0x5bf   : > { %v2376_v24 = vpop.f32.mrf.mxu1 }
 0x670   : > { %v1834_v25 = vpop.f32.mrf.mxu1 }
 0x672   : > { %v2387_v26 = vpop.f32.mrf.mxu1 }
 0x674   : > { %v1782_v58 = vpop.f32.mrf.mxu0  ;;  %v1837_v28 = vpop.f32.mrf.mxu1 }
 0x675   : > { %v1835_v33 = vadd.f32 %v1834_v25, %v1782_v58 }
 0x676   : > { %v2381_v29 = vpop.f32.mrf.mxu0  ;;  %v2388_v7 = vpop.f32.mrf.mxu1 }
 0x678   : > { %v1785_v30 = vpop.f32.mrf.mxu0 }
 0x679   : > { %v1838_v36 = vadd.f32 %v1837_v28, %v1785_v30 }
 0x67a   : > { %v2382_v31 = vpop.f32.mrf.mxu0 }
 0x67c   : > { %v1888_v34 = vpop.f32.mrf.mxu0  ;;  %v1944_v27 = vpop.f32.mrf.mxu1 }
 0x67d   : > { %v1895_v35 = vadd.f32 %v1888_v34, %v1835_v33 }
 0x67e   : > { %v2393_v32 = vpop.f32.mrf.mxu0  ;;  %v2399_v60 = vpop.f32.mrf.mxu1 }
 0x67f   : > { %v1951_v37 = vadd.f32 %v1944_v27, %v1895_v35 }
 0x680   : > { %v1891_v38 = vpop.f32.mrf.mxu0  ;;  %v1947_v39 = vpop.f32.mrf.mxu1 }
 0x681   : > { %v1953_v40 = vadd.f32 %v1951_v37, %v3099_v0  ;;  %v1896_v41 = vadd.f32 %v1891_v38, %v1838_v36 }
 0x682   : > { %v2394_v42 = vpop.f32.mrf.mxu0  ;;  %v2400_v43 = vpop.f32.mrf.mxu1 }
 0x683   : > { %1955 = vst.msk [vmem:[%s418_s30] sm:$0xff] %vm429_vm0, %v1953_v40  ;;  %v1952_v44 = vadd.f32 %v1947_v39, %v1896_v41 }
 0x685   : > { %v1954_v0 = vadd.f32 %v1952_v44, %v3101_v1 }
 0x687   : > { %1956 = vst.msk [vmem:[%s418_s30 + $0x8] sm:$0xff] %vm429_vm0, %v1954_v0 }
 0x688   : > { %2716 = shalt.err (!%p2713_p10)
}
 0x689   : > { %s2717_s19 = scalar_lea.hbm %s3284_s23, 256  ;;  %s2721_s11 = scalar_lea.hbm %s3338_s7, 512 }
 0x68a   : > { %p2718_p11 = scmp.ne.s32.totalorder %s3284_s23, %s2717_s19  ;;  %p2722_p5 = scmp.lt.s32.totalorder %s3284_s23, %s3338_s7 }
 0x68b   : > { %p2723_p12 = scmp.lt.s32.totalorder %s2721_s11, %s2717_s19 }
 0x68c   : > { %p2719_p1 = pnand %p2718_p11, %p3383_p2 }
 0x68d   : > { %p2724_p0 = por %p2723_p12, %p2722_p5 }
 0x68e   : > { %p2720_p4 = pneg %p2719_p1 }
 0x690   : > { %p2725_p13 = pnand %p2724_p0, %p2720_p4 }
 0x692   : > { %2728 = shalt.err (!%p2725_p13)
}
 0x693   : > { %s2796_s12 = smov 128   ;;  %s2797_s21 = smov 8  }
 0x694   : > { %2419 = dma.vmem_to_hbm [thread:$0]  (%p3383_p2), %s3286_s9, 256, %s3284_s23, %s1958_s28, %s2796_s12, %s2796_s12, %s2797_s21  }
 0x695 PF: > { %s1986_s20 = sand.u32 1, %s2767_s24   ;;  %p3384_p7 = scmp.ne.s32.totalorder %s3362_s14, 0 }
 0x696   : > { %p3385_p3 = scmp.ge.s32.totalorder %s2779_s27, 2  ;;  %s1987_s30 = scalar_lea.sflag [#allocation4], %s1986_s20 }
 0x698   : > { %p2442_p8 = pnand %p3385_p3, %p3384_p7 }
 0x69a   : > { %p2443_p9 = pneg %p2442_p8 }
 0x69c   : > { %2762 = dma.done.wait (%p2443_p9), %s1987_s30, 256  }
 0x69d   : > { %2764 = vsyncadd (%p2443_p9), %s1987_s30, 4294967040  ;;  %s3386_s27 = sld [smem:[#allocation20_spill]]  ;;  %s3389_s24 = smov %s2771_s25 }
 0x69e   : > { %s3387_s8 = sld [smem:[#allocation19_spill]] }
 0x69f   : > { %s3388_s26 = sld [smem:[#allocation21_spill]] }
 0x6a3   : > { %p25_p6 = scmp.ge.s32.totalorder %s3386_s27, 4  }
 0x6a4   : > { %s3390_s25 = smov %s3387_s8 }
 0x6a5   :  { %27 = sbr.rel (!%p25_p6) target bundleno = 12 (0xc), region = 132 }
 0x6aa   :  { %1992 = vsyncpa [#allocation3], 1 }
 0x6ab   :  { %1994 = vsyncpa [#allocation3 + $0x1], 1 }
 0x6ac   :  { %1995 = vsyncpa [#allocation6], 1 }
 0x6ad   :  { %1997 = vsyncpa [#allocation6 + $0x1], 1 }
 0x6ae   :  { %1998 = vsyncpa [#allocation9], 1 }
 0x6af   :  { %1999 = vsyncpa [#allocation12], 1 }
 0x6b0   :  { %2000 = vsyncpa [#allocation4], 1 }
 0x6b1   :  { %2002 = vsyncpa [#allocation4 + $0x1], 1 }

// kernel: tpu_custom_call.1
= control target key start
LH: loop header
LB: loop body
LE: loop exit
PB: predicated region body
PF: predicated region fallthrough
CT: control target
= control target key end

     0   :  { %s3497_s0 = inlined_call_operand.hbm [shape: f32[4,8,32], index: 0, kind: input, shape index: {}]   ;;  %s3498_s1 = inlined_call_operand.hbm [shape: bf16[4,16,32], index: 1, kind: input, shape index: {}]   ;;  %s3499_s2 = inlined_call_operand.hbm [shape: f32[4,1,16], index: 2, kind: input, shape index: {}]   ;;  %s3500_s3 = inlined_call_operand.vmem [shape: f32[1,32], index: 3, kind: input, shape index: {}]   ;;  %s3501_s4 = inlined_call_operand.hbm [shape: bf16[32,32], index: 4, kind: input, shape index: {}]   ;;  %s3502_s5 = inlined_call_operand.hbm [shape: bf16[32,64], index: 5, kind: input, shape index: {}]   ;;  %s3503_s6 = inlined_call_operand.hbm [shape: bf16[4,8,32], index: 6, kind: input, shape index: {}]   ;;  %s3504_s7 = inlined_call_operand.hbm [shape: f32[4,8,32], index: 7, kind: output, shape index: {}]  }
   0x1   :  { %3520 = sst [smem:[#allocation22_spill]] %s3497_s0 }
   0x2   :  { %3521 = sst [smem:[#allocation23_spill]] %s3498_s1 }
   0x3   :  { %12 = vsyncpa [#allocation3], 0 }
   0x4   :  { %14 = vsyncpa [#allocation3 + $0x1], 0 }
   0x5   :  { %15 = vsyncpa [#allocation6], 0 }
   0x6   :  { %17 = vsyncpa [#allocation6 + $0x1], 0 }
   0x7   :  { %18 = vsyncpa [#allocation9], 0 }
   0x8   :  { %19 = vsyncpa [#allocation12], 0 }
   0x9   :  { %20 = vsyncpa [#allocation4], 0 }
   0xa   :  { %22 = vsyncpa [#allocation4 + $0x1], 0  ;;  %s2990_s24 = smov 0   ;;  %s2992_s25 = smov 0  }
   0xb   :  { %s2994_s26 = smov 0   ;;  %s2996_s27 = smov 0  }
   0xc LB: > { %3522 = sst [smem:[#allocation19_spill]] %s2927_s26  ;;  %s3011_s28 = sadd.s32 4294967295, %s2931_s27   ;;  %s2931_s27 = sphi %s2996_s27, %s3552_s27   ;;  %s2927_s26 = sphi %s2994_s26, %s3554_s26   ;;  %s2923_s25 = sphi %s2992_s25, %s3556_s25   ;;  %s2919_s24 = sphi %s2990_s24, %s3555_s24  }
   0xd   : > { %s2254_s29 = sadd.s32 4294967294, %s2931_s27   ;;  %s3015_s30 = sadd.s32 1, %s2931_s27  }
   0xe   : > { %3523 = sst [smem:[#allocation20_spill]] %s3015_s30  ;;  %s35_s8 = sadd.s32 1, %s2927_s26 }
   0xf   : > { %s32_s9 = ssub.s32 %s2931_s27, %s3015_s30  ;;  %p42_p0 = scmp.ne.s32.totalorder %s2927_s26, %s2923_s25 }
  0x10   : > { %p33_p1 = scmp.eq.s32.totalorder %s32_s9, 0  ;;  %p43_p2 = scmp.eq.s32.totalorder %s2931_s27, 0 }
  0x11   : > { %p48_p3 = scmp.ne.s32.totalorder %s2923_s25, %s2919_s24  ;;  %p3505_p4 = scmp.eq.s32.totalorder %s3011_s28, 0 }
  0x12   : > { %s3027_s10 = scalar_select %p33_p1, %s2927_s26, %s35_s8  }
  0x13   : > { %p3029_p5 = por %p43_p2, %p42_p0  ;;  %p3035_p6 = por %p3505_p4, %p48_p3 }
  0x14   : > { %3524 = sst [smem:[#allocation21_spill]] %s3027_s10  ;;  %p208_p7 = scmp.eq.s32.totalorder %s3011_s28, 1 }
  0x15   : > { %s3526_s12 = scalar_select %p3035_p6, 1, 0 }
  0x16   : > { %p214_p8 = scmp.eq.s32.totalorder %s2254_s29, 1  ;;  %p2255_p9 = scmp.ge.s32.totalorder %s2931_s27, 1 }
  0x17   : > { %p221_p10 = scmp.lt.s32.totalorder %s2931_s27, 3  ;;  %p3042_p11 = por %p208_p7, %p42_p0 }
  0x18   : > { %p3046_p12 = por %p214_p8, %p48_p3  ;;  %s2933_s16 = smov [#allocation8]  }
  0x19   : > { %s3527_s13 = scalar_select %p3042_p11, 1, 0 }
  0x1a   : > { %s3528_s14 = scalar_select %p3046_p12, 1, 0 }
  0x1b   : > { %p3050_p13 = pnand %p2255_p9, %p221_p10  ;;  %s236_s17 = sshll.u32 %s2933_s16, 4  ;;  %s237_s17 = int_to_ptr.vmem [resolvable:$true] %s236_s17 }
  0x1c   : > { %p2558_p3 = scmp.lt.s32.totalorder %s2931_s27, 2  ;;  %s3065_s19 = sand.u32 1, %s2927_s26  }
  0x1d   : > { %s3529_s15 = scalar_select %p3050_p13, 1, 0 }
  0x1e   : > { %p2531_p1 = pneg %p3050_p13  ;;  %s2704_s21 = scalar_lea.vmem %s237_s17, 256 }
  0x1f   : > { %p2705_p8 = scmp.ne.s32.totalorder %s237_s17, %s2704_s21 }
  0x20   : > { %p3058_p2 = pnand %p2531_p1, %p3505_p4  ;;  %p2712_p1 = scmp.lt.s32.totalorder %s237_s17, %s237_s17 }
  0x21   : > { %p2713_p4 = scmp.lt.s32.totalorder %s2704_s21, %s2704_s21 }
  0x22   : > { %s3530_s18 = scalar_select %p3058_p2, 1, 0 }
  0x23   : > { %p3515_p7 = pneg %p3058_p2  ;;  %p2714_p12 = por %p2713_p4, %p2712_p1 }
  0x25   : > { %p2707_p9 = pnand %p2705_p8, %p3515_p7 }
  0x27   : > { %p2708_p10 = pneg %p2707_p9 }
  0x29   : > { %p2715_p11 = pnand %p2714_p12, %p2708_p10 }
  0x2b   : > { %2718 = shalt.err (!%p2715_p11)
}
  0x2c   : > { %s3510_s22 = smov 64   ;;  %s3513_s23 = smov 4  }
  0x2d   : > { %2534 = dma.hbm_to_vmem [thread:$0]  (!%p3058_p2), %s3501_s4, 256, %s237_s17, [#allocation9], %s3510_s22, %s3510_s22, %s3513_s23  }
  0x2e   : > { %s3512_s9 = sshll.u32 %s2931_s27, 8  ;;  %p3086_p4 = pnand %p2558_p3, %p3029_p5 }
  0x2f   : > { %s297_s21 = sand.u32 1, %s2931_s27   ;;  %s3532_s1 = sld [smem:[#allocation23_spill]] }
  0x30   : > { %s3533_s30 = sshll.u32 %s3065_s19, 4  ;;  %s3102_s11 = scalar_lea.sflag [#allocation6], %s297_s21 }
  0x31   : > { %s301_s17 = scalar_lea.vmem [#allocation5], %s3533_s30  ;;  %p3108_p11 = pneg %p3086_p4 }
  0x32   : > { %s309_s29 = sshll.u32 %s301_s17, 4  ;;  %s3100_s29 = int_to_ptr.vmem [resolvable:$true] %s309_s29 }
  0x35   : > { %s3096_s26 = scalar_lea.hbm %s3532_s1, %s3512_s9  ;;  %s2724_s30 = scalar_lea.hbm %s3532_s1, 512 }
  0x36   : > { %s2719_s8 = scalar_lea.hbm %s3096_s26, 256  ;;  %p2725_p8 = scmp.lt.s32.totalorder %s3096_s26, %s3532_s1 }
  0x37   : > { %p2720_p5 = scmp.ne.s32.totalorder %s3096_s26, %s2719_s8  ;;  %p2726_p9 = scmp.lt.s32.totalorder %s2724_s30, %s2719_s8 }
  0x39   : > { %p2722_p12 = pnand %p3108_p11, %p2720_p5  ;;  %p2727_p10 = por %p2726_p9, %p2725_p8 }
  0x3b   : > { %p2723_p3 = pneg %p2722_p12 }
  0x3d   : > { %p2728_p1 = pnand %p2727_p10, %p2723_p3 }
  0x3f   : > { %2731 = shalt.err (!%p2728_p1)
}
  0x40   : > { %s2732_s21 = scalar_lea.vmem %s3100_s29, 256  ;;  %s2936_s23 = smov [#allocation5]  }
  0x41   : > { %p2733_p0 = scmp.ne.s32.totalorder %s3100_s29, %s2732_s21  ;;  %s2737_s10 = sshll.u32 %s2936_s23, 4  ;;  %s2738_s10 = int_to_ptr.vmem [resolvable:$false] %s2737_s10 }
  0x42   : > { %s2739_s20 = scalar_lea.vmem %s2738_s10, 512  ;;  %p2740_p7 = scmp.lt.s32.totalorder %s3100_s29, %s2738_s10 }
  0x43   : > { %p2735_p5 = pnand %p2733_p0, %p3108_p11  ;;  %p2741_p6 = scmp.lt.s32.totalorder %s2739_s20, %s2732_s21 }
  0x45   : > { %p2736_p12 = pneg %p2735_p5  ;;  %p2742_p13 = por %p2741_p6, %p2740_p7 }
  0x47   : > { %p2743_p2 = pnand %p2742_p13, %p2736_p12 }
  0x49   : > { %2746 = shalt.err (!%p2743_p2)
}
  0x4a   : > { %s3535_s9 = smov 4   ;;  %s3536_s8 = smov 64  }
  0x4b   : > { %2547 = dma.hbm_to_vmem [thread:$0]  (!%p3086_p4), %s3096_s26, 256, %s3100_s29, %s3102_s11, %s3536_s8, %s3536_s8, %s3535_s9  }
  0x4c   : > { %s2937_s30 = smov [#allocation10]   ;;  %s2938_s23 = smov [#allocation11]  }
  0x4d   : > { %s249_s17 = sshll.u32 %s2937_s30, 4  ;;  %s262_s1 = sshll.u32 %s2938_s23, 4  ;;  %s250_s17 = int_to_ptr.vmem [resolvable:$true] %s249_s17  ;;  %s263_s1 = int_to_ptr.vmem [resolvable:$true] %s262_s1 }
  0x4e   : > { %s2758_s10 = scalar_lea.vmem %s250_s17, 256  ;;  %p3537_p6 = scmp.ne.s32.totalorder %s3530_s18, 0 }
  0x4f   : > { %p2759_p0 = scmp.ne.s32.totalorder %s250_s17, %s2758_s10  ;;  %p2766_p3 = scmp.lt.s32.totalorder %s250_s17, %s250_s17 }
  0x50   : > { %p3538_p13 = pneg %p3537_p6  ;;  %p2767_p8 = scmp.lt.s32.totalorder %s2758_s10, %s2758_s10 }
  0x52   : > { %p2761_p2 = pnand %p2759_p0, %p3538_p13  ;;  %p2768_p9 = por %p2767_p8, %p2766_p3 }
  0x54   : > { %p2762_p7 = pneg %p2761_p2 }
  0x56   : > { %p2769_p10 = pnand %p2768_p9, %p2762_p7 }
  0x58   : > { %2772 = shalt.err (!%p2769_p10)
}
  0x59   : > { %2537 = dma.hbm_to_vmem [thread:$0]  (!%p3537_p6), %s3502_s5, 256, %s250_s17, [#allocation9], %s3536_s8, %s3536_s8, %s3535_s9  }
  0x5a   : > { %s2784_s21 = scalar_lea.vmem %s263_s1, 256  ;;  %p3539_p5 = pmov %p3538_p13 }
  0x5b   : > { %p2785_p1 = scmp.ne.s32.totalorder %s263_s1, %s2784_s21  ;;  %p2792_p13 = scmp.lt.s32.totalorder %s263_s1, %s263_s1 }
  0x5c   : > { %p2793_p2 = scmp.lt.s32.totalorder %s2784_s21, %s2784_s21 }
  0x5d   : > { %p2787_p12 = pnand %p2785_p1, %p3539_p5 }
  0x5e   : > { %p2794_p7 = por %p2793_p2, %p2792_p13 }
  0x5f   : > { %p2788_p0 = pneg %p2787_p12 }
  0x61   : > { %p2795_p3 = pnand %p2794_p7, %p2788_p0 }
  0x63   : > { %2798 = shalt.err (!%p2795_p3)
}
  0x64   : > { %2540 = dma.hbm_to_vmem [thread:$0]  (!%p3537_p6), %s3503_s6, 256, %s263_s1, [#allocation12], %s3536_s8, %s3536_s8, %s3535_s9  }
  0x65   : > { %s3540_s17 = sshll.u32 %s2931_s27, 8  ;;  %s3541_s0 = sld [smem:[#allocation22_spill]] }
  0x66   : > { %s3542_s29 = sshll.u32 %s3065_s19, 4  ;;  %s277_s20 = scalar_lea.sflag [#allocation3], %s3065_s19 }
  0x67   : > { %s280_s18 = scalar_lea.vmem [#allocation2], %s3542_s29 }
  0x68   : > { %s287_s21 = sshll.u32 %s280_s18, 4  ;;  %s3165_s21 = int_to_ptr.vmem [resolvable:$true] %s287_s21 }
  0x6b   : > { %s3161_s26 = scalar_lea.hbm %s3541_s0, %s3540_s17  ;;  %s2804_s8 = scalar_lea.hbm %s3541_s0, 512 }
  0x6c   : > { %s2799_s30 = scalar_lea.hbm %s3161_s26, 256  ;;  %p2805_p10 = scmp.lt.s32.totalorder %s3161_s26, %s3541_s0 }
  0x6d   : > { %p2800_p8 = scmp.ne.s32.totalorder %s3161_s26, %s2799_s30  ;;  %p2806_p1 = scmp.lt.s32.totalorder %s2804_s8, %s2799_s30 }
  0x6f   : > { %p2802_p9 = pnand %p2800_p8, %p3108_p11  ;;  %p2807_p5 = por %p2806_p1, %p2805_p10 }
  0x71   : > { %p2803_p6 = pneg %p2802_p9 }
  0x73   : > { %p2808_p12 = pnand %p2807_p5, %p2803_p6 }
  0x75   : > { %2811 = shalt.err (!%p2808_p12)
}
  0x76   : > { %s2812_s10 = scalar_lea.vmem %s3165_s21, 256  ;;  %s2939_s29 = smov [#allocation2]  }
  0x77   : > { %p2813_p0 = scmp.ne.s32.totalorder %s3165_s21, %s2812_s10  ;;  %s2817_s18 = sshll.u32 %s2939_s29, 4  ;;  %s2818_s18 = int_to_ptr.vmem [resolvable:$false] %s2817_s18 }
  0x78   : > { %s2819_s1 = scalar_lea.vmem %s2818_s18, 512  ;;  %p2820_p7 = scmp.lt.s32.totalorder %s3165_s21, %s2818_s18 }
  0x79   : > { %p2815_p13 = pnand %p2813_p0, %p3108_p11  ;;  %p2821_p3 = scmp.lt.s32.totalorder %s2819_s1, %s2812_s10 }
  0x7b   : > { %p2816_p2 = pneg %p2815_p13  ;;  %p2822_p8 = por %p2821_p3, %p2820_p7 }
  0x7d   : > { %p2823_p9 = pnand %p2822_p8, %p2816_p2 }
  0x7f   : > { %2826 = shalt.err (!%p2823_p9)
}
  0x80   : > { %s2940_s30 = smov 128   ;;  %s2941_s9 = smov 8  }
  0x81   : > { %2544 = dma.hbm_to_vmem [thread:$0]  (!%p3086_p4), %s3161_s26, 256, %s3165_s21, %s277_s20, %s2940_s30, %s2940_s30, %s2941_s9  }
  0x82   : > { %s2267_s8 = sshll.u32 %s3065_s19, 1  ;;  %s2322_s17 = sshll.u32 %s2931_s27, 5 }
  0x83   : > { %s3195_s10 = scalar_lea.hbm %s3499_s2, %s2322_s17  ;;  %s323_s18 = scalar_lea.vmem [#allocation7], %s2267_s8 }
  0x84   : > { %s330_s1 = sshll.u32 %s323_s18, 4  ;;  %s2827_s0 = scalar_lea.hbm %s3195_s10, 32  ;;  %s3197_s1 = int_to_ptr.vmem [resolvable:$true] %s330_s1 }
  0x85   : > { %p2828_p6 = scmp.ne.s32.totalorder %s3195_s10, %s2827_s0  ;;  %s2832_s21 = scalar_lea.hbm %s3499_s2, 64 }
  0x86   : > { %p2833_p5 = scmp.lt.s32.totalorder %s3195_s10, %s3499_s2  ;;  %p2834_p12 = scmp.lt.s32.totalorder %s2832_s21, %s2827_s0 }
  0x87   : > { %p2830_p10 = pnand %p2828_p6, %p3108_p11 }
  0x88   : > { %p2835_p0 = por %p2834_p12, %p2833_p5 }
  0x89   : > { %p2831_p1 = pneg %p2830_p10 }
  0x8b   : > { %p2836_p13 = pnand %p2835_p0, %p2831_p1 }
  0x8d   : > { %2839 = shalt.err (!%p2836_p13)
}
  0x8e   : > { %s2840_s9 = scalar_lea.vmem %s3197_s1, 32  ;;  %s2942_s8 = smov [#allocation7]  }
  0x8f   : > { %p2841_p2 = scmp.ne.s32.totalorder %s3197_s1, %s2840_s9  ;;  %s2845_s17 = sshll.u32 %s2942_s8, 4  ;;  %s2846_s17 = int_to_ptr.vmem [resolvable:$false] %s2845_s17 }
  0x90   : > { %s2847_s23 = scalar_lea.vmem %s2846_s17, 64  ;;  %p2848_p8 = scmp.lt.s32.totalorder %s3197_s1, %s2846_s17 }
  0x91   : > { %p2843_p7 = pnand %p2841_p2, %p3108_p11  ;;  %p2849_p9 = scmp.lt.s32.totalorder %s2847_s23, %s2840_s9 }
  0x93   : > { %p2844_p3 = pneg %p2843_p7  ;;  %p2850_p6 = por %p2849_p9, %p2848_p8 }
  0x95   : > { %p2851_p10 = pnand %p2850_p6, %p2844_p3 }
  0x97   : > { %2854 = shalt.err (!%p2851_p10)
}
  0x98   : > { %s2943_s0 = smov 16   ;;  %s2944_s29 = smov 1  }
  0x99   : > { %2550 = dma.hbm_to_vmem [thread:$0]  (!%p3086_p4), %s3195_s10, 32, %s3197_s1, %s3102_s11, %s2943_s0, %s2943_s0, %s2944_s29  }
  0x9a   : > { %p3543_p11 = scmp.ne.s32.totalorder %s3529_s15, 0 }
  0x9b   : > { %s3223_s22 = sand.u32 (!%p3543_p11), 1, %s2923_s25   ;;  %p3544_p1 = scmp.ne.s32.totalorder (!%p3543_p11), %s3526_s12, 0 }
  0x9c   : > { %342 = sbr.rel (%p3543_p11) target bundleno = 1765 (0x6e5), region = 48  ;;  %s3226_s18 = sshll.u32 (!%p3543_p11), %s3223_s22, 4 }
  0x9d   : > { %s345_s26 = scalar_lea.sflag (!%p3543_p11), [#allocation3], %s3223_s22  ;;  %s348_s19 = scalar_lea.vmem (!%p3543_p11), [#allocation2], %s3226_s18 }
  0xa1   : > { %2898 = dma.done.wait (%p3544_p1), %s345_s26, 256  }
  0xa2   : > { %2900 = vsyncadd (%p3544_p1), %s345_s26, 4294967040  ;;  %s353_s15 = sand.u32 1, %s3011_s28   ;;  %s357_s11 = scalar_lea.vmem [#allocation5], %s3226_s18 }
  0xa3   : > { %s354_s16 = scalar_lea.sflag [#allocation6], %s353_s15 }
  0xa4   : > { %2902 = dma.done.wait (%p3544_p1), %s354_s16, 288  }
  0xa5   : > { %2904 = vsyncadd (%p3544_p1), %s354_s16, 4294967008  ;;  %s2273_s10 = sshll.u32 %s3223_s22, 1  ;;  %p3545_p4 = scmp.eq.s32.totalorder %s3011_s28, 0 }
  0xa6   : > { %s3241_s1 = scalar_lea.vmem [#allocation7], %s2273_s10 }
  0xa7   : > { %2906 = dma.done.wait (%p3545_p4), [#allocation9], 512   ;;  %p3546_p5 = pmov %p3545_p4 }
  0xa8   : > { %p3547_p12 = pmov %p3545_p4 }
  0xa9   : > { %2908 = vsyncadd (%p3546_p5), [#allocation9], 4294966784 }
  0xaa   : > { %2910 = dma.done.wait (%p3547_p12), [#allocation12], 256   ;;  %p3548_p0 = pmov %p3545_p4 }
  0xab   : > { %v3251_v0 = vld [vmem:[%s348_s19] sm:$0xff]  ;;  %vm429_vm0 = vcmask 261120   ;;  %v3253_v1 = vld [vmem:[%s348_s19 + $0x8] sm:$0xff]  ;;  %v2945_v7 = vmov 0.0   ;;  %vm2946_vm1 = vmmov 0   ;;  %vm1003_vm2 = vcmask 1043456  }
  0xac   : > { %2912 = vsyncadd (%p3548_p0), [#allocation12], 4294967040  ;;  %v427_v2 = vmul.f32 %v3251_v0, %v3251_v0  ;;  %v428_v3 = vmul.f32 %v3253_v1, %v3253_v1  ;;  %v2651_v6 = vld [vmem:[#allocation8 + $0x8] sm:$0xff]   ;;  %2375 = vmatprep.subr.bf16.mxu0 %v2945_v7  ;;  %2379 = vmatprep.mubr.msk.bf16.mxu0 %vm2946_vm1, %v2945_v7  ;;  %v2652_v8 = vld [vmem:[#allocation8] sm:$0xff]   ;;  %vm999_vm3 = vcmask 64512   ;;  %vm1391_vm4 = vcmask 130048  }
  0xad   : > { %2376 = vmatpush3.bf16.msra.mxu0 %v2651_v6  ;;  %v2653_v9 = vld [vmem:[#allocation10 + $0x8] sm:$0xff]   ;;  %v2654_v10 = vld [vmem:[#allocation10] sm:$0xff]   ;;  %s2327_s20 = sshll.u32 %s3011_s28, 8  ;;  %s418_s30 = scalar_lea.vmem [#allocation13], %s3226_s18 }
  0xae   : > { %v430_v4 = vsel %vm429_vm0, %v427_v2, 0.0  ;;  %v433_v5 = vsel %vm429_vm0, %v428_v3, 0.0  ;;  %2377 = vmatprep.subr.bf16.mxu0 %v2945_v7  ;;  %v2655_v11 = vld [vmem:[%s357_s11] sm:$0xff]   ;;  %2383 = vmatprep.subr.bf16.mxu1 %v2653_v9  ;;  %v2656_v12 = vld [vmem:[%s357_s11 + $0x8] sm:$0xff]   ;;  %s2109_s9 = sshll.u32 %s418_s30, 4  ;;  %s3450_s23 = scalar_lea.hbm %s3504_s7, %s2327_s20  ;;  %s3452_s9 = int_to_ptr.vmem [resolvable:$true] %s2109_s9 }
  0xaf   : > { %431 = vadd.xlane.f32.xlu0 %v430_v4  ;;  %2387 = vmatprep.mubr.msk.bf16.mxu1 %vm429_vm0, %v2655_v11  ;;  %v2278_v22 = vld [vmem:[%s3500_s3] ss:$0 sm:$0xff]  ;;  %s2096_s28 = scalar_lea.sflag [#allocation4], %s3223_s22  ;;  %s2855_s0 = scalar_lea.vmem %s3452_s9, 256 }
  0xb0   : > { %2384 = vmatpush3.bf16.msra.mxu1 %v2653_v9  ;;  %p2856_p13 = scmp.ne.s32.totalorder %s3452_s9, %s2855_s0  ;;  %p3549_p2 = scmp.ne.s32.totalorder %s3527_s13, 0 }
  0xb1   : > { %2378 = vmatpush3.bf16.msra.mxu0 %v2652_v8  ;;  %2385 = vmatprep.subr.bf16.mxu1 %v2654_v10  ;;  %s2947_s29 = smov [#allocation13]  }
  0xb2   : > { %2391 = vmatprep.subr.bf16.mxu0 %v2945_v7  ;;  %p2857_p7 = pnand %p2856_p13, %p3549_p2  ;;  %s2859_s18 = sshll.u32 %s2947_s29, 4  ;;  %s2860_s18 = int_to_ptr.vmem [resolvable:$false] %s2859_s18 }
  0xb3   : > { %434 = vadd.xlane.f32.xlu0 %v433_v5  ;;  %s2861_s26 = scalar_lea.vmem %s2860_s18, 512  ;;  %p2862_p8 = scmp.lt.s32.totalorder %s3452_s9, %s2860_s18 }
  0xb4   : > { %2386 = vmatpush3.bf16.msra.mxu1 %v2654_v10  ;;  %p2858_p3 = pneg %p2857_p7  ;;  %p2863_p9 = scmp.lt.s32.totalorder %s2861_s26, %s2855_s0 }
  0xb5   : > { %2397 = vmatprep.subr.bf16.mxu1 %v2945_v7 }
  0xb6   : > { %p2864_p6 = por %p2863_p9, %p2862_p8 }
  0xb7   : > { %2388 = vmatmul.mubr.msk.bf16.vlgmr.msra.gmra.mxu1 %vm429_vm0, %v2656_v12 }
  0xb8   : > { %2399 = vmatprep.mubr.msk.bf16.mxu1 %vm2946_vm1, %v2945_v7  ;;  %p2865_p10 = pnand %p2864_p6, %p2858_p3 }
 0x138   : > { %v432_v13 = vpop.xlane.xlu0 %431 }
 0x139   : > { %v437_v14 = vmul.f32 0.03125, %v432_v13 }
 0x13b   : > { %v439_v15 = vadd.f32 1e-06, %v437_v14 }
 0x13c   : > { %v435_v16 = vpop.xlane.xlu0 %434 }
 0x13d   : > { %2657 = vrsqrt.f32 %v439_v15  ;;  %v438_v17 = vmul.f32 0.03125, %v435_v16 }
 0x13f   : > { %v440_v18 = vadd.f32 1e-06, %v438_v17 }
 0x141   : > { %2659 = vrsqrt.f32 %v440_v18 }
 0x14a   : > { %v2658_v19 = vpop.eup %2657 }
 0x14b   : > { %v443_v20 = vmul.f32 %v2658_v19, %v3251_v0 }
 0x14d   : > { %v451_v24 = vmul.f32 %v2278_v22, %v443_v20 }
 0x14e   : > { %v2660_v21 = vpop.eup %2659 }
 0x14f   : > { %v444_v23 = vmul.f32 %v2660_v21, %v3253_v1 }
 0x151   : > { %v452_v25 = vmul.f32 %v2278_v22, %v444_v23 }
 0x153   : > { %v453_v26 = vpack.c.bf16 %v452_v25, %v451_v24 }
 0x155   : > { %2380 = vmatmul.mubr.msk.bf16.vlgmr.msra.gmra.mxu0 %vm429_vm0, %v453_v26 }
 0x156   : > { %2393 = vmatprep.mubr.msk.bf16.mxu0 %vm2946_vm1, %v2945_v7 }
 0x177   : > { %v2389_v32 = vpop.f32.mrf.mxu1 }
 0x179   : > { %v584_v33 = vpop.f32.mrf.mxu1 }
 0x17b   : > { %v2390_v34 = vpop.f32.mrf.mxu1 }
 0x17d   : > { %v587_v35 = vpop.f32.mrf.mxu1 }
 0x215   : > { %v511_v27 = vpop.f32.mrf.mxu0 }
 0x217   : > { %v2381_v28 = vpop.f32.mrf.mxu0 }
 0x219   : > { %v514_v29 = vpop.f32.mrf.mxu0 }
 0x21a   : > { %v2608_v30 = vpack.i.bf16 %v514_v29, %v511_v27 }
 0x21b   : > { %v2382_v31 = vpop.f32.mrf.mxu0 }
 0x21c   : > { %2609 = vxpose.xlu1.b32.start.end [1/1] (short) (narrow) %v2608_v30, 32 }
 0x229   : > { %919 = vxpose.xlu1.b32.start [1/2] (short) (narrow) %v584_v33, 64 }
 0x22d   : > { %920 = vxpose.xlu1.b32.end [2/2] (short) (narrow) %v587_v35, 64 }
 0x298   : > { %v2610_v36 = vpop.trf.xlu1 }
 0x299   : > { %v2611_v39 = vunpack.i.l.bf16 %v2610_v36  ;;  %v2614_v43 = vunpack.i.h.bf16 %v2610_v36 }
 0x29c   : > { %v2615_v37 = vpop.trf.xlu1 }
 0x29d   : > { %v2616_v38 = vunpack.i.l.bf16 %v2615_v37  ;;  %v2619_v41 = vunpack.i.h.bf16 %v2615_v37 }
 0x29f   : > { %v2630_v40 = vpack.i.bf16 %v2616_v38, %v2611_v39  ;;  %v2644_v44 = vpack.i.bf16 %v2619_v41, %v2614_v43 }
 0x2a0   : > { %v2620_v42 = vpop.trf.xlu1 }
 0x2a1   : > { %2631 = vxpose.xlu0.b32.start.end [1/1] (short) (narrow) %v2630_v40, 8  ;;  %v2621_v47 = vunpack.i.l.bf16 %v2620_v42  ;;  %v2624_v56 = vunpack.i.h.bf16 %v2620_v42 }
 0x2a4   : > { %v2625_v45 = vpop.trf.xlu1 }
 0x2a5   : > { %2645 = vxpose.xlu0.b32.start.end [1/1] (short) (narrow) %v2644_v44, 8  ;;  %v2626_v46 = vunpack.i.l.bf16 %v2625_v45  ;;  %v2629_v49 = vunpack.i.h.bf16 %v2625_v45  ;;  %v2296_v45 = vld [vmem:[%s3241_s1] ss:$0 sm:$0xff] }
 0x2a7   : > { %v2637_v48 = vpack.i.bf16 %v2626_v46, %v2621_v47 }
 0x2a8   : > { %v935_v50 = vpop.trf.xlu1 }
 0x2a9   : > { %2638 = vxpose.xlu1.b32.start.end [1/1] (short) (narrow) %v2637_v48, 8  ;;  %887 = vxpose.xlu0.b32.start.end [1/1] (short) (narrow) %v2629_v49, 8  ;;  %v991_v51 = vpack.c.bf16 %v935_v50, %v935_v50 }
 0x2ab   : > { %v1005_v52 = vsel %vm1003_vm2, %v991_v51, 0 }
 0x2ac   : > { %2392 = vmatpush3.bf16.msra.mxu0 %v1005_v52  ;;  %v936_v53 = vpop.trf.xlu1 }
 0x2ad   : > { %951 = vxpose.xlu1.b32.start [1/2] (short) (narrow) %v2389_v32, 64  ;;  %v992_v54 = vpack.c.bf16 %v936_v53, %v936_v53  ;;  %2403 = vmatprep.subr.bf16.mxu0 %v2945_v7 }
 0x2af   : > { %v1051_v55 = vsel %vm1003_vm2, %v992_v54, 0 }
 0x2b0   : > { %2398 = vmatpush3.bf16.msra.mxu1 %v1051_v55  ;;  %v937_v57 = vpop.trf.xlu1 }
 0x2b1   : > { %952 = vxpose.xlu1.b32.end [2/2] (short) (narrow) %v2390_v34, 64  ;;  %2409 = vmatprep.subr.bf16.mxu1 %v2945_v7  ;;  %v993_v62 = vpack.c.bf16 %v937_v57, %v937_v57 }
 0x2b3   : > { %v1097_v10 = vsel %vm1003_vm2, %v993_v62, 0 }
 0x2b4   : > { %v938_v58 = vpop.trf.xlu1 }
 0x2b5   : > { %v994_v63 = vpack.c.bf16 %v938_v58, %v938_v58 }
 0x2b7   : > { %v1143_v11 = vsel %vm1003_vm2, %v994_v63, 0 }
 0x2b8   : > { %v3287_v59 = vpop.trf.xlu1 }
 0x2b9   : > { %v1488_v41 = vpack.c.bf16 %v3287_v59, %v3287_v59 }
 0x2bb   : > { %v1500_v44 = vsel %vm1391_vm4, %v1488_v41, 0 }
 0x2bc   : > { %v3289_v60 = vpop.trf.xlu1 }
 0x2bd   : > { %v1489_v33 = vpack.c.bf16 %v3289_v60, %v3289_v60 }
 0x2bf   : > { %v1546_v37 = vsel %vm1391_vm4, %v1489_v33, 0 }
 0x2c0   : > { %v3291_v61 = vpop.trf.xlu1 }
 0x2c4   : > { %v3293_v5 = vpop.trf.xlu1 }
 0x2ca   : > { %855 = vxpose.xlu1.b32.start.end [1/1] (short) (narrow) %v2624_v56, 8 }
 0x31d   : > { %v2632_v2 = vpop.trf.xlu0 }
 0x31e   : > { %v2636_v3 = vunpack.i.h.bf16 %v2632_v2  ;;  %v2633_v4 = vunpack.i.l.bf16 %v2632_v2 }
 0x320   : > { %v984_v6 = vpack.c.bf16 %v2636_v3, %v2636_v3  ;;  %v983_v8 = vpack.c.bf16 %v2633_v4, %v2633_v4 }
 0x321   : > { %v2646_v9 = vpop.trf.xlu0 }
 0x322   : > { %2394 = vmatmul.mubr.msk.bf16.vlgmr.msra.gmra.mxu0 %vm999_vm3, %v983_v8  ;;  %2400 = vmatmul.mubr.msk.bf16.vlgmr.msra.gmra.mxu1 %vm999_vm3, %v984_v6  ;;  %v2647_v19 = vunpack.i.l.bf16 %v2646_v9  ;;  %v2650_v21 = vunpack.i.h.bf16 %v2646_v9 }
 0x323   : > { %2404 = vmatpush3.bf16.msra.mxu0 %v1097_v10  ;;  %2410 = vmatpush3.bf16.msra.mxu1 %v1143_v11  ;;  %v2297_v10 = vld [vmem:[%s3241_s1 + $0x1] ss:$0 sm:$0xff] }
 0x324   : > { %2405 = vmatprep.mubr.msk.bf16.mxu0 %vm2946_vm1, %v2945_v7  ;;  %2411 = vmatprep.mubr.msk.bf16.mxu1 %vm2946_vm1, %v2945_v7  ;;  %v987_v24 = vpack.c.bf16 %v2647_v19, %v2647_v19  ;;  %v988_v26 = vpack.c.bf16 %v2650_v21, %v2650_v21 }
 0x325   : > { %v2639_v12 = vpop.trf.xlu1  ;;  %2415 = vmatprep.subr.bf16.mxu0 %v2945_v7  ;;  %2421 = vmatprep.subr.bf16.mxu1 %v2945_v7  ;;  %v903_v31 = vpop.trf.xlu0 }
 0x326   : > { %v2643_v13 = vunpack.i.h.bf16 %v2639_v12  ;;  %v2640_v14 = vunpack.i.l.bf16 %v2639_v12  ;;  %v990_v35 = vpack.c.bf16 %v903_v31, %v903_v31 }
 0x328   : > { %v986_v15 = vpack.c.bf16 %v2643_v13, %v2643_v13  ;;  %v985_v16 = vpack.c.bf16 %v2640_v14, %v2640_v14 }
 0x329   : > { %v967_v17 = vpop.trf.xlu1 }
 0x32a   : > { %v995_v18 = vpack.c.bf16 %v967_v17, %v967_v17  ;;  %2406 = vmatmul.mubr.msk.bf16.vlgmr.msra.gmra.mxu0 %vm999_vm3, %v985_v16  ;;  %2412 = vmatmul.mubr.msk.bf16.vlgmr.msra.gmra.mxu1 %vm999_vm3, %v986_v15 }
 0x32b   : > { %2417 = vmatprep.mubr.msk.bf16.mxu0 %vm2946_vm1, %v2945_v7  ;;  %2423 = vmatprep.mubr.msk.bf16.mxu1 %vm2946_vm1, %v2945_v7 }
 0x32c   : > { %v1189_v20 = vsel %vm1003_vm2, %v995_v18, 0 }
 0x32d   : > { %v968_v22 = vpop.trf.xlu1  ;;  %2416 = vmatpush3.bf16.msra.mxu0 %v1189_v20 }
 0x32e   : > { %v996_v23 = vpack.c.bf16 %v968_v22, %v968_v22  ;;  %2427 = vmatprep.subr.bf16.mxu0 %v2945_v7 }
 0x330   : > { %v1235_v25 = vsel %vm1003_vm2, %v996_v23, 0 }
 0x331   : > { %v969_v27 = vpop.trf.xlu1  ;;  %2422 = vmatpush3.bf16.msra.mxu1 %v1235_v25 }
 0x332   : > { %v997_v28 = vpack.c.bf16 %v969_v27, %v969_v27  ;;  %2418 = vmatmul.mubr.msk.bf16.vlgmr.msra.gmra.mxu0 %vm999_vm3, %v987_v24  ;;  %2433 = vmatprep.subr.bf16.mxu1 %v2945_v7 }
 0x333   : > { %2429 = vmatprep.mubr.msk.bf16.mxu0 %vm2946_vm1, %v2945_v7 }
 0x334   : > { %v1281_v29 = vsel %vm1003_vm2, %v997_v28, 0  ;;  %2424 = vmatmul.mubr.msk.bf16.vlgmr.msra.gmra.mxu1 %vm999_vm3, %v988_v26 }
 0x335   : > { %v970_v30 = vpop.trf.xlu1  ;;  %2428 = vmatpush3.bf16.msra.mxu0 %v1281_v29  ;;  %2435 = vmatprep.mubr.msk.bf16.mxu1 %vm2946_vm1, %v2945_v7 }
 0x336   : > { %v998_v32 = vpack.c.bf16 %v970_v30, %v970_v30  ;;  %2439 = vmatprep.subr.bf16.mxu0 %v2945_v7 }
 0x338   : > { %v1327_v34 = vsel %vm1003_vm2, %v998_v32, 0 }
 0x339   : > { %v3326_v36 = vpop.trf.xlu1  ;;  %2434 = vmatpush3.bf16.msra.mxu1 %v1327_v34 }
 0x33a   : > { %2445 = vmatprep.subr.bf16.mxu1 %v2945_v7 }
 0x33c   : > { %2436 = vmatmul.mubr.msk.bf16.vlgmr.msra.gmra.mxu1 %vm999_vm3, %v990_v35 }
 0x33d   : > { %v3331_v38 = vpop.trf.xlu1  ;;  %2446 = vmatpush3.bf16.xpose.msra.mxu1 %v1546_v37  ;;  %2447 = vmatprep.mubr.msk.bf16.mxu1 %vm2946_vm1, %v2945_v7 }
 0x33e   : > { %2457 = vmatprep.subr.bf16.mxu1 %v2945_v7 }
 0x341   : > { %v3336_v39 = vpop.trf.xlu1 }
 0x345   : > { %v3338_v40 = vpop.trf.xlu1 }
 0x349   : > { %v871_v42 = vpop.trf.xlu1 }
 0x34a   : > { %v989_v43 = vpack.c.bf16 %v871_v42, %v871_v42 }
 0x34c   : > { %2430 = vmatmul.mubr.msk.bf16.vlgmr.msra.gmra.mxu0 %vm999_vm3, %v989_v43 }
 0x34d   : > { %2440 = vmatpush3.bf16.xpose.msra.mxu0 %v1500_v44  ;;  %2441 = vmatprep.mubr.msk.bf16.mxu0 %vm2946_vm1, %v2945_v7 }
 0x34e   : > { %2451 = vmatprep.subr.bf16.mxu0 %v2945_v7 }
 0x3e2   : > { %v1041_v46 = vpop.f32.mrf.mxu0  ;;  %v1087_v47 = vpop.f32.mrf.mxu1 }
 0x3e3   : > { %v1383_v48 = vadd.f32 %v2296_v45, %v1041_v46  ;;  %v1384_v49 = vadd.f32 %v2296_v45, %v1087_v47 }
 0x3e4   : > { %v2395_v50 = vpop.f32.mrf.mxu0  ;;  %v2401_v51 = vpop.f32.mrf.mxu1 }
 0x3e5   : > { %v1395_v52 = vsel %vm1391_vm4, %v1384_v49, -inf  ;;  %v1392_v53 = vsel %vm1391_vm4, %v1383_v48, -inf }
 0x3e6   : > { %1396 = vmax.xlane.f32.xlu1 %v1395_v52  ;;  %v1090_v54 = vpop.f32.mrf.mxu1  ;;  %1393 = vmax.xlane.f32.xlu0 %v1392_v53  ;;  %v1044_v55 = vpop.f32.mrf.mxu0 }
 0x3e8   : > { %v2396_v56 = vpop.f32.mrf.mxu0  ;;  %v2402_v57 = vpop.f32.mrf.mxu1 }
 0x3ea   : > { %v1133_v58 = vpop.f32.mrf.mxu0  ;;  %v1179_v59 = vpop.f32.mrf.mxu1 }
 0x3eb   : > { %v1385_v60 = vadd.f32 %v2296_v45, %v1133_v58  ;;  %v1386_v2 = vadd.f32 %v2296_v45, %v1179_v59 }
 0x3ec   : > { %v2407_v62 = vpop.f32.mrf.mxu0  ;;  %v2413_v63 = vpop.f32.mrf.mxu1 }
 0x3ed   : > { %v1398_v3 = vsel %vm1391_vm4, %v1385_v60, -inf  ;;  %v1401_v11 = vsel %vm1391_vm4, %v1386_v2, -inf }
 0x3ee   : > { %v1182_v4 = vpop.f32.mrf.mxu1  ;;  %1399 = vmax.xlane.f32.xlu0 %v1398_v3  ;;  %v1136_v6 = vpop.f32.mrf.mxu0 }
 0x3f0   : > { %v2408_v8 = vpop.f32.mrf.mxu0  ;;  %v2414_v9 = vpop.f32.mrf.mxu1 }
 0x3f2   : > { %1402 = vmax.xlane.f32.xlu0 %v1401_v11  ;;  %v1225_v12 = vpop.f32.mrf.mxu0 }
 0x3f3   : > { %v1387_v13 = vadd.f32 %v2297_v10, %v1225_v12 }
 0x3f4   : > { %v1271_v14 = vpop.f32.mrf.mxu1  ;;  %v2419_v15 = vpop.f32.mrf.mxu0 }
 0x3f5   : > { %v1388_v16 = vadd.f32 %v2297_v10, %v1271_v14  ;;  %v1404_v17 = vsel %vm1391_vm4, %v1387_v13, -inf }
 0x3f6   : > { %v2425_v18 = vpop.f32.mrf.mxu1  ;;  %1405 = vmax.xlane.f32.xlu0 %v1404_v17  ;;  %v1228_v19 = vpop.f32.mrf.mxu0 }
 0x3f7   : > { %v1407_v20 = vsel %vm1391_vm4, %v1388_v16, -inf }
 0x3f8   : > { %v1274_v21 = vpop.f32.mrf.mxu1  ;;  %v2420_v22 = vpop.f32.mrf.mxu0 }
 0x3fa   : > { %v2426_v23 = vpop.f32.mrf.mxu1  ;;  %1408 = vmax.xlane.f32.xlu0 %v1407_v20 }
 0x3fc   : > { %v1363_v24 = vpop.f32.mrf.mxu1 }
 0x3fd   : > { %v1390_v25 = vadd.f32 %v2297_v10, %v1363_v24 }
 0x3fe   : > { %v2437_v26 = vpop.f32.mrf.mxu1 }
 0x3ff   : > { %v1413_v27 = vsel %vm1391_vm4, %v1390_v25, -inf }
 0x400   : > { %1414 = vmax.xlane.f32.xlu0 %v1413_v27  ;;  %v1366_v28 = vpop.f32.mrf.mxu1  ;;  %v1491_v27 = vpack.c.bf16 %v3293_v5, %v3293_v5 }
 0x402   : > { %v2438_v29 = vpop.f32.mrf.mxu1 }
 0x403   : > { %v1490_v29 = vpack.c.bf16 %v3291_v61, %v3291_v61 }
 0x40c   : > { %v1317_v30 = vpop.f32.mrf.mxu0 }
 0x40d   : > { %v1389_v31 = vadd.f32 %v2297_v10, %v1317_v30 }
 0x40e   : > { %v2431_v32 = vpop.f32.mrf.mxu0 }
 0x40f   : > { %v1410_v33 = vsel %vm1391_vm4, %v1389_v31, -inf }
 0x410   : > { %1411 = vmax.xlane.f32.xlu1 %v1410_v33  ;;  %v1320_v34 = vpop.f32.mrf.mxu0 }
 0x411   : > { %v1638_v34 = vsel %vm1391_vm4, %v1491_v27, 0 }
 0x412   : > { %v2432_v35 = vpop.f32.mrf.mxu0 }
 0x413   : > { %v1592_v35 = vsel %vm1391_vm4, %v1490_v29, 0 }
 0x46f   : > { %v1397_v37 = vpop.xlane.xlu1 %1396  ;;  %v1394_v41 = vpop.xlane.xlu0 %1393 }
 0x470   : > { %v1417_v42 = vsub.f32 %v1384_v49, %v1397_v37  ;;  %v1416_v43 = vsub.f32 %v1383_v48, %v1394_v41  ;;  %v1492_v41 = vpack.c.bf16 %v3326_v36, %v3326_v36 }
 0x472   : > { %v1426_v44 = vmul.f32 1.442695, %v1417_v42  ;;  %v1424_v45 = vmul.f32 1.442695, %v1416_v43 }
 0x474   : > { %2661 = vpow2.f32 %v1426_v44 }
 0x475   : > { %2663 = vpow2.f32 %v1424_v45  ;;  %v1493_v45 = vpack.c.bf16 %v3331_v38, %v3331_v38 }
 0x477   : > { %v1400_v46 = vpop.xlane.xlu0 %1399  ;;  %v1730_v36 = vsel %vm1391_vm4, %v1493_v45, 0 }
 0x478   : > { %v1418_v47 = vsub.f32 %v1385_v60, %v1400_v46 }
 0x47a   : > { %v1428_v50 = vmul.f32 1.442695, %v1418_v47  ;;  %v1684_v47 = vsel %vm1391_vm4, %v1492_v41, 0 }
 0x47b   : > { %v1403_v51 = vpop.xlane.xlu0 %1402 }
 0x47c   : > { %2665 = vpow2.f32 %v1428_v50  ;;  %v1419_v52 = vsub.f32 %v1386_v2, %v1403_v51 }
 0x47e   : > { %v1430_v53 = vmul.f32 1.442695, %v1419_v52  ;;  %v1494_v52 = vpack.c.bf16 %v3336_v39, %v3336_v39 }
 0x47f   : > { %v1406_v54 = vpop.xlane.xlu0 %1405 }
 0x480   : > { %2667 = vpow2.f32 %v1430_v53  ;;  %v1420_v55 = vsub.f32 %v1387_v13, %v1406_v54 }
 0x481   : > { %v2662_v56 = vpop.eup %2661 }
 0x482   : > { %v2664_v57 = vpop.eup %2663  ;;  %v1432_v58 = vmul.f32 1.442695, %v1420_v55  ;;  %v1443_v49 = vsel %vm1391_vm4, %v2662_v56, 0.0  ;;  %v1495_v55 = vpack.c.bf16 %v3338_v40, %v3338_v40 }
 0x483   : > { %1444 = vadd.xlane.f32.xlu0 %v1443_v49  ;;  %v1409_v48 = vpop.xlane.xlu0 %1408  ;;  %v1440_v59 = vsel %vm1391_vm4, %v2664_v57, 0.0 }
 0x484   : > { %2669 = vpow2.f32 %v1432_v58  ;;  %v1421_v62 = vsub.f32 %v1388_v16, %v1409_v48  ;;  %1441 = vadd.xlane.f32.xlu1 %v1440_v59  ;;  %v1822_v39 = vsel %vm1391_vm4, %v1495_v55, 0 }
 0x486   : > { %v1434_v60 = vmul.f32 1.442695, %v1421_v62 }
 0x488   : > { %2671 = vpow2.f32 %v1434_v60 }
 0x489   : > { %v2666_v63 = vpop.eup %2665  ;;  %v1415_v2 = vpop.xlane.xlu0 %1414 }
 0x48a   : > { %v1423_v3 = vsub.f32 %v1390_v25, %v1415_v2  ;;  %v1446_v4 = vsel %vm1391_vm4, %v2666_v63, 0.0  ;;  %v1872_v2 = vld [vmem:[#allocation11] sm:$0xf] }
 0x48b   : > { %1447 = vadd.xlane.f32.xlu1 %v1446_v4  ;;  %v1874_v4 = vld [vmem:[#allocation11 + $0x4] sm:$0xf] }
 0x48c   : > { %v1438_v6 = vmul.f32 1.442695, %v1423_v3  ;;  %v1936_v3 = vsel %vm1003_vm2, %v1872_v2, 0 }
 0x48d   : > { %v2668_v8 = vpop.eup %2667 }
 0x48e   : > { %2673 = vpow2.f32 %v1438_v6  ;;  %v1449_v9 = vsel %vm1391_vm4, %v2668_v8, 0.0  ;;  %v1884_v6 = vsel %vm1003_vm2, %v1874_v4, 0 }
 0x48f   : > { %1450 = vadd.xlane.f32.xlu0 %v1449_v9 }
 0x491   : > { %v3361_v10 = vpop.eup %2669 }
 0x492   : > { %v1452_v11 = vsel %vm1391_vm4, %v3361_v10, 0.0 }
 0x493   : > { %1453 = vadd.xlane.f32.xlu1 %v1452_v11 }
 0x495   : > { %v3365_v12 = vpop.eup %2671 }
 0x496   : > { %v1455_v13 = vsel %vm1391_vm4, %v3365_v12, 0.0 }
 0x497   : > { %1456 = vadd.xlane.f32.xlu0 %v1455_v13 }
 0x499   : > { %v1412_v14 = vpop.xlane.xlu1 %1411 }
 0x49a   : > { %v1422_v15 = vsub.f32 %v1389_v31, %v1412_v14 }
 0x49b   : > { %v3369_v16 = vpop.eup %2673 }
 0x49c   : > { %v1436_v17 = vmul.f32 1.442695, %v1422_v15  ;;  %v1461_v18 = vsel %vm1391_vm4, %v3369_v16, 0.0 }
 0x49d   : > { %1462 = vadd.xlane.f32.xlu0 %v1461_v18 }
 0x49e   : > { %2675 = vpow2.f32 %v1436_v17 }
 0x4ab   : > { %v3373_v19 = vpop.eup %2675 }
 0x4ac   : > { %v1458_v20 = vsel %vm1391_vm4, %v3373_v19, 0.0 }
 0x4ad   : > { %1459 = vadd.xlane.f32.xlu1 %v1458_v20 }
 0x50c   : > { %v1445_v21 = vpop.xlane.xlu0 %1444 }
 0x50d   : > { %2677 = vrcp.f32 %v1445_v21  ;;  %v1442_v22 = vpop.xlane.xlu1 %1441 }
 0x50e   : > { %2679 = vrcp.f32 %v1442_v22  ;;  %v2036_v22 = vld [vmem:[#allocation11 + $0xc] sm:$0xf] }
 0x50f   : > { %v2046_v27 = vsel %vm1003_vm2, %v2036_v22, 0 }
 0x514   : > { %v1448_v23 = vpop.xlane.xlu1 %1447 }
 0x515   : > { %2681 = vrcp.f32 %v1448_v23 }
 0x518   : > { %v1451_v24 = vpop.xlane.xlu0 %1450 }
 0x519   : > { %2683 = vrcp.f32 %v1451_v24 }
 0x51a   : > { %v2678_v25 = vpop.eup %2677 }
 0x51b   : > { %v2680_v26 = vpop.eup %2679  ;;  %v1473_v28 = vmul.f32 %v2678_v25, %v2662_v56 }
 0x51c   : > { %v1454_v30 = vpop.xlane.xlu1 %1453  ;;  %v1472_v31 = vmul.f32 %v2680_v26, %v2664_v57  ;;  %v1776_v57 = vsel %vm1391_vm4, %v1494_v52, 0 }
 0x51d   : > { %2685 = vrcp.f32 %v1454_v30  ;;  %v1481_v32 = vpack.c.bf16 %v1473_v28, %v1473_v28  ;;  %v1980_v28 = vld [vmem:[#allocation11 + $0x8] sm:$0xf] }
 0x51e   : > { %v1480_v33 = vpack.c.bf16 %v1472_v31, %v1472_v31 }
 0x51f   : > { %2448 = vmatmul.mubr.msk.bf16.vlgmr.msra.gmra.mxu1 %vm1391_vm4, %v1481_v32 }
 0x520   : > { %2442 = vmatmul.mubr.msk.bf16.vlgmr.msra.gmra.mxu0 %vm1391_vm4, %v1480_v33  ;;  %2458 = vmatpush3.bf16.xpose.msra.mxu1 %v1638_v34  ;;  %v1457_v37 = vpop.xlane.xlu0 %1456  ;;  %v1990_v33 = vsel %vm1003_vm2, %v1980_v28, 0 }
 0x521   : > { %2452 = vmatpush3.bf16.xpose.msra.mxu0 %v1592_v35  ;;  %2687 = vrcp.f32 %v1457_v37  ;;  %2453 = vmatprep.mubr.msk.bf16.mxu0 %vm2946_vm1, %v2945_v7 }
 0x522   : > { %v2682_v61 = vpop.eup %2681  ;;  %2463 = vmatprep.subr.bf16.mxu0 %v2945_v7  ;;  %2459 = vmatprep.mubr.msk.bf16.mxu1 %vm2946_vm1, %v2945_v7 }
 0x523   : > { %v1474_v5 = vmul.f32 %v2682_v61, %v2666_v63  ;;  %2469 = vmatprep.subr.bf16.mxu1 %v2945_v7 }
 0x525   : > { %v1482_v42 = vpack.c.bf16 %v1474_v5, %v1474_v5 }
 0x526   : > { %v2684_v43 = vpop.eup %2683  ;;  %v1463_v44 = vpop.xlane.xlu0 %1462 }
 0x527   : > { %2689 = vrcp.f32 %v1463_v44  ;;  %v1475_v46 = vmul.f32 %v2684_v43, %v2668_v8 }
 0x528   : > { %2454 = vmatmul.mubr.msk.bf16.vlgmr.msra.gmra.mxu0 %vm1391_vm4, %v1482_v42 }
 0x529   : > { %2464 = vmatpush3.bf16.xpose.msra.mxu0 %v1684_v47  ;;  %v1483_v50 = vpack.c.bf16 %v1475_v46, %v1475_v46  ;;  %2465 = vmatprep.mubr.msk.bf16.mxu0 %vm2946_vm1, %v2945_v7 }
 0x52a   : > { %v2686_v51 = vpop.eup %2685  ;;  %2475 = vmatprep.subr.bf16.mxu0 %v2945_v7 }
 0x52b   : > { %2460 = vmatmul.mubr.msk.bf16.vlgmr.msra.gmra.mxu1 %vm1391_vm4, %v1483_v50  ;;  %v1476_v38 = vmul.f32 %v2686_v51, %v3361_v10 }
 0x52c   : > { %2470 = vmatpush3.bf16.xpose.msra.mxu1 %v1730_v36  ;;  %2471 = vmatprep.mubr.msk.bf16.mxu1 %vm2946_vm1, %v2945_v7 }
 0x52d   : > { %v1484_v53 = vpack.c.bf16 %v1476_v38, %v1476_v38  ;;  %2481 = vmatprep.subr.bf16.mxu1 %v2945_v7 }
 0x52e   : > { %v2688_v54 = vpop.eup %2687 }
 0x52f   : > { %v1477_v56 = vmul.f32 %v2688_v54, %v3365_v12 }
 0x530   : > { %2466 = vmatmul.mubr.msk.bf16.vlgmr.msra.gmra.mxu0 %vm1391_vm4, %v1484_v53 }
 0x531   : > { %2476 = vmatpush3.bf16.xpose.msra.mxu0 %v1776_v57  ;;  %v1485_v58 = vpack.c.bf16 %v1477_v56, %v1477_v56  ;;  %2477 = vmatprep.mubr.msk.bf16.mxu0 %vm2946_vm1, %v2945_v7 }
 0x532   : > { %2487 = vmatprep.subr.bf16.mxu0 %v2945_v7 }
 0x533   : > { %2472 = vmatmul.mubr.msk.bf16.vlgmr.msra.gmra.mxu1 %vm1391_vm4, %v1485_v58 }
 0x534   : > { %v2690_v49 = vpop.eup %2689  ;;  %2482 = vmatpush3.bf16.xpose.msra.mxu1 %v1822_v39  ;;  %2483 = vmatprep.mubr.msk.bf16.mxu1 %vm2946_vm1, %v2945_v7 }
 0x535   : > { %v1479_v40 = vmul.f32 %v2690_v49, %v3369_v16  ;;  %2493 = vmatprep.subr.bf16.mxu1 %v2945_v7 }
 0x536   : > { %v1460_v48 = vpop.xlane.xlu1 %1459 }
 0x537   : > { %2691 = vrcp.f32 %v1460_v48  ;;  %v1487_v59 = vpack.c.bf16 %v1479_v40, %v1479_v40 }
 0x53b   : > { %2484 = vmatmul.mubr.msk.bf16.vlgmr.msra.gmra.mxu1 %vm1391_vm4, %v1487_v59 }
 0x53c   : > { %2495 = vmatprep.mubr.msk.bf16.mxu1 %vm2946_vm1, %v2945_v7  ;;  %2494 = vmatpush3.bf16.msra.mxu1 %v1936_v3 }
 0x53d   : > { %2505 = vmatprep.subr.bf16.mxu1 %v2945_v7 }
 0x544   : > { %v2692_v62 = vpop.eup %2691 }
 0x545   : > { %v1478_v60 = vmul.f32 %v2692_v62, %v3373_v19 }
 0x547   : > { %v1486_v63 = vpack.c.bf16 %v1478_v60, %v1478_v60 }
 0x549   : > { %2478 = vmatmul.mubr.msk.bf16.vlgmr.msra.gmra.mxu0 %vm1391_vm4, %v1486_v63 }
 0x54a   : > { %2489 = vmatprep.mubr.msk.bf16.mxu0 %vm2946_vm1, %v2945_v7  ;;  %2488 = vmatpush3.bf16.msra.mxu0 %v1884_v6 }
 0x54b   : > { %2499 = vmatprep.subr.bf16.mxu0 %v2945_v7 }
 0x5df   : > { %v1582_v8 = vpop.f32.mrf.mxu1 }
 0x5e0   : > { %v1536_v9 = vpop.f32.mrf.mxu0 }
 0x5e1   : > { %v2449_v10 = vpop.f32.mrf.mxu1 }
 0x5e2   : > { %v2443_v11 = vpop.f32.mrf.mxu0 }
 0x5e3   : > { %v1585_v12 = vpop.f32.mrf.mxu1 }
 0x5e4   : > { %v1539_v13 = vpop.f32.mrf.mxu0 }
 0x5e5   : > { %v2450_v14 = vpop.f32.mrf.mxu1 }
 0x5e6   : > { %v2444_v15 = vpop.f32.mrf.mxu0 }
 0x5e8   : > { %v1628_v16 = vpop.f32.mrf.mxu0 }
 0x5ea   : > { %v2455_v17 = vpop.f32.mrf.mxu0 }
 0x5eb   : > { %v1674_v18 = vpop.f32.mrf.mxu1 }
 0x5ec   : > { %v1631_v19 = vpop.f32.mrf.mxu0 }
 0x5ed   : > { %v2461_v20 = vpop.f32.mrf.mxu1 }
 0x5ee   : > { %v2456_v21 = vpop.f32.mrf.mxu0 }
 0x5ef   : > { %v1677_v23 = vpop.f32.mrf.mxu1 }
 0x5f0   : > { %v1720_v24 = vpop.f32.mrf.mxu0 }
 0x5f1   : > { %v2324_v25 = vpack.c.bf16 %v1720_v24, %v1536_v9  ;;  %v2462_v26 = vpop.f32.mrf.mxu1 }
 0x5f2   : > { %v2467_v29 = vpop.f32.mrf.mxu0 }
 0x5f3   : > { %2496 = vmatmul.mubr.msk.bf16.vlgmr.msra.gmra.mxu1 %vm999_vm3, %v2324_v25  ;;  %v1766_v30 = vpop.f32.mrf.mxu1 }
 0x5f4   : > { %v1723_v31 = vpop.f32.mrf.mxu0  ;;  %v2323_v32 = vpack.c.bf16 %v1766_v30, %v1582_v8  ;;  %2506 = vmatpush3.bf16.msra.mxu1 %v2046_v27  ;;  %2507 = vmatprep.mubr.msk.bf16.mxu1 %vm2946_vm1, %v2945_v7 }
 0x5f5   : > { %v2473_v34 = vpop.f32.mrf.mxu1 }
 0x5f6   : > { %v2468_v35 = vpop.f32.mrf.mxu0  ;;  %2490 = vmatmul.mubr.msk.bf16.vlgmr.msra.gmra.mxu0 %vm999_vm3, %v2323_v32 }
 0x5f7   : > { %v1769_v37 = vpop.f32.mrf.mxu1  ;;  %2500 = vmatpush3.bf16.msra.mxu0 %v1990_v33  ;;  %2501 = vmatprep.mubr.msk.bf16.mxu0 %vm2946_vm1, %v2945_v7 }
 0x5f9   : > { %v2474_v61 = vpop.f32.mrf.mxu1 }
 0x5fb   : > { %v1858_v5 = vpop.f32.mrf.mxu1 }
 0x5fc   : > { %v2326_v41 = vpack.c.bf16 %v1858_v5, %v1674_v18 }
 0x5fd   : > { %v2485_v42 = vpop.f32.mrf.mxu1 }
 0x5fe   : > { %2508 = vmatmul.mubr.msk.bf16.vlgmr.msra.gmra.mxu1 %vm999_vm3, %v2326_v41 }
 0x5ff   : > { %v1861_v43 = vpop.f32.mrf.mxu1 }
 0x601   : > { %v2486_v44 = vpop.f32.mrf.mxu1 }
 0x609   : > { %v1812_v45 = vpop.f32.mrf.mxu0 }
 0x60a   : > { %v2325_v46 = vpack.c.bf16 %v1812_v45, %v1628_v16 }
 0x60b   : > { %v2479_v47 = vpop.f32.mrf.mxu0 }
 0x60c   : > { %2502 = vmatmul.mubr.msk.bf16.vlgmr.msra.gmra.mxu0 %vm999_vm3, %v2325_v46 }
 0x60d   : > { %v1815_v50 = vpop.f32.mrf.mxu0 }
 0x60f   : > { %v2480_v51 = vpop.f32.mrf.mxu0 }
 0x6b3   : > { %v1972_v36 = vpop.f32.mrf.mxu1 }
 0x6b5   : > { %v2497_v38 = vpop.f32.mrf.mxu1 }
 0x6b6   : > { %v1920_v52 = vpop.f32.mrf.mxu0 }
 0x6b7   : > { %v1975_v53 = vpop.f32.mrf.mxu1  ;;  %v1973_v40 = vadd.f32 %v1972_v36, %v1920_v52 }
 0x6b8   : > { %v2491_v7 = vpop.f32.mrf.mxu0 }
 0x6b9   : > { %v2498_v54 = vpop.f32.mrf.mxu1 }
 0x6ba   : > { %v1923_v55 = vpop.f32.mrf.mxu0 }
 0x6bb   : > { %v1976_v60 = vadd.f32 %v1975_v53, %v1923_v55 }
 0x6bc   : > { %v2492_v56 = vpop.f32.mrf.mxu0 }
 0x6be   : > { %v2082_v57 = vpop.f32.mrf.mxu1 }
 0x6c0   : > { %v2509_v58 = vpop.f32.mrf.mxu1 }
 0x6c2   : > { %v2085_v39 = vpop.f32.mrf.mxu1 }
 0x6c4   : > { %v2510_v49 = vpop.f32.mrf.mxu1 }
 0x6cc   : > { %v2026_v48 = vpop.f32.mrf.mxu0 }
 0x6cd   : > { %v2033_v59 = vadd.f32 %v2026_v48, %v1973_v40 }
 0x6ce   : > { %v2503_v62 = vpop.f32.mrf.mxu0 }
 0x6cf   : > { %v2089_v63 = vadd.f32 %v2082_v57, %v2033_v59 }
 0x6d0   : > { %v2029_v2 = vpop.f32.mrf.mxu0 }
 0x6d1   : > { %v2091_v3 = vadd.f32 %v2089_v63, %v3251_v0  ;;  %v2034_v4 = vadd.f32 %v2029_v2, %v1976_v60 }
 0x6d2   : > { %v2504_v6 = vpop.f32.mrf.mxu0 }
 0x6d3   : > { %2093 = vst.msk [vmem:[%s418_s30] sm:$0xff] %vm429_vm0, %v2091_v3  ;;  %v2090_v8 = vadd.f32 %v2085_v39, %v2034_v4 }
 0x6d5   : > { %v2092_v0 = vadd.f32 %v2090_v8, %v3253_v1 }
 0x6d7   : > { %2094 = vst.msk [vmem:[%s418_s30 + $0x8] sm:$0xff] %vm429_vm0, %v2092_v0 }
 0x6d8   : > { %2868 = shalt.err (!%p2865_p10)
}
 0x6d9   : > { %s2869_s19 = scalar_lea.hbm %s3450_s23, 256  ;;  %s2873_s11 = scalar_lea.hbm %s3504_s7, 512 }
 0x6da   : > { %p2870_p11 = scmp.ne.s32.totalorder %s3450_s23, %s2869_s19  ;;  %p2874_p5 = scmp.lt.s32.totalorder %s3450_s23, %s3504_s7 }
 0x6db   : > { %p2875_p12 = scmp.lt.s32.totalorder %s2873_s11, %s2869_s19 }
 0x6dc   : > { %p2871_p1 = pnand %p2870_p11, %p3549_p2 }
 0x6dd   : > { %p2876_p0 = por %p2875_p12, %p2874_p5 }
 0x6de   : > { %p2872_p4 = pneg %p2871_p1 }
 0x6e0   : > { %p2877_p13 = pnand %p2876_p0, %p2872_p4 }
 0x6e2   : > { %2880 = shalt.err (!%p2877_p13)
}
 0x6e3   : > { %s2948_s12 = smov 128   ;;  %s2949_s21 = smov 8  }
 0x6e4   : > { %2529 = dma.vmem_to_hbm [thread:$0]  (%p3549_p2), %s3452_s9, 256, %s3450_s23, %s2096_s28, %s2948_s12, %s2948_s12, %s2949_s21  }
 0x6e5 PF: > { %s2124_s20 = sand.u32 1, %s2919_s24   ;;  %p3550_p7 = scmp.ne.s32.totalorder %s3528_s14, 0 }
 0x6e6   : > { %p3551_p3 = scmp.ge.s32.totalorder %s2931_s27, 2  ;;  %s2125_s30 = scalar_lea.sflag [#allocation4], %s2124_s20 }
 0x6e8   : > { %p2552_p8 = pnand %p3551_p3, %p3550_p7 }
 0x6ea   : > { %p2553_p9 = pneg %p2552_p8 }
 0x6ec   : > { %2914 = dma.done.wait (%p2553_p9), %s2125_s30, 256  }
 0x6ed   : > { %2916 = vsyncadd (%p2553_p9), %s2125_s30, 4294967040  ;;  %s3552_s27 = sld [smem:[#allocation20_spill]]  ;;  %s3555_s24 = smov %s2923_s25 }
 0x6ee   : > { %s3553_s8 = sld [smem:[#allocation19_spill]] }
 0x6ef   : > { %s3554_s26 = sld [smem:[#allocation21_spill]] }
 0x6f3   : > { %p25_p6 = scmp.ge.s32.totalorder %s3552_s27, 4  }
 0x6f4   : > { %s3556_s25 = smov %s3553_s8 }
 0x6f5   :  { %27 = sbr.rel (!%p25_p6) target bundleno = 12 (0xc), region = 132 }
 0x6fa   :  { %2130 = vsyncpa [#allocation3], 1 }
 0x6fb   :  { %2132 = vsyncpa [#allocation3 + $0x1], 1 }
 0x6fc   :  { %2133 = vsyncpa [#allocation6], 1 }
 0x6fd   :  { %2135 = vsyncpa [#allocation6 + $0x1], 1 }
 0x6fe   :  { %2136 = vsyncpa [#allocation9], 1 }
 0x6ff   :  { %2137 = vsyncpa [#allocation12], 1 }
 0x700   :  { %2138 = vsyncpa [#allocation4], 1 }
 0x701   :  { %2140 = vsyncpa [#allocation4 + $0x1], 1 }

// kernel: tpu_custom_call.1
= control target key start
LH: loop header
LB: loop body
LE: loop exit
PB: predicated region body
PF: predicated region fallthrough
CT: control target
= control target key end

     0   :  { %s3497_s0 = inlined_call_operand.hbm [shape: f32[4,8,32], index: 0, kind: input, shape index: {}]   ;;  %s3498_s1 = inlined_call_operand.hbm [shape: bf16[4,16,32], index: 1, kind: input, shape index: {}]   ;;  %s3499_s2 = inlined_call_operand.hbm [shape: f32[4,1,16], index: 2, kind: input, shape index: {}]   ;;  %s3500_s3 = inlined_call_operand.vmem [shape: f32[1,32], index: 3, kind: input, shape index: {}]   ;;  %s3501_s4 = inlined_call_operand.hbm [shape: bf16[32,32], index: 4, kind: input, shape index: {}]   ;;  %s3502_s5 = inlined_call_operand.hbm [shape: bf16[32,64], index: 5, kind: input, shape index: {}]   ;;  %s3503_s6 = inlined_call_operand.hbm [shape: bf16[4,8,32], index: 6, kind: input, shape index: {}]   ;;  %s3504_s7 = inlined_call_operand.hbm [shape: f32[4,8,32], index: 7, kind: output, shape index: {}]  }
   0x1   :  { %3520 = sst [smem:[#allocation22_spill]] %s3497_s0 }
   0x2   :  { %3521 = sst [smem:[#allocation23_spill]] %s3498_s1 }
   0x3   :  { %12 = vsyncpa [#allocation3], 0 }
   0x4   :  { %14 = vsyncpa [#allocation3 + $0x1], 0 }
   0x5   :  { %15 = vsyncpa [#allocation6], 0 }
   0x6   :  { %17 = vsyncpa [#allocation6 + $0x1], 0 }
   0x7   :  { %18 = vsyncpa [#allocation9], 0 }
   0x8   :  { %19 = vsyncpa [#allocation12], 0 }
   0x9   :  { %20 = vsyncpa [#allocation4], 0 }
   0xa   :  { %22 = vsyncpa [#allocation4 + $0x1], 0  ;;  %s2990_s24 = smov 0   ;;  %s2992_s25 = smov 0  }
   0xb   :  { %s2994_s26 = smov 0   ;;  %s2996_s27 = smov 0  }
   0xc LB: > { %3522 = sst [smem:[#allocation19_spill]] %s2927_s26  ;;  %s3011_s28 = sadd.s32 4294967295, %s2931_s27   ;;  %s2931_s27 = sphi %s2996_s27, %s3552_s27   ;;  %s2927_s26 = sphi %s2994_s26, %s3554_s26   ;;  %s2923_s25 = sphi %s2992_s25, %s3556_s25   ;;  %s2919_s24 = sphi %s2990_s24, %s3555_s24  }
   0xd   : > { %s2254_s29 = sadd.s32 4294967294, %s2931_s27   ;;  %s3015_s30 = sadd.s32 1, %s2931_s27  }
   0xe   : > { %3523 = sst [smem:[#allocation20_spill]] %s3015_s30  ;;  %s35_s8 = sadd.s32 1, %s2927_s26 }
   0xf   : > { %s32_s9 = ssub.s32 %s2931_s27, %s3015_s30  ;;  %p42_p0 = scmp.ne.s32.totalorder %s2927_s26, %s2923_s25 }
  0x10   : > { %p33_p1 = scmp.eq.s32.totalorder %s32_s9, 0  ;;  %p43_p2 = scmp.eq.s32.totalorder %s2931_s27, 0 }
  0x11   : > { %p48_p3 = scmp.ne.s32.totalorder %s2923_s25, %s2919_s24  ;;  %p3505_p4 = scmp.eq.s32.totalorder %s3011_s28, 0 }
  0x12   : > { %s3027_s10 = scalar_select %p33_p1, %s2927_s26, %s35_s8  }
  0x13   : > { %p3029_p5 = por %p43_p2, %p42_p0  ;;  %p3035_p6 = por %p3505_p4, %p48_p3 }
  0x14   : > { %3524 = sst [smem:[#allocation21_spill]] %s3027_s10  ;;  %p208_p7 = scmp.eq.s32.totalorder %s3011_s28, 1 }
  0x15   : > { %s3526_s12 = scalar_select %p3035_p6, 1, 0 }
  0x16   : > { %p214_p8 = scmp.eq.s32.totalorder %s2254_s29, 1  ;;  %p2255_p9 = scmp.ge.s32.totalorder %s2931_s27, 1 }
  0x17   : > { %p221_p10 = scmp.lt.s32.totalorder %s2931_s27, 3  ;;  %p3042_p11 = por %p208_p7, %p42_p0 }
  0x18   : > { %p3046_p12 = por %p214_p8, %p48_p3  ;;  %s2933_s16 = smov [#allocation8]  }
  0x19   : > { %s3527_s13 = scalar_select %p3042_p11, 1, 0 }
  0x1a   : > { %s3528_s14 = scalar_select %p3046_p12, 1, 0 }
  0x1b   : > { %p3050_p13 = pnand %p2255_p9, %p221_p10  ;;  %s236_s17 = sshll.u32 %s2933_s16, 4  ;;  %s237_s17 = int_to_ptr.vmem [resolvable:$true] %s236_s17 }
  0x1c   : > { %p2558_p3 = scmp.lt.s32.totalorder %s2931_s27, 2  ;;  %s3065_s19 = sand.u32 1, %s2927_s26  }
  0x1d   : > { %s3529_s15 = scalar_select %p3050_p13, 1, 0 }
  0x1e   : > { %p2531_p1 = pneg %p3050_p13  ;;  %s2704_s21 = scalar_lea.vmem %s237_s17, 256 }
  0x1f   : > { %p2705_p8 = scmp.ne.s32.totalorder %s237_s17, %s2704_s21 }
  0x20   : > { %p3058_p2 = pnand %p2531_p1, %p3505_p4  ;;  %p2712_p1 = scmp.lt.s32.totalorder %s237_s17, %s237_s17 }
  0x21   : > { %p2713_p4 = scmp.lt.s32.totalorder %s2704_s21, %s2704_s21 }
  0x22   : > { %s3530_s18 = scalar_select %p3058_p2, 1, 0 }
  0x23   : > { %p3515_p7 = pneg %p3058_p2  ;;  %p2714_p12 = por %p2713_p4, %p2712_p1 }
  0x25   : > { %p2707_p9 = pnand %p2705_p8, %p3515_p7 }
  0x27   : > { %p2708_p10 = pneg %p2707_p9 }
  0x29   : > { %p2715_p11 = pnand %p2714_p12, %p2708_p10 }
  0x2b   : > { %2718 = shalt.err (!%p2715_p11)
}
  0x2c   : > { %s3510_s22 = smov 64   ;;  %s3513_s23 = smov 4  }
  0x2d   : > { %2534 = dma.hbm_to_vmem [thread:$0]  (!%p3058_p2), %s3501_s4, 256, %s237_s17, [#allocation9], %s3510_s22, %s3510_s22, %s3513_s23  }
  0x2e   : > { %s3512_s9 = sshll.u32 %s2931_s27, 8  ;;  %p3086_p4 = pnand %p2558_p3, %p3029_p5 }
  0x2f   : > { %s297_s21 = sand.u32 1, %s2931_s27   ;;  %s3532_s1 = sld [smem:[#allocation23_spill]] }
  0x30   : > { %s3533_s30 = sshll.u32 %s3065_s19, 4  ;;  %s3102_s11 = scalar_lea.sflag [#allocation6], %s297_s21 }
  0x31   : > { %s301_s17 = scalar_lea.vmem [#allocation5], %s3533_s30  ;;  %p3108_p11 = pneg %p3086_p4 }
  0x32   : > { %s309_s29 = sshll.u32 %s301_s17, 4  ;;  %s3100_s29 = int_to_ptr.vmem [resolvable:$true] %s309_s29 }
  0x35   : > { %s3096_s26 = scalar_lea.hbm %s3532_s1, %s3512_s9  ;;  %s2724_s30 = scalar_lea.hbm %s3532_s1, 512 }
  0x36   : > { %s2719_s8 = scalar_lea.hbm %s3096_s26, 256  ;;  %p2725_p8 = scmp.lt.s32.totalorder %s3096_s26, %s3532_s1 }
  0x37   : > { %p2720_p5 = scmp.ne.s32.totalorder %s3096_s26, %s2719_s8  ;;  %p2726_p9 = scmp.lt.s32.totalorder %s2724_s30, %s2719_s8 }
  0x39   : > { %p2722_p12 = pnand %p3108_p11, %p2720_p5  ;;  %p2727_p10 = por %p2726_p9, %p2725_p8 }
  0x3b   : > { %p2723_p3 = pneg %p2722_p12 }
  0x3d   : > { %p2728_p1 = pnand %p2727_p10, %p2723_p3 }
  0x3f   : > { %2731 = shalt.err (!%p2728_p1)
}
  0x40   : > { %s2732_s21 = scalar_lea.vmem %s3100_s29, 256  ;;  %s2936_s23 = smov [#allocation5]  }
  0x41   : > { %p2733_p0 = scmp.ne.s32.totalorder %s3100_s29, %s2732_s21  ;;  %s2737_s10 = sshll.u32 %s2936_s23, 4  ;;  %s2738_s10 = int_to_ptr.vmem [resolvable:$false] %s2737_s10 }
  0x42   : > { %s2739_s20 = scalar_lea.vmem %s2738_s10, 512  ;;  %p2740_p7 = scmp.lt.s32.totalorder %s3100_s29, %s2738_s10 }
  0x43   : > { %p2735_p5 = pnand %p2733_p0, %p3108_p11  ;;  %p2741_p6 = scmp.lt.s32.totalorder %s2739_s20, %s2732_s21 }
  0x45   : > { %p2736_p12 = pneg %p2735_p5  ;;  %p2742_p13 = por %p2741_p6, %p2740_p7 }
  0x47   : > { %p2743_p2 = pnand %p2742_p13, %p2736_p12 }
  0x49   : > { %2746 = shalt.err (!%p2743_p2)
}
  0x4a   : > { %s3535_s9 = smov 4   ;;  %s3536_s8 = smov 64  }
  0x4b   : > { %2547 = dma.hbm_to_vmem [thread:$0]  (!%p3086_p4), %s3096_s26, 256, %s3100_s29, %s3102_s11, %s3536_s8, %s3536_s8, %s3535_s9  }
  0x4c   : > { %s2937_s30 = smov [#allocation10]   ;;  %s2938_s23 = smov [#allocation11]  }
  0x4d   : > { %s249_s17 = sshll.u32 %s2937_s30, 4  ;;  %s262_s1 = sshll.u32 %s2938_s23, 4  ;;  %s250_s17 = int_to_ptr.vmem [resolvable:$true] %s249_s17  ;;  %s263_s1 = int_to_ptr.vmem [resolvable:$true] %s262_s1 }
  0x4e   : > { %s2758_s10 = scalar_lea.vmem %s250_s17, 256  ;;  %p3537_p6 = scmp.ne.s32.totalorder %s3530_s18, 0 }
  0x4f   : > { %p2759_p0 = scmp.ne.s32.totalorder %s250_s17, %s2758_s10  ;;  %p2766_p3 = scmp.lt.s32.totalorder %s250_s17, %s250_s17 }
  0x50   : > { %p3538_p13 = pneg %p3537_p6  ;;  %p2767_p8 = scmp.lt.s32.totalorder %s2758_s10, %s2758_s10 }
  0x52   : > { %p2761_p2 = pnand %p2759_p0, %p3538_p13  ;;  %p2768_p9 = por %p2767_p8, %p2766_p3 }
  0x54   : > { %p2762_p7 = pneg %p2761_p2 }
  0x56   : > { %p2769_p10 = pnand %p2768_p9, %p2762_p7 }
  0x58   : > { %2772 = shalt.err (!%p2769_p10)
}
  0x59   : > { %2537 = dma.hbm_to_vmem [thread:$0]  (!%p3537_p6), %s3502_s5, 256, %s250_s17, [#allocation9], %s3536_s8, %s3536_s8, %s3535_s9  }
  0x5a   : > { %s2784_s21 = scalar_lea.vmem %s263_s1, 256  ;;  %p3539_p5 = pmov %p3538_p13 }
  0x5b   : > { %p2785_p1 = scmp.ne.s32.totalorder %s263_s1, %s2784_s21  ;;  %p2792_p13 = scmp.lt.s32.totalorder %s263_s1, %s263_s1 }
  0x5c   : > { %p2793_p2 = scmp.lt.s32.totalorder %s2784_s21, %s2784_s21 }
  0x5d   : > { %p2787_p12 = pnand %p2785_p1, %p3539_p5 }
  0x5e   : > { %p2794_p7 = por %p2793_p2, %p2792_p13 }
  0x5f   : > { %p2788_p0 = pneg %p2787_p12 }
  0x61   : > { %p2795_p3 = pnand %p2794_p7, %p2788_p0 }
  0x63   : > { %2798 = shalt.err (!%p2795_p3)
}
  0x64   : > { %2540 = dma.hbm_to_vmem [thread:$0]  (!%p3537_p6), %s3503_s6, 256, %s263_s1, [#allocation12], %s3536_s8, %s3536_s8, %s3535_s9  }
  0x65   : > { %s3540_s17 = sshll.u32 %s2931_s27, 8  ;;  %s3541_s0 = sld [smem:[#allocation22_spill]] }
  0x66   : > { %s3542_s29 = sshll.u32 %s3065_s19, 4  ;;  %s277_s20 = scalar_lea.sflag [#allocation3], %s3065_s19 }
  0x67   : > { %s280_s18 = scalar_lea.vmem [#allocation2], %s3542_s29 }
  0x68   : > { %s287_s21 = sshll.u32 %s280_s18, 4  ;;  %s3165_s21 = int_to_ptr.vmem [resolvable:$true] %s287_s21 }
  0x6b   : > { %s3161_s26 = scalar_lea.hbm %s3541_s0, %s3540_s17  ;;  %s2804_s8 = scalar_lea.hbm %s3541_s0, 512 }
  0x6c   : > { %s2799_s30 = scalar_lea.hbm %s3161_s26, 256  ;;  %p2805_p10 = scmp.lt.s32.totalorder %s3161_s26, %s3541_s0 }
  0x6d   : > { %p2800_p8 = scmp.ne.s32.totalorder %s3161_s26, %s2799_s30  ;;  %p2806_p1 = scmp.lt.s32.totalorder %s2804_s8, %s2799_s30 }
  0x6f   : > { %p2802_p9 = pnand %p2800_p8, %p3108_p11  ;;  %p2807_p5 = por %p2806_p1, %p2805_p10 }
  0x71   : > { %p2803_p6 = pneg %p2802_p9 }
  0x73   : > { %p2808_p12 = pnand %p2807_p5, %p2803_p6 }
  0x75   : > { %2811 = shalt.err (!%p2808_p12)
}
  0x76   : > { %s2812_s10 = scalar_lea.vmem %s3165_s21, 256  ;;  %s2939_s29 = smov [#allocation2]  }
  0x77   : > { %p2813_p0 = scmp.ne.s32.totalorder %s3165_s21, %s2812_s10  ;;  %s2817_s18 = sshll.u32 %s2939_s29, 4  ;;  %s2818_s18 = int_to_ptr.vmem [resolvable:$false] %s2817_s18 }
  0x78   : > { %s2819_s1 = scalar_lea.vmem %s2818_s18, 512  ;;  %p2820_p7 = scmp.lt.s32.totalorder %s3165_s21, %s2818_s18 }
  0x79   : > { %p2815_p13 = pnand %p2813_p0, %p3108_p11  ;;  %p2821_p3 = scmp.lt.s32.totalorder %s2819_s1, %s2812_s10 }
  0x7b   : > { %p2816_p2 = pneg %p2815_p13  ;;  %p2822_p8 = por %p2821_p3, %p2820_p7 }
  0x7d   : > { %p2823_p9 = pnand %p2822_p8, %p2816_p2 }
  0x7f   : > { %2826 = shalt.err (!%p2823_p9)
}
  0x80   : > { %s2940_s30 = smov 128   ;;  %s2941_s9 = smov 8  }
  0x81   : > { %2544 = dma.hbm_to_vmem [thread:$0]  (!%p3086_p4), %s3161_s26, 256, %s3165_s21, %s277_s20, %s2940_s30, %s2940_s30, %s2941_s9  }
  0x82   : > { %s2267_s8 = sshll.u32 %s3065_s19, 1  ;;  %s2322_s17 = sshll.u32 %s2931_s27, 5 }
  0x83   : > { %s3195_s10 = scalar_lea.hbm %s3499_s2, %s2322_s17  ;;  %s323_s18 = scalar_lea.vmem [#allocation7], %s2267_s8 }
  0x84   : > { %s330_s1 = sshll.u32 %s323_s18, 4  ;;  %s2827_s0 = scalar_lea.hbm %s3195_s10, 32  ;;  %s3197_s1 = int_to_ptr.vmem [resolvable:$true] %s330_s1 }
  0x85   : > { %p2828_p6 = scmp.ne.s32.totalorder %s3195_s10, %s2827_s0  ;;  %s2832_s21 = scalar_lea.hbm %s3499_s2, 64 }
  0x86   : > { %p2833_p5 = scmp.lt.s32.totalorder %s3195_s10, %s3499_s2  ;;  %p2834_p12 = scmp.lt.s32.totalorder %s2832_s21, %s2827_s0 }
  0x87   : > { %p2830_p10 = pnand %p2828_p6, %p3108_p11 }
  0x88   : > { %p2835_p0 = por %p2834_p12, %p2833_p5 }
  0x89   : > { %p2831_p1 = pneg %p2830_p10 }
  0x8b   : > { %p2836_p13 = pnand %p2835_p0, %p2831_p1 }
  0x8d   : > { %2839 = shalt.err (!%p2836_p13)
}
  0x8e   : > { %s2840_s9 = scalar_lea.vmem %s3197_s1, 32  ;;  %s2942_s8 = smov [#allocation7]  }
  0x8f   : > { %p2841_p2 = scmp.ne.s32.totalorder %s3197_s1, %s2840_s9  ;;  %s2845_s17 = sshll.u32 %s2942_s8, 4  ;;  %s2846_s17 = int_to_ptr.vmem [resolvable:$false] %s2845_s17 }
  0x90   : > { %s2847_s23 = scalar_lea.vmem %s2846_s17, 64  ;;  %p2848_p8 = scmp.lt.s32.totalorder %s3197_s1, %s2846_s17 }
  0x91   : > { %p2843_p7 = pnand %p2841_p2, %p3108_p11  ;;  %p2849_p9 = scmp.lt.s32.totalorder %s2847_s23, %s2840_s9 }
  0x93   : > { %p2844_p3 = pneg %p2843_p7  ;;  %p2850_p6 = por %p2849_p9, %p2848_p8 }
  0x95   : > { %p2851_p10 = pnand %p2850_p6, %p2844_p3 }
  0x97   : > { %2854 = shalt.err (!%p2851_p10)
}
  0x98   : > { %s2943_s0 = smov 16   ;;  %s2944_s29 = smov 1  }
  0x99   : > { %2550 = dma.hbm_to_vmem [thread:$0]  (!%p3086_p4), %s3195_s10, 32, %s3197_s1, %s3102_s11, %s2943_s0, %s2943_s0, %s2944_s29  }
  0x9a   : > { %p3543_p11 = scmp.ne.s32.totalorder %s3529_s15, 0 }
  0x9b   : > { %s3223_s22 = sand.u32 (!%p3543_p11), 1, %s2923_s25   ;;  %p3544_p1 = scmp.ne.s32.totalorder (!%p3543_p11), %s3526_s12, 0 }
  0x9c   : > { %342 = sbr.rel (%p3543_p11) target bundleno = 1765 (0x6e5), region = 48  ;;  %s3226_s18 = sshll.u32 (!%p3543_p11), %s3223_s22, 4 }
  0x9d   : > { %s345_s26 = scalar_lea.sflag (!%p3543_p11), [#allocation3], %s3223_s22  ;;  %s348_s19 = scalar_lea.vmem (!%p3543_p11), [#allocation2], %s3226_s18 }
  0xa1   : > { %2898 = dma.done.wait (%p3544_p1), %s345_s26, 256  }
  0xa2   : > { %2900 = vsyncadd (%p3544_p1), %s345_s26, 4294967040  ;;  %s353_s15 = sand.u32 1, %s3011_s28   ;;  %s357_s11 = scalar_lea.vmem [#allocation5], %s3226_s18 }
  0xa3   : > { %s354_s16 = scalar_lea.sflag [#allocation6], %s353_s15 }
  0xa4   : > { %2902 = dma.done.wait (%p3544_p1), %s354_s16, 288  }
  0xa5   : > { %2904 = vsyncadd (%p3544_p1), %s354_s16, 4294967008  ;;  %s2273_s10 = sshll.u32 %s3223_s22, 1  ;;  %p3545_p4 = scmp.eq.s32.totalorder %s3011_s28, 0 }
  0xa6   : > { %s3241_s1 = scalar_lea.vmem [#allocation7], %s2273_s10 }
  0xa7   : > { %2906 = dma.done.wait (%p3545_p4), [#allocation9], 512   ;;  %p3546_p5 = pmov %p3545_p4 }
  0xa8   : > { %p3547_p12 = pmov %p3545_p4 }
  0xa9   : > { %2908 = vsyncadd (%p3546_p5), [#allocation9], 4294966784 }
  0xaa   : > { %2910 = dma.done.wait (%p3547_p12), [#allocation12], 256   ;;  %p3548_p0 = pmov %p3545_p4 }
  0xab   : > { %v3251_v0 = vld [vmem:[%s348_s19] sm:$0xff]  ;;  %vm429_vm0 = vcmask 261120   ;;  %v3253_v1 = vld [vmem:[%s348_s19 + $0x8] sm:$0xff]  ;;  %v2945_v7 = vmov 0.0   ;;  %vm2946_vm1 = vmmov 0   ;;  %vm1003_vm2 = vcmask 1043456  }
  0xac   : > { %2912 = vsyncadd (%p3548_p0), [#allocation12], 4294967040  ;;  %v427_v2 = vmul.f32 %v3251_v0, %v3251_v0  ;;  %v428_v3 = vmul.f32 %v3253_v1, %v3253_v1  ;;  %v2651_v6 = vld [vmem:[#allocation8 + $0x8] sm:$0xff]   ;;  %2375 = vmatprep.subr.bf16.mxu0 %v2945_v7  ;;  %2379 = vmatprep.mubr.msk.bf16.mxu0 %vm2946_vm1, %v2945_v7  ;;  %v2652_v8 = vld [vmem:[#allocation8] sm:$0xff]   ;;  %vm999_vm3 = vcmask 64512   ;;  %vm1391_vm4 = vcmask 130048  }
  0xad   : > { %2376 = vmatpush3.bf16.msra.mxu0 %v2651_v6  ;;  %v2653_v9 = vld [vmem:[#allocation10 + $0x8] sm:$0xff]   ;;  %v2654_v10 = vld [vmem:[#allocation10] sm:$0xff]   ;;  %s2327_s20 = sshll.u32 %s3011_s28, 8  ;;  %s418_s30 = scalar_lea.vmem [#allocation13], %s3226_s18 }
  0xae   : > { %v430_v4 = vsel %vm429_vm0, %v427_v2, 0.0  ;;  %v433_v5 = vsel %vm429_vm0, %v428_v3, 0.0  ;;  %2377 = vmatprep.subr.bf16.mxu0 %v2945_v7  ;;  %v2655_v11 = vld [vmem:[%s357_s11] sm:$0xff]   ;;  %2383 = vmatprep.subr.bf16.mxu1 %v2653_v9  ;;  %v2656_v12 = vld [vmem:[%s357_s11 + $0x8] sm:$0xff]   ;;  %s2109_s9 = sshll.u32 %s418_s30, 4  ;;  %s3450_s23 = scalar_lea.hbm %s3504_s7, %s2327_s20  ;;  %s3452_s9 = int_to_ptr.vmem [resolvable:$true] %s2109_s9 }
  0xaf   : > { %431 = vadd.xlane.f32.xlu0 %v430_v4  ;;  %2387 = vmatprep.mubr.msk.bf16.mxu1 %vm429_vm0, %v2655_v11  ;;  %v2278_v22 = vld [vmem:[%s3500_s3] ss:$0 sm:$0xff]  ;;  %s2096_s28 = scalar_lea.sflag [#allocation4], %s3223_s22  ;;  %s2855_s0 = scalar_lea.vmem %s3452_s9, 256 }
  0xb0   : > { %2384 = vmatpush3.bf16.msra.mxu1 %v2653_v9  ;;  %p2856_p13 = scmp.ne.s32.totalorder %s3452_s9, %s2855_s0  ;;  %p3549_p2 = scmp.ne.s32.totalorder %s3527_s13, 0 }
  0xb1   : > { %2378 = vmatpush3.bf16.msra.mxu0 %v2652_v8  ;;  %2385 = vmatprep.subr.bf16.mxu1 %v2654_v10  ;;  %s2947_s29 = smov [#allocation13]  }
  0xb2   : > { %2391 = vmatprep.subr.bf16.mxu0 %v2945_v7  ;;  %p2857_p7 = pnand %p2856_p13, %p3549_p2  ;;  %s2859_s18 = sshll.u32 %s2947_s29, 4  ;;  %s2860_s18 = int_to_ptr.vmem [resolvable:$false] %s2859_s18 }
  0xb3   : > { %434 = vadd.xlane.f32.xlu0 %v433_v5  ;;  %s2861_s26 = scalar_lea.vmem %s2860_s18, 512  ;;  %p2862_p8 = scmp.lt.s32.totalorder %s3452_s9, %s2860_s18 }
  0xb4   : > { %2386 = vmatpush3.bf16.msra.mxu1 %v2654_v10  ;;  %p2858_p3 = pneg %p2857_p7  ;;  %p2863_p9 = scmp.lt.s32.totalorder %s2861_s26, %s2855_s0 }
  0xb5   : > { %2397 = vmatprep.subr.bf16.mxu1 %v2945_v7 }
  0xb6   : > { %p2864_p6 = por %p2863_p9, %p2862_p8 }
  0xb7   : > { %2388 = vmatmul.mubr.msk.bf16.vlgmr.msra.gmra.mxu1 %vm429_vm0, %v2656_v12 }
  0xb8   : > { %2399 = vmatprep.mubr.msk.bf16.mxu1 %vm2946_vm1, %v2945_v7  ;;  %p2865_p10 = pnand %p2864_p6, %p2858_p3 }
 0x138   : > { %v432_v13 = vpop.xlane.xlu0 %431 }
 0x139   : > { %v437_v14 = vmul.f32 0.03125, %v432_v13 }
 0x13b   : > { %v439_v15 = vadd.f32 1e-06, %v437_v14 }
 0x13c   : > { %v435_v16 = vpop.xlane.xlu0 %434 }
 0x13d   : > { %2657 = vrsqrt.f32 %v439_v15  ;;  %v438_v17 = vmul.f32 0.03125, %v435_v16 }
 0x13f   : > { %v440_v18 = vadd.f32 1e-06, %v438_v17 }
 0x141   : > { %2659 = vrsqrt.f32 %v440_v18 }
 0x14a   : > { %v2658_v19 = vpop.eup %2657 }
 0x14b   : > { %v443_v20 = vmul.f32 %v2658_v19, %v3251_v0 }
 0x14d   : > { %v451_v24 = vmul.f32 %v2278_v22, %v443_v20 }
 0x14e   : > { %v2660_v21 = vpop.eup %2659 }
 0x14f   : > { %v444_v23 = vmul.f32 %v2660_v21, %v3253_v1 }
 0x151   : > { %v452_v25 = vmul.f32 %v2278_v22, %v444_v23 }
 0x153   : > { %v453_v26 = vpack.c.bf16 %v452_v25, %v451_v24 }
 0x155   : > { %2380 = vmatmul.mubr.msk.bf16.vlgmr.msra.gmra.mxu0 %vm429_vm0, %v453_v26 }
 0x156   : > { %2393 = vmatprep.mubr.msk.bf16.mxu0 %vm2946_vm1, %v2945_v7 }
 0x177   : > { %v2389_v32 = vpop.f32.mrf.mxu1 }
 0x179   : > { %v584_v33 = vpop.f32.mrf.mxu1 }
 0x17b   : > { %v2390_v34 = vpop.f32.mrf.mxu1 }
 0x17d   : > { %v587_v35 = vpop.f32.mrf.mxu1 }
 0x215   : > { %v511_v27 = vpop.f32.mrf.mxu0 }
 0x217   : > { %v2381_v28 = vpop.f32.mrf.mxu0 }
 0x219   : > { %v514_v29 = vpop.f32.mrf.mxu0 }
 0x21a   : > { %v2608_v30 = vpack.i.bf16 %v514_v29, %v511_v27 }
 0x21b   : > { %v2382_v31 = vpop.f32.mrf.mxu0 }
 0x21c   : > { %2609 = vxpose.xlu1.b32.start.end [1/1] (short) (narrow) %v2608_v30, 32 }
 0x229   : > { %919 = vxpose.xlu1.b32.start [1/2] (short) (narrow) %v584_v33, 64 }
 0x22d   : > { %920 = vxpose.xlu1.b32.end [2/2] (short) (narrow) %v587_v35, 64 }
 0x298   : > { %v2610_v36 = vpop.trf.xlu1 }
 0x299   : > { %v2611_v39 = vunpack.i.l.bf16 %v2610_v36  ;;  %v2614_v43 = vunpack.i.h.bf16 %v2610_v36 }
 0x29c   : > { %v2615_v37 = vpop.trf.xlu1 }
 0x29d   : > { %v2616_v38 = vunpack.i.l.bf16 %v2615_v37  ;;  %v2619_v41 = vunpack.i.h.bf16 %v2615_v37 }
 0x29f   : > { %v2630_v40 = vpack.i.bf16 %v2616_v38, %v2611_v39  ;;  %v2644_v44 = vpack.i.bf16 %v2619_v41, %v2614_v43 }
 0x2a0   : > { %v2620_v42 = vpop.trf.xlu1 }
 0x2a1   : > { %2631 = vxpose.xlu0.b32.start.end [1/1] (short) (narrow) %v2630_v40, 8  ;;  %v2621_v47 = vunpack.i.l.bf16 %v2620_v42  ;;  %v2624_v56 = vunpack.i.h.bf16 %v2620_v42 }
 0x2a4   : > { %v2625_v45 = vpop.trf.xlu1 }
 0x2a5   : > { %2645 = vxpose.xlu0.b32.start.end [1/1] (short) (narrow) %v2644_v44, 8  ;;  %v2626_v46 = vunpack.i.l.bf16 %v2625_v45  ;;  %v2629_v49 = vunpack.i.h.bf16 %v2625_v45  ;;  %v2296_v45 = vld [vmem:[%s3241_s1] ss:$0 sm:$0xff] }
 0x2a7   : > { %v2637_v48 = vpack.i.bf16 %v2626_v46, %v2621_v47 }
 0x2a8   : > { %v935_v50 = vpop.trf.xlu1 }
 0x2a9   : > { %2638 = vxpose.xlu1.b32.start.end [1/1] (short) (narrow) %v2637_v48, 8  ;;  %887 = vxpose.xlu0.b32.start.end [1/1] (short) (narrow) %v2629_v49, 8  ;;  %v991_v51 = vpack.c.bf16 %v935_v50, %v935_v50 }
 0x2ab   : > { %v1005_v52 = vsel %vm1003_vm2, %v991_v51, 0 }
 0x2ac   : > { %2392 = vmatpush3.bf16.msra.mxu0 %v1005_v52  ;;  %v936_v53 = vpop.trf.xlu1 }
 0x2ad   : > { %951 = vxpose.xlu1.b32.start [1/2] (short) (narrow) %v2389_v32, 64  ;;  %v992_v54 = vpack.c.bf16 %v936_v53, %v936_v53  ;;  %2403 = vmatprep.subr.bf16.mxu0 %v2945_v7 }
 0x2af   : > { %v1051_v55 = vsel %vm1003_vm2, %v992_v54, 0 }
 0x2b0   : > { %2398 = vmatpush3.bf16.msra.mxu1 %v1051_v55  ;;  %v937_v57 = vpop.trf.xlu1 }
 0x2b1   : > { %952 = vxpose.xlu1.b32.end [2/2] (short) (narrow) %v2390_v34, 64  ;;  %2409 = vmatprep.subr.bf16.mxu1 %v2945_v7  ;;  %v993_v62 = vpack.c.bf16 %v937_v57, %v937_v57 }
 0x2b3   : > { %v1097_v10 = vsel %vm1003_vm2, %v993_v62, 0 }
 0x2b4   : > { %v938_v58 = vpop.trf.xlu1 }
 0x2b5   : > { %v994_v63 = vpack.c.bf16 %v938_v58, %v938_v58 }
 0x2b7   : > { %v1143_v11 = vsel %vm1003_vm2, %v994_v63, 0 }
 0x2b8   : > { %v3287_v59 = vpop.trf.xlu1 }
 0x2b9   : > { %v1488_v41 = vpack.c.bf16 %v3287_v59, %v3287_v59 }
 0x2bb   : > { %v1500_v44 = vsel %vm1391_vm4, %v1488_v41, 0 }
 0x2bc   : > { %v3289_v60 = vpop.trf.xlu1 }
 0x2bd   : > { %v1489_v33 = vpack.c.bf16 %v3289_v60, %v3289_v60 }
 0x2bf   : > { %v1546_v37 = vsel %vm1391_vm4, %v1489_v33, 0 }
 0x2c0   : > { %v3291_v61 = vpop.trf.xlu1 }
 0x2c4   : > { %v3293_v5 = vpop.trf.xlu1 }
 0x2ca   : > { %855 = vxpose.xlu1.b32.start.end [1/1] (short) (narrow) %v2624_v56, 8 }
 0x31d   : > { %v2632_v2 = vpop.trf.xlu0 }
 0x31e   : > { %v2636_v3 = vunpack.i.h.bf16 %v2632_v2  ;;  %v2633_v4 = vunpack.i.l.bf16 %v2632_v2 }
 0x320   : > { %v984_v6 = vpack.c.bf16 %v2636_v3, %v2636_v3  ;;  %v983_v8 = vpack.c.bf16 %v2633_v4, %v2633_v4 }
 0x321   : > { %v2646_v9 = vpop.trf.xlu0 }
 0x322   : > { %2394 = vmatmul.mubr.msk.bf16.vlgmr.msra.gmra.mxu0 %vm999_vm3, %v983_v8  ;;  %2400 = vmatmul.mubr.msk.bf16.vlgmr.msra.gmra.mxu1 %vm999_vm3, %v984_v6  ;;  %v2647_v19 = vunpack.i.l.bf16 %v2646_v9  ;;  %v2650_v21 = vunpack.i.h.bf16 %v2646_v9 }
 0x323   : > { %2404 = vmatpush3.bf16.msra.mxu0 %v1097_v10  ;;  %2410 = vmatpush3.bf16.msra.mxu1 %v1143_v11  ;;  %v2297_v10 = vld [vmem:[%s3241_s1 + $0x1] ss:$0 sm:$0xff] }
 0x324   : > { %2405 = vmatprep.mubr.msk.bf16.mxu0 %vm2946_vm1, %v2945_v7  ;;  %2411 = vmatprep.mubr.msk.bf16.mxu1 %vm2946_vm1, %v2945_v7  ;;  %v987_v24 = vpack.c.bf16 %v2647_v19, %v2647_v19  ;;  %v988_v26 = vpack.c.bf16 %v2650_v21, %v2650_v21 }
 0x325   : > { %v2639_v12 = vpop.trf.xlu1  ;;  %2415 = vmatprep.subr.bf16.mxu0 %v2945_v7  ;;  %2421 = vmatprep.subr.bf16.mxu1 %v2945_v7  ;;  %v903_v31 = vpop.trf.xlu0 }
 0x326   : > { %v2643_v13 = vunpack.i.h.bf16 %v2639_v12  ;;  %v2640_v14 = vunpack.i.l.bf16 %v2639_v12  ;;  %v990_v35 = vpack.c.bf16 %v903_v31, %v903_v31 }
 0x328   : > { %v986_v15 = vpack.c.bf16 %v2643_v13, %v2643_v13  ;;  %v985_v16 = vpack.c.bf16 %v2640_v14, %v2640_v14 }
 0x329   : > { %v967_v17 = vpop.trf.xlu1 }
 0x32a   : > { %v995_v18 = vpack.c.bf16 %v967_v17, %v967_v17  ;;  %2406 = vmatmul.mubr.msk.bf16.vlgmr.msra.gmra.mxu0 %vm999_vm3, %v985_v16  ;;  %2412 = vmatmul.mubr.msk.bf16.vlgmr.msra.gmra.mxu1 %vm999_vm3, %v986_v15 }
 0x32b   : > { %2417 = vmatprep.mubr.msk.bf16.mxu0 %vm2946_vm1, %v2945_v7  ;;  %2423 = vmatprep.mubr.msk.bf16.mxu1 %vm2946_vm1, %v2945_v7 }
 0x32c   : > { %v1189_v20 = vsel %vm1003_vm2, %v995_v18, 0 }
 0x32d   : > { %v968_v22 = vpop.trf.xlu1  ;;  %2416 = vmatpush3.bf16.msra.mxu0 %v1189_v20 }
 0x32e   : > { %v996_v23 = vpack.c.bf16 %v968_v22, %v968_v22  ;;  %2427 = vmatprep.subr.bf16.mxu0 %v2945_v7 }
 0x330   : > { %v1235_v25 = vsel %vm1003_vm2, %v996_v23, 0 }
 0x331   : > { %v969_v27 = vpop.trf.xlu1  ;;  %2422 = vmatpush3.bf16.msra.mxu1 %v1235_v25 }
 0x332   : > { %v997_v28 = vpack.c.bf16 %v969_v27, %v969_v27  ;;  %2418 = vmatmul.mubr.msk.bf16.vlgmr.msra.gmra.mxu0 %vm999_vm3, %v987_v24  ;;  %2433 = vmatprep.subr.bf16.mxu1 %v2945_v7 }
 0x333   : > { %2429 = vmatprep.mubr.msk.bf16.mxu0 %vm2946_vm1, %v2945_v7 }
 0x334   : > { %v1281_v29 = vsel %vm1003_vm2, %v997_v28, 0  ;;  %2424 = vmatmul.mubr.msk.bf16.vlgmr.msra.gmra.mxu1 %vm999_vm3, %v988_v26 }
 0x335   : > { %v970_v30 = vpop.trf.xlu1  ;;  %2428 = vmatpush3.bf16.msra.mxu0 %v1281_v29  ;;  %2435 = vmatprep.mubr.msk.bf16.mxu1 %vm2946_vm1, %v2945_v7 }
 0x336   : > { %v998_v32 = vpack.c.bf16 %v970_v30, %v970_v30  ;;  %2439 = vmatprep.subr.bf16.mxu0 %v2945_v7 }
 0x338   : > { %v1327_v34 = vsel %vm1003_vm2, %v998_v32, 0 }
 0x339   : > { %v3326_v36 = vpop.trf.xlu1  ;;  %2434 = vmatpush3.bf16.msra.mxu1 %v1327_v34 }
 0x33a   : > { %2445 = vmatprep.subr.bf16.mxu1 %v2945_v7 }
 0x33c   : > { %2436 = vmatmul.mubr.msk.bf16.vlgmr.msra.gmra.mxu1 %vm999_vm3, %v990_v35 }
 0x33d   : > { %v3331_v38 = vpop.trf.xlu1  ;;  %2446 = vmatpush3.bf16.xpose.msra.mxu1 %v1546_v37  ;;  %2447 = vmatprep.mubr.msk.bf16.mxu1 %vm2946_vm1, %v2945_v7 }
 0x33e   : > { %2457 = vmatprep.subr.bf16.mxu1 %v2945_v7 }
 0x341   : > { %v3336_v39 = vpop.trf.xlu1 }
 0x345   : > { %v3338_v40 = vpop.trf.xlu1 }
 0x349   : > { %v871_v42 = vpop.trf.xlu1 }
 0x34a   : > { %v989_v43 = vpack.c.bf16 %v871_v42, %v871_v42 }
 0x34c   : > { %2430 = vmatmul.mubr.msk.bf16.vlgmr.msra.gmra.mxu0 %vm999_vm3, %v989_v43 }
 0x34d   : > { %2440 = vmatpush3.bf16.xpose.msra.mxu0 %v1500_v44  ;;  %2441 = vmatprep.mubr.msk.bf16.mxu0 %vm2946_vm1, %v2945_v7 }
 0x34e   : > { %2451 = vmatprep.subr.bf16.mxu0 %v2945_v7 }
 0x3e2   : > { %v1041_v46 = vpop.f32.mrf.mxu0  ;;  %v1087_v47 = vpop.f32.mrf.mxu1 }
 0x3e3   : > { %v1383_v48 = vadd.f32 %v2296_v45, %v1041_v46  ;;  %v1384_v49 = vadd.f32 %v2296_v45, %v1087_v47 }
 0x3e4   : > { %v2395_v50 = vpop.f32.mrf.mxu0  ;;  %v2401_v51 = vpop.f32.mrf.mxu1 }
 0x3e5   : > { %v1395_v52 = vsel %vm1391_vm4, %v1384_v49, -inf  ;;  %v1392_v53 = vsel %vm1391_vm4, %v1383_v48, -inf }
 0x3e6   : > { %1396 = vmax.xlane.f32.xlu1 %v1395_v52  ;;  %v1090_v54 = vpop.f32.mrf.mxu1  ;;  %1393 = vmax.xlane.f32.xlu0 %v1392_v53  ;;  %v1044_v55 = vpop.f32.mrf.mxu0 }
 0x3e8   : > { %v2396_v56 = vpop.f32.mrf.mxu0  ;;  %v2402_v57 = vpop.f32.mrf.mxu1 }
 0x3ea   : > { %v1133_v58 = vpop.f32.mrf.mxu0  ;;  %v1179_v59 = vpop.f32.mrf.mxu1 }
 0x3eb   : > { %v1385_v60 = vadd.f32 %v2296_v45, %v1133_v58  ;;  %v1386_v2 = vadd.f32 %v2296_v45, %v1179_v59 }
 0x3ec   : > { %v2407_v62 = vpop.f32.mrf.mxu0  ;;  %v2413_v63 = vpop.f32.mrf.mxu1 }
 0x3ed   : > { %v1398_v3 = vsel %vm1391_vm4, %v1385_v60, -inf  ;;  %v1401_v11 = vsel %vm1391_vm4, %v1386_v2, -inf }
 0x3ee   : > { %v1182_v4 = vpop.f32.mrf.mxu1  ;;  %1399 = vmax.xlane.f32.xlu0 %v1398_v3  ;;  %v1136_v6 = vpop.f32.mrf.mxu0 }
 0x3f0   : > { %v2408_v8 = vpop.f32.mrf.mxu0  ;;  %v2414_v9 = vpop.f32.mrf.mxu1 }
 0x3f2   : > { %1402 = vmax.xlane.f32.xlu0 %v1401_v11  ;;  %v1225_v12 = vpop.f32.mrf.mxu0 }
 0x3f3   : > { %v1387_v13 = vadd.f32 %v2297_v10, %v1225_v12 }
 0x3f4   : > { %v1271_v14 = vpop.f32.mrf.mxu1  ;;  %v2419_v15 = vpop.f32.mrf.mxu0 }
 0x3f5   : > { %v1388_v16 = vadd.f32 %v2297_v10, %v1271_v14  ;;  %v1404_v17 = vsel %vm1391_vm4, %v1387_v13, -inf }
 0x3f6   : > { %v2425_v18 = vpop.f32.mrf.mxu1  ;;  %1405 = vmax.xlane.f32.xlu0 %v1404_v17  ;;  %v1228_v19 = vpop.f32.mrf.mxu0 }
 0x3f7   : > { %v1407_v20 = vsel %vm1391_vm4, %v1388_v16, -inf }
 0x3f8   : > { %v1274_v21 = vpop.f32.mrf.mxu1  ;;  %v2420_v22 = vpop.f32.mrf.mxu0 }
 0x3fa   : > { %v2426_v23 = vpop.f32.mrf.mxu1  ;;  %1408 = vmax.xlane.f32.xlu0 %v1407_v20 }
 0x3fc   : > { %v1363_v24 = vpop.f32.mrf.mxu1 }
 0x3fd   : > { %v1390_v25 = vadd.f32 %v2297_v10, %v1363_v24 }
 0x3fe   : > { %v2437_v26 = vpop.f32.mrf.mxu1 }
 0x3ff   : > { %v1413_v27 = vsel %vm1391_vm4, %v1390_v25, -inf }
 0x400   : > { %1414 = vmax.xlane.f32.xlu0 %v1413_v27  ;;  %v1366_v28 = vpop.f32.mrf.mxu1  ;;  %v1491_v27 = vpack.c.bf16 %v3293_v5, %v3293_v5 }
 0x402   : > { %v2438_v29 = vpop.f32.mrf.mxu1 }
 0x403   : > { %v1490_v29 = vpack.c.bf16 %v3291_v61, %v3291_v61 }
 0x40c   : > { %v1317_v30 = vpop.f32.mrf.mxu0 }
 0x40d   : > { %v1389_v31 = vadd.f32 %v2297_v10, %v1317_v30 }
 0x40e   : > { %v2431_v32 = vpop.f32.mrf.mxu0 }
 0x40f   : > { %v1410_v33 = vsel %vm1391_vm4, %v1389_v31, -inf }
 0x410   : > { %1411 = vmax.xlane.f32.xlu1 %v1410_v33  ;;  %v1320_v34 = vpop.f32.mrf.mxu0 }
 0x411   : > { %v1638_v34 = vsel %vm1391_vm4, %v1491_v27, 0 }
 0x412   : > { %v2432_v35 = vpop.f32.mrf.mxu0 }
 0x413   : > { %v1592_v35 = vsel %vm1391_vm4, %v1490_v29, 0 }
 0x46f   : > { %v1397_v37 = vpop.xlane.xlu1 %1396  ;;  %v1394_v41 = vpop.xlane.xlu0 %1393 }
 0x470   : > { %v1417_v42 = vsub.f32 %v1384_v49, %v1397_v37  ;;  %v1416_v43 = vsub.f32 %v1383_v48, %v1394_v41  ;;  %v1492_v41 = vpack.c.bf16 %v3326_v36, %v3326_v36 }
 0x472   : > { %v1426_v44 = vmul.f32 1.442695, %v1417_v42  ;;  %v1424_v45 = vmul.f32 1.442695, %v1416_v43 }
 0x474   : > { %2661 = vpow2.f32 %v1426_v44 }
 0x475   : > { %2663 = vpow2.f32 %v1424_v45  ;;  %v1493_v45 = vpack.c.bf16 %v3331_v38, %v3331_v38 }
 0x477   : > { %v1400_v46 = vpop.xlane.xlu0 %1399  ;;  %v1730_v36 = vsel %vm1391_vm4, %v1493_v45, 0 }
 0x478   : > { %v1418_v47 = vsub.f32 %v1385_v60, %v1400_v46 }
 0x47a   : > { %v1428_v50 = vmul.f32 1.442695, %v1418_v47  ;;  %v1684_v47 = vsel %vm1391_vm4, %v1492_v41, 0 }
 0x47b   : > { %v1403_v51 = vpop.xlane.xlu0 %1402 }
 0x47c   : > { %2665 = vpow2.f32 %v1428_v50  ;;  %v1419_v52 = vsub.f32 %v1386_v2, %v1403_v51 }
 0x47e   : > { %v1430_v53 = vmul.f32 1.442695, %v1419_v52  ;;  %v1494_v52 = vpack.c.bf16 %v3336_v39, %v3336_v39 }
 0x47f   : > { %v1406_v54 = vpop.xlane.xlu0 %1405 }
 0x480   : > { %2667 = vpow2.f32 %v1430_v53  ;;  %v1420_v55 = vsub.f32 %v1387_v13, %v1406_v54 }
 0x481   : > { %v2662_v56 = vpop.eup %2661 }
 0x482   : > { %v2664_v57 = vpop.eup %2663  ;;  %v1432_v58 = vmul.f32 1.442695, %v1420_v55  ;;  %v1443_v49 = vsel %vm1391_vm4, %v2662_v56, 0.0  ;;  %v1495_v55 = vpack.c.bf16 %v3338_v40, %v3338_v40 }
 0x483   : > { %1444 = vadd.xlane.f32.xlu0 %v1443_v49  ;;  %v1409_v48 = vpop.xlane.xlu0 %1408  ;;  %v1440_v59 = vsel %vm1391_vm4, %v2664_v57, 0.0 }
 0x484   : > { %2669 = vpow2.f32 %v1432_v58  ;;  %v1421_v62 = vsub.f32 %v1388_v16, %v1409_v48  ;;  %1441 = vadd.xlane.f32.xlu1 %v1440_v59  ;;  %v1822_v39 = vsel %vm1391_vm4, %v1495_v55, 0 }
 0x486   : > { %v1434_v60 = vmul.f32 1.442695, %v1421_v62 }
 0x488   : > { %2671 = vpow2.f32 %v1434_v60 }
 0x489   : > { %v2666_v63 = vpop.eup %2665  ;;  %v1415_v2 = vpop.xlane.xlu0 %1414 }
 0x48a   : > { %v1423_v3 = vsub.f32 %v1390_v25, %v1415_v2  ;;  %v1446_v4 = vsel %vm1391_vm4, %v2666_v63, 0.0  ;;  %v1872_v2 = vld [vmem:[#allocation11] sm:$0xf] }
 0x48b   : > { %1447 = vadd.xlane.f32.xlu1 %v1446_v4  ;;  %v1874_v4 = vld [vmem:[#allocation11 + $0x4] sm:$0xf] }
 0x48c   : > { %v1438_v6 = vmul.f32 1.442695, %v1423_v3  ;;  %v1936_v3 = vsel %vm1003_vm2, %v1872_v2, 0 }
 0x48d   : > { %v2668_v8 = vpop.eup %2667 }
 0x48e   : > { %2673 = vpow2.f32 %v1438_v6  ;;  %v1449_v9 = vsel %vm1391_vm4, %v2668_v8, 0.0  ;;  %v1884_v6 = vsel %vm1003_vm2, %v1874_v4, 0 }
 0x48f   : > { %1450 = vadd.xlane.f32.xlu0 %v1449_v9 }
 0x491   : > { %v3361_v10 = vpop.eup %2669 }
 0x492   : > { %v1452_v11 = vsel %vm1391_vm4, %v3361_v10, 0.0 }
 0x493   : > { %1453 = vadd.xlane.f32.xlu1 %v1452_v11 }
 0x495   : > { %v3365_v12 = vpop.eup %2671 }
 0x496   : > { %v1455_v13 = vsel %vm1391_vm4, %v3365_v12, 0.0 }
 0x497   : > { %1456 = vadd.xlane.f32.xlu0 %v1455_v13 }
 0x499   : > { %v1412_v14 = vpop.xlane.xlu1 %1411 }
 0x49a   : > { %v1422_v15 = vsub.f32 %v1389_v31, %v1412_v14 }
 0x49b   : > { %v3369_v16 = vpop.eup %2673 }
 0x49c   : > { %v1436_v17 = vmul.f32 1.442695, %v1422_v15  ;;  %v1461_v18 = vsel %vm1391_vm4, %v3369_v16, 0.0 }
 0x49d   : > { %1462 = vadd.xlane.f32.xlu0 %v1461_v18 }
 0x49e   : > { %2675 = vpow2.f32 %v1436_v17 }
 0x4ab   : > { %v3373_v19 = vpop.eup %2675 }
 0x4ac   : > { %v1458_v20 = vsel %vm1391_vm4, %v3373_v19, 0.0 }
 0x4ad   : > { %1459 = vadd.xlane.f32.xlu1 %v1458_v20 }
 0x50c   : > { %v1445_v21 = vpop.xlane.xlu0 %1444 }
 0x50d   : > { %2677 = vrcp.f32 %v1445_v21  ;;  %v1442_v22 = vpop.xlane.xlu1 %1441 }
 0x50e   : > { %2679 = vrcp.f32 %v1442_v22  ;;  %v2036_v22 = vld [vmem:[#allocation11 + $0xc] sm:$0xf] }
 0x50f   : > { %v2046_v27 = vsel %vm1003_vm2, %v2036_v22, 0 }
 0x514   : > { %v1448_v23 = vpop.xlane.xlu1 %1447 }
 0x515   : > { %2681 = vrcp.f32 %v1448_v23 }
 0x518   : > { %v1451_v24 = vpop.xlane.xlu0 %1450 }
 0x519   : > { %2683 = vrcp.f32 %v1451_v24 }
 0x51a   : > { %v2678_v25 = vpop.eup %2677 }
 0x51b   : > { %v2680_v26 = vpop.eup %2679  ;;  %v1473_v28 = vmul.f32 %v2678_v25, %v2662_v56 }
 0x51c   : > { %v1454_v30 = vpop.xlane.xlu1 %1453  ;;  %v1472_v31 = vmul.f32 %v2680_v26, %v2664_v57  ;;  %v1776_v57 = vsel %vm1391_vm4, %v1494_v52, 0 }
 0x51d   : > { %2685 = vrcp.f32 %v1454_v30  ;;  %v1481_v32 = vpack.c.bf16 %v1473_v28, %v1473_v28  ;;  %v1980_v28 = vld [vmem:[#allocation11 + $0x8] sm:$0xf] }
 0x51e   : > { %v1480_v33 = vpack.c.bf16 %v1472_v31, %v1472_v31 }
 0x51f   : > { %2448 = vmatmul.mubr.msk.bf16.vlgmr.msra.gmra.mxu1 %vm1391_vm4, %v1481_v32 }
 0x520   : > { %2442 = vmatmul.mubr.msk.bf16.vlgmr.msra.gmra.mxu0 %vm1391_vm4, %v1480_v33  ;;  %2458 = vmatpush3.bf16.xpose.msra.mxu1 %v1638_v34  ;;  %v1457_v37 = vpop.xlane.xlu0 %1456  ;;  %v1990_v33 = vsel %vm1003_vm2, %v1980_v28, 0 }
 0x521   : > { %2452 = vmatpush3.bf16.xpose.msra.mxu0 %v1592_v35  ;;  %2687 = vrcp.f32 %v1457_v37  ;;  %2453 = vmatprep.mubr.msk.bf16.mxu0 %vm2946_vm1, %v2945_v7 }
 0x522   : > { %v2682_v61 = vpop.eup %2681  ;;  %2463 = vmatprep.subr.bf16.mxu0 %v2945_v7  ;;  %2459 = vmatprep.mubr.msk.bf16.mxu1 %vm2946_vm1, %v2945_v7 }
 0x523   : > { %v1474_v5 = vmul.f32 %v2682_v61, %v2666_v63  ;;  %2469 = vmatprep.subr.bf16.mxu1 %v2945_v7 }
 0x525   : > { %v1482_v42 = vpack.c.bf16 %v1474_v5, %v1474_v5 }
 0x526   : > { %v2684_v43 = vpop.eup %2683  ;;  %v1463_v44 = vpop.xlane.xlu0 %1462 }
 0x527   : > { %2689 = vrcp.f32 %v1463_v44  ;;  %v1475_v46 = vmul.f32 %v2684_v43, %v2668_v8 }
 0x528   : > { %2454 = vmatmul.mubr.msk.bf16.vlgmr.msra.gmra.mxu0 %vm1391_vm4, %v1482_v42 }
 0x529   : > { %2464 = vmatpush3.bf16.xpose.msra.mxu0 %v1684_v47  ;;  %v1483_v50 = vpack.c.bf16 %v1475_v46, %v1475_v46  ;;  %2465 = vmatprep.mubr.msk.bf16.mxu0 %vm2946_vm1, %v2945_v7 }
 0x52a   : > { %v2686_v51 = vpop.eup %2685  ;;  %2475 = vmatprep.subr.bf16.mxu0 %v2945_v7 }
 0x52b   : > { %2460 = vmatmul.mubr.msk.bf16.vlgmr.msra.gmra.mxu1 %vm1391_vm4, %v1483_v50  ;;  %v1476_v38 = vmul.f32 %v2686_v51, %v3361_v10 }
 0x52c   : > { %2470 = vmatpush3.bf16.xpose.msra.mxu1 %v1730_v36  ;;  %2471 = vmatprep.mubr.msk.bf16.mxu1 %vm2946_vm1, %v2945_v7 }
 0x52d   : > { %v1484_v53 = vpack.c.bf16 %v1476_v38, %v1476_v38  ;;  %2481 = vmatprep.subr.bf16.mxu1 %v2945_v7 }
 0x52e   : > { %v2688_v54 = vpop.eup %2687 }
 0x52f   : > { %v1477_v56 = vmul.f32 %v2688_v54, %v3365_v12 }
 0x530   : > { %2466 = vmatmul.mubr.msk.bf16.vlgmr.msra.gmra.mxu0 %vm1391_vm4, %v1484_v53 }
 0x531   : > { %2476 = vmatpush3.bf16.xpose.msra.mxu0 %v1776_v57  ;;  %v1485_v58 = vpack.c.bf16 %v1477_v56, %v1477_v56  ;;  %2477 = vmatprep.mubr.msk.bf16.mxu0 %vm2946_vm1, %v2945_v7 }
 0x532   : > { %2487 = vmatprep.subr.bf16.mxu0 %v2945_v7 }
 0x533   : > { %2472 = vmatmul.mubr.msk.bf16.vlgmr.msra.gmra.mxu1 %vm1391_vm4, %v1485_v58 }
 0x534   : > { %v2690_v49 = vpop.eup %2689  ;;  %2482 = vmatpush3.bf16.xpose.msra.mxu1 %v1822_v39  ;;  %2483 = vmatprep.mubr.msk.bf16.mxu1 %vm2946_vm1, %v2945_v7 }
 0x535   : > { %v1479_v40 = vmul.f32 %v2690_v49, %v3369_v16  ;;  %2493 = vmatprep.subr.bf16.mxu1 %v2945_v7 }
 0x536   : > { %v1460_v48 = vpop.xlane.xlu1 %1459 }
 0x537   : > { %2691 = vrcp.f32 %v1460_v48  ;;  %v1487_v59 = vpack.c.bf16 %v1479_v40, %v1479_v40 }
 0x53b   : > { %2484 = vmatmul.mubr.msk.bf16.vlgmr.msra.gmra.mxu1 %vm1391_vm4, %v1487_v59 }
 0x53c   : > { %2495 = vmatprep.mubr.msk.bf16.mxu1 %vm2946_vm1, %v2945_v7  ;;  %2494 = vmatpush3.bf16.msra.mxu1 %v1936_v3 }
 0x53d   : > { %2505 = vmatprep.subr.bf16.mxu1 %v2945_v7 }
 0x544   : > { %v2692_v62 = vpop.eup %2691 }
 0x545   : > { %v1478_v60 = vmul.f32 %v2692_v62, %v3373_v19 }
 0x547   : > { %v1486_v63 = vpack.c.bf16 %v1478_v60, %v1478_v60 }
 0x549   : > { %2478 = vmatmul.mubr.msk.bf16.vlgmr.msra.gmra.mxu0 %vm1391_vm4, %v1486_v63 }
 0x54a   : > { %2489 = vmatprep.mubr.msk.bf16.mxu0 %vm2946_vm1, %v2945_v7  ;;  %2488 = vmatpush3.bf16.msra.mxu0 %v1884_v6 }
 0x54b   : > { %2499 = vmatprep.subr.bf16.mxu0 %v2945_v7 }
 0x5df   : > { %v1582_v8 = vpop.f32.mrf.mxu1 }
 0x5e0   : > { %v1536_v9 = vpop.f32.mrf.mxu0 }
 0x5e1   : > { %v2449_v10 = vpop.f32.mrf.mxu1 }
 0x5e2   : > { %v2443_v11 = vpop.f32.mrf.mxu0 }
 0x5e3   : > { %v1585_v12 = vpop.f32.mrf.mxu1 }
 0x5e4   : > { %v1539_v13 = vpop.f32.mrf.mxu0 }
 0x5e5   : > { %v2450_v14 = vpop.f32.mrf.mxu1 }
 0x5e6   : > { %v2444_v15 = vpop.f32.mrf.mxu0 }
 0x5e8   : > { %v1628_v16 = vpop.f32.mrf.mxu0 }
 0x5ea   : > { %v2455_v17 = vpop.f32.mrf.mxu0 }
 0x5eb   : > { %v1674_v18 = vpop.f32.mrf.mxu1 }
 0x5ec   : > { %v1631_v19 = vpop.f32.mrf.mxu0 }
 0x5ed   : > { %v2461_v20 = vpop.f32.mrf.mxu1 }
 0x5ee   : > { %v2456_v21 = vpop.f32.mrf.mxu0 }
 0x5ef   : > { %v1677_v23 = vpop.f32.mrf.mxu1 }
 0x5f0   : > { %v1720_v24 = vpop.f32.mrf.mxu0 }
 0x5f1   : > { %v2324_v25 = vpack.c.bf16 %v1720_v24, %v1536_v9  ;;  %v2462_v26 = vpop.f32.mrf.mxu1 }
 0x5f2   : > { %v2467_v29 = vpop.f32.mrf.mxu0 }
 0x5f3   : > { %2496 = vmatmul.mubr.msk.bf16.vlgmr.msra.gmra.mxu1 %vm999_vm3, %v2324_v25  ;;  %v1766_v30 = vpop.f32.mrf.mxu1 }
 0x5f4   : > { %v1723_v31 = vpop.f32.mrf.mxu0  ;;  %v2323_v32 = vpack.c.bf16 %v1766_v30, %v1582_v8  ;;  %2506 = vmatpush3.bf16.msra.mxu1 %v2046_v27  ;;  %2507 = vmatprep.mubr.msk.bf16.mxu1 %vm2946_vm1, %v2945_v7 }
 0x5f5   : > { %v2473_v34 = vpop.f32.mrf.mxu1 }
 0x5f6   : > { %v2468_v35 = vpop.f32.mrf.mxu0  ;;  %2490 = vmatmul.mubr.msk.bf16.vlgmr.msra.gmra.mxu0 %vm999_vm3, %v2323_v32 }
 0x5f7   : > { %v1769_v37 = vpop.f32.mrf.mxu1  ;;  %2500 = vmatpush3.bf16.msra.mxu0 %v1990_v33  ;;  %2501 = vmatprep.mubr.msk.bf16.mxu0 %vm2946_vm1, %v2945_v7 }
 0x5f9   : > { %v2474_v61 = vpop.f32.mrf.mxu1 }
 0x5fb   : > { %v1858_v5 = vpop.f32.mrf.mxu1 }
 0x5fc   : > { %v2326_v41 = vpack.c.bf16 %v1858_v5, %v1674_v18 }
 0x5fd   : > { %v2485_v42 = vpop.f32.mrf.mxu1 }
 0x5fe   : > { %2508 = vmatmul.mubr.msk.bf16.vlgmr.msra.gmra.mxu1 %vm999_vm3, %v2326_v41 }
 0x5ff   : > { %v1861_v43 = vpop.f32.mrf.mxu1 }
 0x601   : > { %v2486_v44 = vpop.f32.mrf.mxu1 }
 0x609   : > { %v1812_v45 = vpop.f32.mrf.mxu0 }
 0x60a   : > { %v2325_v46 = vpack.c.bf16 %v1812_v45, %v1628_v16 }
 0x60b   : > { %v2479_v47 = vpop.f32.mrf.mxu0 }
 0x60c   : > { %2502 = vmatmul.mubr.msk.bf16.vlgmr.msra.gmra.mxu0 %vm999_vm3, %v2325_v46 }
 0x60d   : > { %v1815_v50 = vpop.f32.mrf.mxu0 }
 0x60f   : > { %v2480_v51 = vpop.f32.mrf.mxu0 }
 0x6b3   : > { %v1972_v36 = vpop.f32.mrf.mxu1 }
 0x6b5   : > { %v2497_v38 = vpop.f32.mrf.mxu1 }
 0x6b6   : > { %v1920_v52 = vpop.f32.mrf.mxu0 }
 0x6b7   : > { %v1975_v53 = vpop.f32.mrf.mxu1  ;;  %v1973_v40 = vadd.f32 %v1972_v36, %v1920_v52 }
 0x6b8   : > { %v2491_v7 = vpop.f32.mrf.mxu0 }
 0x6b9   : > { %v2498_v54 = vpop.f32.mrf.mxu1 }
 0x6ba   : > { %v1923_v55 = vpop.f32.mrf.mxu0 }
 0x6bb   : > { %v1976_v60 = vadd.f32 %v1975_v53, %v1923_v55 }
 0x6bc   : > { %v2492_v56 = vpop.f32.mrf.mxu0 }
 0x6be   : > { %v2082_v57 = vpop.f32.mrf.mxu1 }
 0x6c0   : > { %v2509_v58 = vpop.f32.mrf.mxu1 }
 0x6c2   : > { %v2085_v39 = vpop.f32.mrf.mxu1 }
 0x6c4   : > { %v2510_v49 = vpop.f32.mrf.mxu1 }
 0x6cc   : > { %v2026_v48 = vpop.f32.mrf.mxu0 }
 0x6cd   : > { %v2033_v59 = vadd.f32 %v2026_v48, %v1973_v40 }
 0x6ce   : > { %v2503_v62 = vpop.f32.mrf.mxu0 }
 0x6cf   : > { %v2089_v63 = vadd.f32 %v2082_v57, %v2033_v59 }
 0x6d0   : > { %v2029_v2 = vpop.f32.mrf.mxu0 }
 0x6d1   : > { %v2091_v3 = vadd.f32 %v2089_v63, %v3251_v0  ;;  %v2034_v4 = vadd.f32 %v2029_v2, %v1976_v60 }
 0x6d2   : > { %v2504_v6 = vpop.f32.mrf.mxu0 }
 0x6d3   : > { %2093 = vst.msk [vmem:[%s418_s30] sm:$0xff] %vm429_vm0, %v2091_v3  ;;  %v2090_v8 = vadd.f32 %v2085_v39, %v2034_v4 }
 0x6d5   : > { %v2092_v0 = vadd.f32 %v2090_v8, %v3253_v1 }
 0x6d7   : > { %2094 = vst.msk [vmem:[%s418_s30 + $0x8] sm:$0xff] %vm429_vm0, %v2092_v0 }
 0x6d8   : > { %2868 = shalt.err (!%p2865_p10)
}
 0x6d9   : > { %s2869_s19 = scalar_lea.hbm %s3450_s23, 256  ;;  %s2873_s11 = scalar_lea.hbm %s3504_s7, 512 }
 0x6da   : > { %p2870_p11 = scmp.ne.s32.totalorder %s3450_s23, %s2869_s19  ;;  %p2874_p5 = scmp.lt.s32.totalorder %s3450_s23, %s3504_s7 }
 0x6db   : > { %p2875_p12 = scmp.lt.s32.totalorder %s2873_s11, %s2869_s19 }
 0x6dc   : > { %p2871_p1 = pnand %p2870_p11, %p3549_p2 }
 0x6dd   : > { %p2876_p0 = por %p2875_p12, %p2874_p5 }
 0x6de   : > { %p2872_p4 = pneg %p2871_p1 }
 0x6e0   : > { %p2877_p13 = pnand %p2876_p0, %p2872_p4 }
 0x6e2   : > { %2880 = shalt.err (!%p2877_p13)
}
 0x6e3   : > { %s2948_s12 = smov 128   ;;  %s2949_s21 = smov 8  }
 0x6e4   : > { %2529 = dma.vmem_to_hbm [thread:$0]  (%p3549_p2), %s3452_s9, 256, %s3450_s23, %s2096_s28, %s2948_s12, %s2948_s12, %s2949_s21  }
 0x6e5 PF: > { %s2124_s20 = sand.u32 1, %s2919_s24   ;;  %p3550_p7 = scmp.ne.s32.totalorder %s3528_s14, 0 }
 0x6e6   : > { %p3551_p3 = scmp.ge.s32.totalorder %s2931_s27, 2  ;;  %s2125_s30 = scalar_lea.sflag [#allocation4], %s2124_s20 }
 0x6e8   : > { %p2552_p8 = pnand %p3551_p3, %p3550_p7 }
 0x6ea   : > { %p2553_p9 = pneg %p2552_p8 }
 0x6ec   : > { %2914 = dma.done.wait (%p2553_p9), %s2125_s30, 256  }
 0x6ed   : > { %2916 = vsyncadd (%p2553_p9), %s2125_s30, 4294967040  ;;  %s3552_s27 = sld [smem:[#allocation20_spill]]  ;;  %s3555_s24 = smov %s2923_s25 }
 0x6ee   : > { %s3553_s8 = sld [smem:[#allocation19_spill]] }
 0x6ef   : > { %s3554_s26 = sld [smem:[#allocation21_spill]] }
 0x6f3   : > { %p25_p6 = scmp.ge.s32.totalorder %s3552_s27, 4  }
 0x6f4   : > { %s3556_s25 = smov %s3553_s8 }
 0x6f5   :  { %27 = sbr.rel (!%p25_p6) target bundleno = 12 (0xc), region = 132 }
 0x6fa   :  { %2130 = vsyncpa [#allocation3], 1 }
 0x6fb   :  { %2132 = vsyncpa [#allocation3 + $0x1], 1 }
 0x6fc   :  { %2133 = vsyncpa [#allocation6], 1 }
 0x6fd   :  { %2135 = vsyncpa [#allocation6 + $0x1], 1 }
 0x6fe   :  { %2136 = vsyncpa [#allocation9], 1 }
 0x6ff   :  { %2137 = vsyncpa [#allocation12], 1 }
 0x700   :  { %2138 = vsyncpa [#allocation4], 1 }
 0x701   :  { %2140 = vsyncpa [#allocation4 + $0x1], 1 }

</bundles_post_ra>
